<compile_context>
chip_gen: v6e
topology: v6e:2x2x1
jax: 0.10.0
libtpu: 0.0.40
codegen_flags: <defaults>
</compile_context>

<pallas_src>
import jax
import jax.numpy as jnp
from jax.experimental import pallas as pl
from jax.experimental.pallas import tpu as pltpu  # noqa: F401  (TPU backend assumed)

# ---- scaled-down CLIP ViT config (CLIP-ViT-B/32 structure, tiny sizes) ----
IMAGE = 32          # input image size
PATCH = 8           # patch size  -> 4x4 = 16 patches
CHANS = 3
HIDDEN = 64         # hidden dim
HEADS = 4
HEAD_DIM = HIDDEN // HEADS
MLP = 4 * HIDDEN    # CLIP intermediate size = 4 * hidden
LAYERS = 2          # number of encoder layers (ViT-B/32 has 12)
EPS = 1e-5
NUM_PATCHES = (IMAGE // PATCH) ** 2
SEQ = NUM_PATCHES + 1                    # +1 for [CLS] token
SEQ_PAD = ((SEQ + 7) // 8) * 8           # pad to sublane multiple (17 -> 24)
CPP = CHANS * PATCH * PATCH              # flattened patch length (192)
SCALE = HEAD_DIM ** -0.5
NEG_INF = -1e30


def _layernorm(x, g, b):
    mu = jnp.mean(x, axis=-1, keepdims=True)
    xc = x - mu
    var = jnp.mean(xc * xc, axis=-1, keepdims=True)
    return xc * jax.lax.rsqrt(var + EPS) * g + b


# ---------------------------------------------------------------------------
# Single fused Pallas kernel: patch embed + embeddings + pre-LN + encoder stack
# ---------------------------------------------------------------------------
def fused_clip_kernel(tokens_ref, patch_w_ref, addend_ref, mask_ref,
                      pre_g_ref, pre_b_ref,
                      ln1_g_ref, ln1_b_ref,
                      wqkv_ref, bqkv_ref, wo_ref, bo_ref,
                      ln2_g_ref, ln2_b_ref,
                      w1_ref, b1_ref, w2_ref, b2_ref,
                      out_ref):
    f32 = jnp.float32
    bf16 = jnp.bfloat16
    N = tokens_ref.shape[0]                                   # B * SEQ_PAD

    # ---- patch "conv" as one matmul; CLS / pad rows were zero-filled in wrapper ----
    x = jnp.dot(tokens_ref[...], patch_w_ref[...],
                preferred_element_type=f32)                   # (N, D) f32
    x = x + addend_ref[...]                                   # [CLS] + position emb (pre-tiled)
    x = _layernorm(x, pre_g_ref[...], pre_b_ref[...])         # CLIP pre_layrnorm

    mask = mask_ref[...]                                      # (N, N) block-diag + key-pad bias

    # MXU-natural batched contraction: lhs last dim vs rhs dim-1, batch over heads.
    dn_batched = (((2,), (1,)), ((0,), (0,)))

    for li in range(LAYERS):
        # ---------------- multi-head self-attention (pre-LN) ----------------
        h = _layernorm(x, ln1_g_ref[li], ln1_b_ref[li])       # (N, D) f32
        # fused QKV: one (N,64)@(64,192) push; Q columns pre-scaled by head_dim**-0.5
        qkv = jnp.dot(h.astype(bf16), wqkv_ref[li],
                      preferred_element_type=f32) + bqkv_ref[li]   # (N, 3D) f32
        q = qkv[:, :HIDDEN]
        k = qkv[:, HIDDEN:2 * HIDDEN]
        v = qkv[:, 2 * HIDDEN:]

        # one whole-slab transpose of K (instead of per-head implicit transposes)
        kT = jnp.transpose(k).reshape(HEADS, HEAD_DIM, N)     # (H, hd, N)
        # head split = cheap 16-lane slices
        qh = jnp.stack([q[:, i * HEAD_DIM:(i + 1) * HEAD_DIM]
                        for i in range(HEADS)], axis=0)       # (H, N, hd)
        vh = jnp.stack([v[:, i * HEAD_DIM:(i + 1) * HEAD_DIM]
                        for i in range(HEADS)], axis=0)       # (H, N, hd)

        s = jax.lax.dot_general(qh.astype(bf16), kT.astype(bf16),
                                dn_batched, preferred_element_type=f32)  # (H, N, N)
        s = s + mask                                          # mask other-image / pad keys
        s = s - jnp.max(s, axis=-1, keepdims=True)
        p = jnp.exp(s)
        p = p * pl.reciprocal(jnp.sum(p, axis=-1, keepdims=True))        # exact softmax
        ctx = jax.lax.dot_general(p.astype(bf16), vh.astype(bf16),
                                  dn_batched, preferred_element_type=f32)  # (H, N, hd)

        attn = jnp.concatenate([ctx[i] for i in range(HEADS)], axis=-1)  # (N, D)
        attn = jnp.dot(attn.astype(bf16), wo_ref[li],
                       preferred_element_type=f32) + bo_ref[li]
        x = x + attn                                          # residual

        # ---------------- MLP with QuickGELU (pre-LN) ----------------
        h = _layernorm(x, ln2_g_ref[li], ln2_b_ref[li])
        h1 = jnp.dot(h.astype(bf16), w1_ref[li],
                     preferred_element_type=f32) + b1_ref[li]   # (N, MLP)
        h1 = h1 * jax.nn.sigmoid(1.702 * h1)                    # QuickGELU (f32)
        h2 = jnp.dot(h1.astype(bf16), w2_ref[li],
                     preferred_element_type=f32) + b2_ref[li]
        x = x + h2                                              # residual

    out_ref[...] = x


# ---------------------------------------------------------------------------
# Weight repacking: PyTorch-style params -> kernel layout (fused QKV, stacked, bf16)
# ---------------------------------------------------------------------------
def pack_params(params):
    L = params['layers']
    bf = jnp.bfloat16
    stack = lambda k: jnp.stack([lp[k] for lp in L])

    # combined class-token + position embedding per (padded) token slot
    addend = jnp.zeros((SEQ_PAD, HIDDEN), jnp.float32)
    addend = addend.at[:SEQ, :].set(params['pos_emb'])
    addend = addend.at[0, :].add(params['class_emb'])

    # fused QKV weight / bias; 1/sqrt(head_dim) folded into the Q columns
    wqkv = jnp.stack([jnp.concatenate([lp['wq'] * SCALE, lp['wk'], lp['wv']], axis=1)
                      for lp in L]).astype(bf)                    # (L, D, 3D)
    bqkv = jnp.stack([jnp.concatenate([lp['bq'] * SCALE, lp['bk'], lp['bv']], axis=1)
                      for lp in L])                               # (L, 1, 3D)

    return {
        'patch_w': params['patch_w'].astype(bf),   # conv weight flattened & transposed
        'addend': addend,
        'pre_g': params['pre_ln_g'], 'pre_b': params['pre_ln_b'],
        'ln1_g': stack('ln1_g'), 'ln1_b': stack('ln1_b'),
        'wqkv': wqkv, 'bqkv': bqkv,
        'wo': stack('wo').astype(bf), 'bo': stack('bo'),
        'ln2_g': stack('ln2_g'), 'ln2_b': stack('ln2_b'),
        'w1': stack('w1').astype(bf), 'b1': stack('b1'),
        'w2': stack('w2').astype(bf), 'b2': stack('b2'),
    }


# ---------------------------------------------------------------------------
# Forward wrapper: XLA glue (patch extraction / padding / masks) + one pallas_call
# ---------------------------------------------------------------------------
def clip_vision_forward(pixel_values, params):
    """Returns last_hidden_state of shape (B, SEQ, HIDDEN)."""
    B = pixel_values.shape[0]
    N = B * SEQ_PAD
    g = IMAGE // PATCH
    kp = pack_params(params)

    # patch extraction (channel-major within a patch, matching Conv2d weight flatten),
    # placed into a zero-padded (B, SEQ_PAD, CPP) token slab: row 0 = CLS slot,
    # rows 1..NUM_PATCHES = patches, rows >= SEQ = padding.
    x = pixel_values.reshape(B, CHANS, g, PATCH, g, PATCH)
    x = x.transpose(0, 2, 4, 1, 3, 5).reshape(B, NUM_PATCHES, CPP)
    tokens = jnp.zeros((B, SEQ_PAD, CPP), jnp.float32)
    tokens = tokens.at[:, 1:1 + NUM_PATCHES, :].set(x)
    tokens = tokens.reshape(N, CPP).astype(jnp.bfloat16)

    # pre-tiled class-token + position embeddings for the whole token slab
    addend = jnp.tile(kp['addend'], (B, 1))                       # (N, D) f32

    # block-diagonal attention bias: query i may attend key j iff same image
    # and j is a real (non-padded) token.
    row = jnp.arange(N)[:, None]
    col = jnp.arange(N)[None, :]
    mask = jnp.where((row // SEQ_PAD == col // SEQ_PAD) & (col % SEQ_PAD < SEQ),
                     0.0, NEG_INF).astype(jnp.float32)            # (N, N)

    out = pl.pallas_call(
        fused_clip_kernel,
        out_shape=jax.ShapeDtypeStruct((N, HIDDEN), jnp.float32),
    )(tokens, kp['patch_w'], addend, mask, kp['pre_g'], kp['pre_b'],
      kp['ln1_g'], kp['ln1_b'], kp['wqkv'], kp['bqkv'], kp['wo'], kp['bo'],
      kp['ln2_g'], kp['ln2_b'], kp['w1'], kp['b1'], kp['w2'], kp['b2'])

    # drop the padded token rows; post_layernorm is intentionally not applied
    # to last_hidden_state (HF CLIP only applies it to the pooled [CLS]).
    return out.reshape(B, SEQ_PAD, HIDDEN)[:, :SEQ, :]


# ---------------------------------------------------------------------------
# Deterministic synthetic parameters (shapes mirror CLIPVisionModel modules)
# ---------------------------------------------------------------------------
def init_params(key):
    keys = iter(jax.random.split(key, 128))

    def nrm(shape, scale=0.02):
        return (scale * jax.random.normal(next(keys), shape)).astype(jnp.float32)

    params = {
        'patch_w': nrm((CPP, HIDDEN)),       # conv weight (D,C,P,P) flattened & transposed
        'class_emb': nrm((HIDDEN,)),
        'pos_emb': nrm((SEQ, HIDDEN)),
        'pre_ln_g': jnp.ones((1, HIDDEN), jnp.float32),
        'pre_ln_b': jnp.zeros((1, HIDDEN), jnp.float32),
        'layers': [],
    }
    for _ in range(LAYERS):
        params['layers'].append({
            'ln1_g': jnp.ones((1, HIDDEN), jnp.float32),
            'ln1_b': jnp.zeros((1, HIDDEN), jnp.float32),
            'wq': nrm((HIDDEN, HIDDEN)), 'bq': nrm((1, HIDDEN)),
            'wk': nrm((HIDDEN, HIDDEN)), 'bk': nrm((1, HIDDEN)),
            'wv': nrm((HIDDEN, HIDDEN)), 'bv': nrm((1, HIDDEN)),
            'wo': nrm((HIDDEN, HIDDEN)), 'bo': nrm((1, HIDDEN)),
            'ln2_g': jnp.ones((1, HIDDEN), jnp.float32),
            'ln2_b': jnp.zeros((1, HIDDEN), jnp.float32),
            'w1': nrm((HIDDEN, MLP)), 'b1': nrm((1, MLP)),
            'w2': nrm((MLP, HIDDEN)), 'b2': nrm((1, HIDDEN)),
        })
    return params


if __name__ == "__main__":
    key = jax.random.PRNGKey(0)
    pkey, xkey = jax.random.split(key)
    params = init_params(pkey)
    pixel_values = jax.random.normal(xkey, (2, CHANS, IMAGE, IMAGE), jnp.float32)

    fwd = jax.jit(clip_vision_forward)
    out = jax.block_until_ready(fwd(pixel_values, params))
    assert out.shape == (2, SEQ, HIDDEN), out.shape
    assert bool(jnp.all(jnp.isfinite(out)))
    print("KERNEL_OK")
</pallas_src>

<mosaic_0001>
module attributes {stable_mosaic.version = 11 : i64} {
  func.func @fused_clip_kernel(%arg0: memref<48x192xbf16, #tpu.memory_space<vmem>>, %arg1: memref<192x64xbf16, #tpu.memory_space<vmem>>, %arg2: memref<48x64xf32, #tpu.memory_space<vmem>>, %arg3: memref<48x48xf32, #tpu.memory_space<vmem>>, %arg4: memref<1x64xf32, #tpu.memory_space<vmem>>, %arg5: memref<1x64xf32, #tpu.memory_space<vmem>>, %arg6: memref<2x1x64xf32, #tpu.memory_space<vmem>>, %arg7: memref<2x1x64xf32, #tpu.memory_space<vmem>>, %arg8: memref<2x64x192xbf16, #tpu.memory_space<vmem>>, %arg9: memref<2x1x192xf32, #tpu.memory_space<vmem>>, %arg10: memref<2x64x64xbf16, #tpu.memory_space<vmem>>, %arg11: memref<2x1x64xf32, #tpu.memory_space<vmem>>, %arg12: memref<2x1x64xf32, #tpu.memory_space<vmem>>, %arg13: memref<2x1x64xf32, #tpu.memory_space<vmem>>, %arg14: memref<2x64x256xbf16, #tpu.memory_space<vmem>>, %arg15: memref<2x1x256xf32, #tpu.memory_space<vmem>>, %arg16: memref<2x256x64xbf16, #tpu.memory_space<vmem>>, %arg17: memref<2x1x64xf32, #tpu.memory_space<vmem>>, %arg18: memref<48x64xf32, #tpu.memory_space<vmem>>) attributes {dimension_semantics = [], scalar_prefetch = 0 : i64, scratch_operands = 0 : i64, tpu.core_type = #tpu.core_type<tc>} {
    %c0 = arith.constant 0 : index
    %c0_0 = arith.constant 0 : index
    %0 = vector.load %arg0[%c0, %c0_0] : memref<48x192xbf16, #tpu.memory_space<vmem>>, vector<48x192xbf16>
    %c0_1 = arith.constant 0 : index
    %c0_2 = arith.constant 0 : index
    %1 = vector.load %arg1[%c0_1, %c0_2] : memref<192x64xbf16, #tpu.memory_space<vmem>>, vector<192x64xbf16>
    %cst = arith.constant dense<0.000000e+00> : vector<48x64xf32>
    %2 = tpu.matmul %0, %1, %cst {dimension_numbers = #tpu.dot_dimension_numbers<[1], [0], [0], [1], [0, 0, 1, 1], [], []>} : vector<48x192xbf16>, vector<192x64xbf16>, vector<48x64xf32> -> vector<48x64xf32>
    %c0_3 = arith.constant 0 : index
    %c0_4 = arith.constant 0 : index
    %3 = vector.load %arg2[%c0_3, %c0_4] : memref<48x64xf32, #tpu.memory_space<vmem>>, vector<48x64xf32>
    %4 = arith.addf %2, %3 : vector<48x64xf32>
    %c0_5 = arith.constant 0 : index
    %c0_6 = arith.constant 0 : index
    %5 = vector.load %arg4[%c0_5, %c0_6] : memref<1x64xf32, #tpu.memory_space<vmem>>, vector<1x64xf32>
    %c0_7 = arith.constant 0 : index
    %c0_8 = arith.constant 0 : index
    %6 = vector.load %arg5[%c0_7, %c0_8] : memref<1x64xf32, #tpu.memory_space<vmem>>, vector<1x64xf32>
    %cst_9 = arith.constant dense<0.000000e+00> : vector<48xf32>
    %7 = vector.multi_reduction <add>, %4, %cst_9 [1] : vector<48x64xf32> to vector<48xf32>
    %8 = vector.shape_cast %7 : vector<48xf32> to vector<48x1xf32>
    %cst_10 = arith.constant 6.400000e+01 : f32
    %9 = vector.broadcast %cst_10 : f32 to vector<48x1xf32>
    %10 = arith.divf %8, %9 : vector<48x1xf32>
    %11 = vector.broadcast %10 : vector<48x1xf32> to vector<48x64xf32>
    %12 = arith.subf %4, %11 : vector<48x64xf32>
    %13 = arith.mulf %12, %12 : vector<48x64xf32>
    %cst_11 = arith.constant dense<0.000000e+00> : vector<48xf32>
    %14 = vector.multi_reduction <add>, %13, %cst_11 [1] : vector<48x64xf32> to vector<48xf32>
    %15 = vector.shape_cast %14 : vector<48xf32> to vector<48x1xf32>
    %cst_12 = arith.constant 6.400000e+01 : f32
    %16 = vector.broadcast %cst_12 : f32 to vector<48x1xf32>
    %17 = arith.divf %15, %16 : vector<48x1xf32>
    %cst_13 = arith.constant 9.99999974E-6 : f32
    %18 = vector.broadcast %cst_13 : f32 to vector<48x1xf32>
    %19 = arith.addf %17, %18 : vector<48x1xf32>
    %20 = math.rsqrt %19 : vector<48x1xf32>
    %21 = vector.broadcast %20 : vector<48x1xf32> to vector<48x64xf32>
    %22 = arith.mulf %12, %21 : vector<48x64xf32>
    %23 = vector.broadcast %5 : vector<1x64xf32> to vector<48x64xf32>
    %24 = arith.mulf %22, %23 : vector<48x64xf32>
    %25 = vector.broadcast %6 : vector<1x64xf32> to vector<48x64xf32>
    %26 = arith.addf %24, %25 : vector<48x64xf32>
    %c0_14 = arith.constant 0 : index
    %c0_15 = arith.constant 0 : index
    %27 = vector.load %arg3[%c0_14, %c0_15] : memref<48x48xf32, #tpu.memory_space<vmem>>, vector<48x48xf32>
    %c0_16 = arith.constant 0 : index
    %c0_17 = arith.constant 0 : index
    %c0_18 = arith.constant 0 : index
    %28 = vector.load %arg6[%c0_16, %c0_17, %c0_18] : memref<2x1x64xf32, #tpu.memory_space<vmem>>, vector<1x1x64xf32>
    %29 = vector.shape_cast %28 : vector<1x1x64xf32> to vector<1x64xf32>
    %c0_19 = arith.constant 0 : index
    %c0_20 = arith.constant 0 : index
    %c0_21 = arith.constant 0 : index
    %30 = vector.load %arg7[%c0_19, %c0_20, %c0_21] : memref<2x1x64xf32, #tpu.memory_space<vmem>>, vector<1x1x64xf32>
    %31 = vector.shape_cast %30 : vector<1x1x64xf32> to vector<1x64xf32>
    %cst_22 = arith.constant dense<0.000000e+00> : vector<48xf32>
    %32 = vector.multi_reduction <add>, %26, %cst_22 [1] : vector<48x64xf32> to vector<48xf32>
    %33 = vector.shape_cast %32 : vector<48xf32> to vector<48x1xf32>
    %cst_23 = arith.constant 6.400000e+01 : f32
    %34 = vector.broadcast %cst_23 : f32 to vector<48x1xf32>
    %35 = arith.divf %33, %34 : vector<48x1xf32>
    %36 = vector.broadcast %35 : vector<48x1xf32> to vector<48x64xf32>
    %37 = arith.subf %26, %36 : vector<48x64xf32>
    %38 = arith.mulf %37, %37 : vector<48x64xf32>
    %cst_24 = arith.constant dense<0.000000e+00> : vector<48xf32>
    %39 = vector.multi_reduction <add>, %38, %cst_24 [1] : vector<48x64xf32> to vector<48xf32>
    %40 = vector.shape_cast %39 : vector<48xf32> to vector<48x1xf32>
    %cst_25 = arith.constant 6.400000e+01 : f32
    %41 = vector.broadcast %cst_25 : f32 to vector<48x1xf32>
    %42 = arith.divf %40, %41 : vector<48x1xf32>
    %cst_26 = arith.constant 9.99999974E-6 : f32
    %43 = vector.broadcast %cst_26 : f32 to vector<48x1xf32>
    %44 = arith.addf %42, %43 : vector<48x1xf32>
    %45 = math.rsqrt %44 : vector<48x1xf32>
    %46 = vector.broadcast %45 : vector<48x1xf32> to vector<48x64xf32>
    %47 = arith.mulf %37, %46 : vector<48x64xf32>
    %48 = vector.broadcast %29 : vector<1x64xf32> to vector<48x64xf32>
    %49 = arith.mulf %47, %48 : vector<48x64xf32>
    %50 = vector.broadcast %31 : vector<1x64xf32> to vector<48x64xf32>
    %51 = arith.addf %49, %50 : vector<48x64xf32>
    %52 = arith.truncf %51 : vector<48x64xf32> to vector<48x64xbf16>
    %c0_27 = arith.constant 0 : index
    %c0_28 = arith.constant 0 : index
    %c0_29 = arith.constant 0 : index
    %53 = vector.load %arg8[%c0_27, %c0_28, %c0_29] : memref<2x64x192xbf16, #tpu.memory_space<vmem>>, vector<1x64x192xbf16>
    %54 = vector.shape_cast %53 : vector<1x64x192xbf16> to vector<64x192xbf16>
    %cst_30 = arith.constant dense<0.000000e+00> : vector<48x192xf32>
    %55 = tpu.matmul %52, %54, %cst_30 {dimension_numbers = #tpu.dot_dimension_numbers<[1], [0], [0], [1], [0, 0, 1, 1], [], []>} : vector<48x64xbf16>, vector<64x192xbf16>, vector<48x192xf32> -> vector<48x192xf32>
    %c0_31 = arith.constant 0 : index
    %c0_32 = arith.constant 0 : index
    %c0_33 = arith.constant 0 : index
    %56 = vector.load %arg9[%c0_31, %c0_32, %c0_33] : memref<2x1x192xf32, #tpu.memory_space<vmem>>, vector<1x1x192xf32>
    %57 = vector.shape_cast %56 : vector<1x1x192xf32> to vector<1x192xf32>
    %58 = vector.broadcast %57 : vector<1x192xf32> to vector<48x192xf32>
    %59 = arith.addf %55, %58 : vector<48x192xf32>
    %60 = vector.extract_strided_slice %59 {offsets = [0, 0], sizes = [48, 64], strides = [1, 1]} : vector<48x192xf32> to vector<48x64xf32>
    %61 = vector.extract_strided_slice %59 {offsets = [0, 64], sizes = [48, 64], strides = [1, 1]} : vector<48x192xf32> to vector<48x64xf32>
    %62 = vector.extract_strided_slice %59 {offsets = [0, 128], sizes = [48, 64], strides = [1, 1]} : vector<48x192xf32> to vector<48x64xf32>
    %63 = tpu.transpose %61, [1, 0] : vector<48x64xf32> -> vector<64x48xf32>
    %64 = vector.shape_cast %63 : vector<64x48xf32> to vector<4x16x48xf32>
    %65 = vector.extract_strided_slice %60 {offsets = [0, 0], sizes = [48, 16], strides = [1, 1]} : vector<48x64xf32> to vector<48x16xf32>
    %66 = vector.extract_strided_slice %60 {offsets = [0, 16], sizes = [48, 16], strides = [1, 1]} : vector<48x64xf32> to vector<48x16xf32>
    %67 = vector.extract_strided_slice %60 {offsets = [0, 32], sizes = [48, 16], strides = [1, 1]} : vector<48x64xf32> to vector<48x16xf32>
    %68 = vector.extract_strided_slice %60 {offsets = [0, 48], sizes = [48, 16], strides = [1, 1]} : vector<48x64xf32> to vector<48x16xf32>
    %69 = vector.shape_cast %65 : vector<48x16xf32> to vector<1x48x16xf32>
    %70 = vector.shape_cast %66 : vector<48x16xf32> to vector<1x48x16xf32>
    %71 = vector.shape_cast %67 : vector<48x16xf32> to vector<1x48x16xf32>
    %72 = vector.shape_cast %68 : vector<48x16xf32> to vector<1x48x16xf32>
    %73 = tpu.concatenate %69, %70, %71, %72 in 0 : vector<1x48x16xf32>, vector<1x48x16xf32>, vector<1x48x16xf32>, vector<1x48x16xf32> -> vector<4x48x16xf32>
    %74 = vector.extract_strided_slice %62 {offsets = [0, 0], sizes = [48, 16], strides = [1, 1]} : vector<48x64xf32> to vector<48x16xf32>
    %75 = vector.extract_strided_slice %62 {offsets = [0, 16], sizes = [48, 16], strides = [1, 1]} : vector<48x64xf32> to vector<48x16xf32>
    %76 = vector.extract_strided_slice %62 {offsets = [0, 32], sizes = [48, 16], strides = [1, 1]} : vector<48x64xf32> to vector<48x16xf32>
    %77 = vector.extract_strided_slice %62 {offsets = [0, 48], sizes = [48, 16], strides = [1, 1]} : vector<48x64xf32> to vector<48x16xf32>
    %78 = vector.shape_cast %74 : vector<48x16xf32> to vector<1x48x16xf32>
    %79 = vector.shape_cast %75 : vector<48x16xf32> to vector<1x48x16xf32>
    %80 = vector.shape_cast %76 : vector<48x16xf32> to vector<1x48x16xf32>
    %81 = vector.shape_cast %77 : vector<48x16xf32> to vector<1x48x16xf32>
    %82 = tpu.concatenate %78, %79, %80, %81 in 0 : vector<1x48x16xf32>, vector<1x48x16xf32>, vector<1x48x16xf32>, vector<1x48x16xf32> -> vector<4x48x16xf32>
    %83 = arith.truncf %73 : vector<4x48x16xf32> to vector<4x48x16xbf16>
    %84 = arith.truncf %64 : vector<4x16x48xf32> to vector<4x16x48xbf16>
    %cst_34 = arith.constant dense<0.000000e+00> : vector<4x48x48xf32>
    %85 = tpu.matmul %83, %84, %cst_34 {dimension_numbers = #tpu.dot_dimension_numbers<[2], [1], [1], [2], [0, 0, 0, 1, 1, 2], [0], [0]>} : vector<4x48x16xbf16>, vector<4x16x48xbf16>, vector<4x48x48xf32> -> vector<4x48x48xf32>
    %86 = vector.shape_cast %27 : vector<48x48xf32> to vector<1x48x48xf32>
    %87 = vector.broadcast %86 : vector<1x48x48xf32> to vector<4x48x48xf32>
    %88 = arith.addf %85, %87 : vector<4x48x48xf32>
    %cst_35 = arith.constant dense<0xFF800000> : vector<4x48xf32>
    %89 = vector.multi_reduction <maximumf>, %88, %cst_35 [2] : vector<4x48x48xf32> to vector<4x48xf32>
    %90 = vector.shape_cast %89 : vector<4x48xf32> to vector<4x48x1xf32>
    %91 = vector.broadcast %90 : vector<4x48x1xf32> to vector<4x48x48xf32>
    %92 = arith.subf %88, %91 : vector<4x48x48xf32>
    %93 = math.exp %92 : vector<4x48x48xf32>
    %cst_36 = arith.constant dense<0.000000e+00> : vector<4x48xf32>
    %94 = vector.multi_reduction <add>, %93, %cst_36 [2] : vector<4x48x48xf32> to vector<4x48xf32>
    %95 = vector.shape_cast %94 : vector<4x48xf32> to vector<4x48x1xf32>
    %96 = tpu.reciprocal %95 : vector<4x48x1xf32> -> vector<4x48x1xf32>
    %97 = vector.broadcast %96 : vector<4x48x1xf32> to vector<4x48x48xf32>
    %98 = arith.mulf %93, %97 : vector<4x48x48xf32>
    %99 = arith.truncf %98 : vector<4x48x48xf32> to vector<4x48x48xbf16>
    %100 = arith.truncf %82 : vector<4x48x16xf32> to vector<4x48x16xbf16>
    %cst_37 = arith.constant dense<0.000000e+00> : vector<4x48x16xf32>
    %101 = tpu.matmul %99, %100, %cst_37 {dimension_numbers = #tpu.dot_dimension_numbers<[2], [1], [1], [2], [0, 0, 0, 1, 1, 2], [0], [0]>} : vector<4x48x48xbf16>, vector<4x48x16xbf16>, vector<4x48x16xf32> -> vector<4x48x16xf32>
    %102 = vector.extract_strided_slice %101 {offsets = [0, 0, 0], sizes = [1, 48, 16], strides = [1, 1, 1]} : vector<4x48x16xf32> to vector<1x48x16xf32>
    %103 = vector.shape_cast %102 : vector<1x48x16xf32> to vector<48x16xf32>
    %104 = vector.extract_strided_slice %101 {offsets = [1, 0, 0], sizes = [1, 48, 16], strides = [1, 1, 1]} : vector<4x48x16xf32> to vector<1x48x16xf32>
    %105 = vector.shape_cast %104 : vector<1x48x16xf32> to vector<48x16xf32>
    %106 = vector.extract_strided_slice %101 {offsets = [2, 0, 0], sizes = [1, 48, 16], strides = [1, 1, 1]} : vector<4x48x16xf32> to vector<1x48x16xf32>
    %107 = vector.shape_cast %106 : vector<1x48x16xf32> to vector<48x16xf32>
    %108 = vector.extract_strided_slice %101 {offsets = [3, 0, 0], sizes = [1, 48, 16], strides = [1, 1, 1]} : vector<4x48x16xf32> to vector<1x48x16xf32>
    %109 = vector.shape_cast %108 : vector<1x48x16xf32> to vector<48x16xf32>
    %110 = tpu.concatenate %103, %105, %107, %109 in 1 : vector<48x16xf32>, vector<48x16xf32>, vector<48x16xf32>, vector<48x16xf32> -> vector<48x64xf32>
    %111 = arith.truncf %110 : vector<48x64xf32> to vector<48x64xbf16>
    %c0_38 = arith.constant 0 : index
    %c0_39 = arith.constant 0 : index
    %c0_40 = arith.constant 0 : index
    %112 = vector.load %arg10[%c0_38, %c0_39, %c0_40] : memref<2x64x64xbf16, #tpu.memory_space<vmem>>, vector<1x64x64xbf16>
    %113 = vector.shape_cast %112 : vector<1x64x64xbf16> to vector<64x64xbf16>
    %cst_41 = arith.constant dense<0.000000e+00> : vector<48x64xf32>
    %114 = tpu.matmul %111, %113, %cst_41 {dimension_numbers = #tpu.dot_dimension_numbers<[1], [0], [0], [1], [0, 0, 1, 1], [], []>} : vector<48x64xbf16>, vector<64x64xbf16>, vector<48x64xf32> -> vector<48x64xf32>
    %c0_42 = arith.constant 0 : index
    %c0_43 = arith.constant 0 : index
    %c0_44 = arith.constant 0 : index
    %115 = vector.load %arg11[%c0_42, %c0_43, %c0_44] : memref<2x1x64xf32, #tpu.memory_space<vmem>>, vector<1x1x64xf32>
    %116 = vector.shape_cast %115 : vector<1x1x64xf32> to vector<1x64xf32>
    %117 = vector.broadcast %116 : vector<1x64xf32> to vector<48x64xf32>
    %118 = arith.addf %114, %117 : vector<48x64xf32>
    %119 = arith.addf %26, %118 : vector<48x64xf32>
    %c0_45 = arith.constant 0 : index
    %c0_46 = arith.constant 0 : index
    %c0_47 = arith.constant 0 : index
    %120 = vector.load %arg12[%c0_45, %c0_46, %c0_47] : memref<2x1x64xf32, #tpu.memory_space<vmem>>, vector<1x1x64xf32>
    %121 = vector.shape_cast %120 : vector<1x1x64xf32> to vector<1x64xf32>
    %c0_48 = arith.constant 0 : index
    %c0_49 = arith.constant 0 : index
    %c0_50 = arith.constant 0 : index
    %122 = vector.load %arg13[%c0_48, %c0_49, %c0_50] : memref<2x1x64xf32, #tpu.memory_space<vmem>>, vector<1x1x64xf32>
    %123 = vector.shape_cast %122 : vector<1x1x64xf32> to vector<1x64xf32>
    %cst_51 = arith.constant dense<0.000000e+00> : vector<48xf32>
    %124 = vector.multi_reduction <add>, %119, %cst_51 [1] : vector<48x64xf32> to vector<48xf32>
    %125 = vector.shape_cast %124 : vector<48xf32> to vector<48x1xf32>
    %cst_52 = arith.constant 6.400000e+01 : f32
    %126 = vector.broadcast %cst_52 : f32 to vector<48x1xf32>
    %127 = arith.divf %125, %126 : vector<48x1xf32>
    %128 = vector.broadcast %127 : vector<48x1xf32> to vector<48x64xf32>
    %129 = arith.subf %119, %128 : vector<48x64xf32>
    %130 = arith.mulf %129, %129 : vector<48x64xf32>
    %cst_53 = arith.constant dense<0.000000e+00> : vector<48xf32>
    %131 = vector.multi_reduction <add>, %130, %cst_53 [1] : vector<48x64xf32> to vector<48xf32>
    %132 = vector.shape_cast %131 : vector<48xf32> to vector<48x1xf32>
    %cst_54 = arith.constant 6.400000e+01 : f32
    %133 = vector.broadcast %cst_54 : f32 to vector<48x1xf32>
    %134 = arith.divf %132, %133 : vector<48x1xf32>
    %cst_55 = arith.constant 9.99999974E-6 : f32
    %135 = vector.broadcast %cst_55 : f32 to vector<48x1xf32>
    %136 = arith.addf %134, %135 : vector<48x1xf32>
    %137 = math.rsqrt %136 : vector<48x1xf32>
    %138 = vector.broadcast %137 : vector<48x1xf32> to vector<48x64xf32>
    %139 = arith.mulf %129, %138 : vector<48x64xf32>
    %140 = vector.broadcast %121 : vector<1x64xf32> to vector<48x64xf32>
    %141 = arith.mulf %139, %140 : vector<48x64xf32>
    %142 = vector.broadcast %123 : vector<1x64xf32> to vector<48x64xf32>
    %143 = arith.addf %141, %142 : vector<48x64xf32>
    %144 = arith.truncf %143 : vector<48x64xf32> to vector<48x64xbf16>
    %c0_56 = arith.constant 0 : index
    %c0_57 = arith.constant 0 : index
    %c0_58 = arith.constant 0 : index
    %145 = vector.load %arg14[%c0_56, %c0_57, %c0_58] : memref<2x64x256xbf16, #tpu.memory_space<vmem>>, vector<1x64x256xbf16>
    %146 = vector.shape_cast %145 : vector<1x64x256xbf16> to vector<64x256xbf16>
    %cst_59 = arith.constant dense<0.000000e+00> : vector<48x256xf32>
    %147 = tpu.matmul %144, %146, %cst_59 {dimension_numbers = #tpu.dot_dimension_numbers<[1], [0], [0], [1], [0, 0, 1, 1], [], []>} : vector<48x64xbf16>, vector<64x256xbf16>, vector<48x256xf32> -> vector<48x256xf32>
    %c0_60 = arith.constant 0 : index
    %c0_61 = arith.constant 0 : index
    %c0_62 = arith.constant 0 : index
    %148 = vector.load %arg15[%c0_60, %c0_61, %c0_62] : memref<2x1x256xf32, #tpu.memory_space<vmem>>, vector<1x1x256xf32>
    %149 = vector.shape_cast %148 : vector<1x1x256xf32> to vector<1x256xf32>
    %150 = vector.broadcast %149 : vector<1x256xf32> to vector<48x256xf32>
    %151 = arith.addf %147, %150 : vector<48x256xf32>
    %cst_63 = arith.constant 1.702000e+00 : f32
    %152 = vector.broadcast %cst_63 : f32 to vector<48x256xf32>
    %153 = arith.mulf %152, %151 : vector<48x256xf32>
    %154 = arith.negf %153 : vector<48x256xf32>
    %155 = math.exp %154 : vector<48x256xf32>
    %cst_64 = arith.constant 1.000000e+00 : f32
    %156 = vector.broadcast %cst_64 : f32 to vector<48x256xf32>
    %157 = arith.addf %156, %155 : vector<48x256xf32>
    %158 = arith.divf %156, %157 : vector<48x256xf32>
    %159 = arith.mulf %151, %158 : vector<48x256xf32>
    %160 = arith.truncf %159 : vector<48x256xf32> to vector<48x256xbf16>
    %c0_65 = arith.constant 0 : index
    %c0_66 = arith.constant 0 : index
    %c0_67 = arith.constant 0 : index
    %161 = vector.load %arg16[%c0_65, %c0_66, %c0_67] : memref<2x256x64xbf16, #tpu.memory_space<vmem>>, vector<1x256x64xbf16>
    %162 = vector.shape_cast %161 : vector<1x256x64xbf16> to vector<256x64xbf16>
    %cst_68 = arith.constant dense<0.000000e+00> : vector<48x64xf32>
    %163 = tpu.matmul %160, %162, %cst_68 {dimension_numbers = #tpu.dot_dimension_numbers<[1], [0], [0], [1], [0, 0, 1, 1], [], []>} : vector<48x256xbf16>, vector<256x64xbf16>, vector<48x64xf32> -> vector<48x64xf32>
    %c0_69 = arith.constant 0 : index
    %c0_70 = arith.constant 0 : index
    %c0_71 = arith.constant 0 : index
    %164 = vector.load %arg17[%c0_69, %c0_70, %c0_71] : memref<2x1x64xf32, #tpu.memory_space<vmem>>, vector<1x1x64xf32>
    %165 = vector.shape_cast %164 : vector<1x1x64xf32> to vector<1x64xf32>
    %166 = vector.broadcast %165 : vector<1x64xf32> to vector<48x64xf32>
    %167 = arith.addf %163, %166 : vector<48x64xf32>
    %168 = arith.addf %119, %167 : vector<48x64xf32>
    %c1 = arith.constant 1 : index
    %c0_72 = arith.constant 0 : index
    %c0_73 = arith.constant 0 : index
    %169 = vector.load %arg6[%c1, %c0_72, %c0_73] : memref<2x1x64xf32, #tpu.memory_space<vmem>>, vector<1x1x64xf32>
    %170 = vector.shape_cast %169 : vector<1x1x64xf32> to vector<1x64xf32>
    %c1_74 = arith.constant 1 : index
    %c0_75 = arith.constant 0 : index
    %c0_76 = arith.constant 0 : index
    %171 = vector.load %arg7[%c1_74, %c0_75, %c0_76] : memref<2x1x64xf32, #tpu.memory_space<vmem>>, vector<1x1x64xf32>
    %172 = vector.shape_cast %171 : vector<1x1x64xf32> to vector<1x64xf32>
    %cst_77 = arith.constant dense<0.000000e+00> : vector<48xf32>
    %173 = vector.multi_reduction <add>, %168, %cst_77 [1] : vector<48x64xf32> to vector<48xf32>
    %174 = vector.shape_cast %173 : vector<48xf32> to vector<48x1xf32>
    %cst_78 = arith.constant 6.400000e+01 : f32
    %175 = vector.broadcast %cst_78 : f32 to vector<48x1xf32>
    %176 = arith.divf %174, %175 : vector<48x1xf32>
    %177 = vector.broadcast %176 : vector<48x1xf32> to vector<48x64xf32>
    %178 = arith.subf %168, %177 : vector<48x64xf32>
    %179 = arith.mulf %178, %178 : vector<48x64xf32>
    %cst_79 = arith.constant dense<0.000000e+00> : vector<48xf32>
    %180 = vector.multi_reduction <add>, %179, %cst_79 [1] : vector<48x64xf32> to vector<48xf32>
    %181 = vector.shape_cast %180 : vector<48xf32> to vector<48x1xf32>
    %cst_80 = arith.constant 6.400000e+01 : f32
    %182 = vector.broadcast %cst_80 : f32 to vector<48x1xf32>
    %183 = arith.divf %181, %182 : vector<48x1xf32>
    %cst_81 = arith.constant 9.99999974E-6 : f32
    %184 = vector.broadcast %cst_81 : f32 to vector<48x1xf32>
    %185 = arith.addf %183, %184 : vector<48x1xf32>
    %186 = math.rsqrt %185 : vector<48x1xf32>
    %187 = vector.broadcast %186 : vector<48x1xf32> to vector<48x64xf32>
    %188 = arith.mulf %178, %187 : vector<48x64xf32>
    %189 = vector.broadcast %170 : vector<1x64xf32> to vector<48x64xf32>
    %190 = arith.mulf %188, %189 : vector<48x64xf32>
    %191 = vector.broadcast %172 : vector<1x64xf32> to vector<48x64xf32>
    %192 = arith.addf %190, %191 : vector<48x64xf32>
    %193 = arith.truncf %192 : vector<48x64xf32> to vector<48x64xbf16>
    %c1_82 = arith.constant 1 : index
    %c0_83 = arith.constant 0 : index
    %c0_84 = arith.constant 0 : index
    %194 = vector.load %arg8[%c1_82, %c0_83, %c0_84] : memref<2x64x192xbf16, #tpu.memory_space<vmem>>, vector<1x64x192xbf16>
    %195 = vector.shape_cast %194 : vector<1x64x192xbf16> to vector<64x192xbf16>
    %cst_85 = arith.constant dense<0.000000e+00> : vector<48x192xf32>
    %196 = tpu.matmul %193, %195, %cst_85 {dimension_numbers = #tpu.dot_dimension_numbers<[1], [0], [0], [1], [0, 0, 1, 1], [], []>} : vector<48x64xbf16>, vector<64x192xbf16>, vector<48x192xf32> -> vector<48x192xf32>
    %c1_86 = arith.constant 1 : index
    %c0_87 = arith.constant 0 : index
    %c0_88 = arith.constant 0 : index
    %197 = vector.load %arg9[%c1_86, %c0_87, %c0_88] : memref<2x1x192xf32, #tpu.memory_space<vmem>>, vector<1x1x192xf32>
    %198 = vector.shape_cast %197 : vector<1x1x192xf32> to vector<1x192xf32>
    %199 = vector.broadcast %198 : vector<1x192xf32> to vector<48x192xf32>
    %200 = arith.addf %196, %199 : vector<48x192xf32>
    %201 = vector.extract_strided_slice %200 {offsets = [0, 0], sizes = [48, 64], strides = [1, 1]} : vector<48x192xf32> to vector<48x64xf32>
    %202 = vector.extract_strided_slice %200 {offsets = [0, 64], sizes = [48, 64], strides = [1, 1]} : vector<48x192xf32> to vector<48x64xf32>
    %203 = vector.extract_strided_slice %200 {offsets = [0, 128], sizes = [48, 64], strides = [1, 1]} : vector<48x192xf32> to vector<48x64xf32>
    %204 = tpu.transpose %202, [1, 0] : vector<48x64xf32> -> vector<64x48xf32>
    %205 = vector.shape_cast %204 : vector<64x48xf32> to vector<4x16x48xf32>
    %206 = vector.extract_strided_slice %201 {offsets = [0, 0], sizes = [48, 16], strides = [1, 1]} : vector<48x64xf32> to vector<48x16xf32>
    %207 = vector.extract_strided_slice %201 {offsets = [0, 16], sizes = [48, 16], strides = [1, 1]} : vector<48x64xf32> to vector<48x16xf32>
    %208 = vector.extract_strided_slice %201 {offsets = [0, 32], sizes = [48, 16], strides = [1, 1]} : vector<48x64xf32> to vector<48x16xf32>
    %209 = vector.extract_strided_slice %201 {offsets = [0, 48], sizes = [48, 16], strides = [1, 1]} : vector<48x64xf32> to vector<48x16xf32>
    %210 = vector.shape_cast %206 : vector<48x16xf32> to vector<1x48x16xf32>
    %211 = vector.shape_cast %207 : vector<48x16xf32> to vector<1x48x16xf32>
    %212 = vector.shape_cast %208 : vector<48x16xf32> to vector<1x48x16xf32>
    %213 = vector.shape_cast %209 : vector<48x16xf32> to vector<1x48x16xf32>
    %214 = tpu.concatenate %210, %211, %212, %213 in 0 : vector<1x48x16xf32>, vector<1x48x16xf32>, vector<1x48x16xf32>, vector<1x48x16xf32> -> vector<4x48x16xf32>
    %215 = vector.extract_strided_slice %203 {offsets = [0, 0], sizes = [48, 16], strides = [1, 1]} : vector<48x64xf32> to vector<48x16xf32>
    %216 = vector.extract_strided_slice %203 {offsets = [0, 16], sizes = [48, 16], strides = [1, 1]} : vector<48x64xf32> to vector<48x16xf32>
    %217 = vector.extract_strided_slice %203 {offsets = [0, 32], sizes = [48, 16], strides = [1, 1]} : vector<48x64xf32> to vector<48x16xf32>
    %218 = vector.extract_strided_slice %203 {offsets = [0, 48], sizes = [48, 16], strides = [1, 1]} : vector<48x64xf32> to vector<48x16xf32>
    %219 = vector.shape_cast %215 : vector<48x16xf32> to vector<1x48x16xf32>
    %220 = vector.shape_cast %216 : vector<48x16xf32> to vector<1x48x16xf32>
    %221 = vector.shape_cast %217 : vector<48x16xf32> to vector<1x48x16xf32>
    %222 = vector.shape_cast %218 : vector<48x16xf32> to vector<1x48x16xf32>
    %223 = tpu.concatenate %219, %220, %221, %222 in 0 : vector<1x48x16xf32>, vector<1x48x16xf32>, vector<1x48x16xf32>, vector<1x48x16xf32> -> vector<4x48x16xf32>
    %224 = arith.truncf %214 : vector<4x48x16xf32> to vector<4x48x16xbf16>
    %225 = arith.truncf %205 : vector<4x16x48xf32> to vector<4x16x48xbf16>
    %cst_89 = arith.constant dense<0.000000e+00> : vector<4x48x48xf32>
    %226 = tpu.matmul %224, %225, %cst_89 {dimension_numbers = #tpu.dot_dimension_numbers<[2], [1], [1], [2], [0, 0, 0, 1, 1, 2], [0], [0]>} : vector<4x48x16xbf16>, vector<4x16x48xbf16>, vector<4x48x48xf32> -> vector<4x48x48xf32>
    %227 = vector.shape_cast %27 : vector<48x48xf32> to vector<1x48x48xf32>
    %228 = vector.broadcast %227 : vector<1x48x48xf32> to vector<4x48x48xf32>
    %229 = arith.addf %226, %228 : vector<4x48x48xf32>
    %cst_90 = arith.constant dense<0xFF800000> : vector<4x48xf32>
    %230 = vector.multi_reduction <maximumf>, %229, %cst_90 [2] : vector<4x48x48xf32> to vector<4x48xf32>
    %231 = vector.shape_cast %230 : vector<4x48xf32> to vector<4x48x1xf32>
    %232 = vector.broadcast %231 : vector<4x48x1xf32> to vector<4x48x48xf32>
    %233 = arith.subf %229, %232 : vector<4x48x48xf32>
    %234 = math.exp %233 : vector<4x48x48xf32>
    %cst_91 = arith.constant dense<0.000000e+00> : vector<4x48xf32>
    %235 = vector.multi_reduction <add>, %234, %cst_91 [2] : vector<4x48x48xf32> to vector<4x48xf32>
    %236 = vector.shape_cast %235 : vector<4x48xf32> to vector<4x48x1xf32>
    %237 = tpu.reciprocal %236 : vector<4x48x1xf32> -> vector<4x48x1xf32>
    %238 = vector.broadcast %237 : vector<4x48x1xf32> to vector<4x48x48xf32>
    %239 = arith.mulf %234, %238 : vector<4x48x48xf32>
    %240 = arith.truncf %239 : vector<4x48x48xf32> to vector<4x48x48xbf16>
    %241 = arith.truncf %223 : vector<4x48x16xf32> to vector<4x48x16xbf16>
    %cst_92 = arith.constant dense<0.000000e+00> : vector<4x48x16xf32>
    %242 = tpu.matmul %240, %241, %cst_92 {dimension_numbers = #tpu.dot_dimension_numbers<[2], [1], [1], [2], [0, 0, 0, 1, 1, 2], [0], [0]>} : vector<4x48x48xbf16>, vector<4x48x16xbf16>, vector<4x48x16xf32> -> vector<4x48x16xf32>
    %243 = vector.extract_strided_slice %242 {offsets = [0, 0, 0], sizes = [1, 48, 16], strides = [1, 1, 1]} : vector<4x48x16xf32> to vector<1x48x16xf32>
    %244 = vector.shape_cast %243 : vector<1x48x16xf32> to vector<48x16xf32>
    %245 = vector.extract_strided_slice %242 {offsets = [1, 0, 0], sizes = [1, 48, 16], strides = [1, 1, 1]} : vector<4x48x16xf32> to vector<1x48x16xf32>
    %246 = vector.shape_cast %245 : vector<1x48x16xf32> to vector<48x16xf32>
    %247 = vector.extract_strided_slice %242 {offsets = [2, 0, 0], sizes = [1, 48, 16], strides = [1, 1, 1]} : vector<4x48x16xf32> to vector<1x48x16xf32>
    %248 = vector.shape_cast %247 : vector<1x48x16xf32> to vector<48x16xf32>
    %249 = vector.extract_strided_slice %242 {offsets = [3, 0, 0], sizes = [1, 48, 16], strides = [1, 1, 1]} : vector<4x48x16xf32> to vector<1x48x16xf32>
    %250 = vector.shape_cast %249 : vector<1x48x16xf32> to vector<48x16xf32>
    %251 = tpu.concatenate %244, %246, %248, %250 in 1 : vector<48x16xf32>, vector<48x16xf32>, vector<48x16xf32>, vector<48x16xf32> -> vector<48x64xf32>
    %252 = arith.truncf %251 : vector<48x64xf32> to vector<48x64xbf16>
    %c1_93 = arith.constant 1 : index
    %c0_94 = arith.constant 0 : index
    %c0_95 = arith.constant 0 : index
    %253 = vector.load %arg10[%c1_93, %c0_94, %c0_95] : memref<2x64x64xbf16, #tpu.memory_space<vmem>>, vector<1x64x64xbf16>
    %254 = vector.shape_cast %253 : vector<1x64x64xbf16> to vector<64x64xbf16>
    %cst_96 = arith.constant dense<0.000000e+00> : vector<48x64xf32>
    %255 = tpu.matmul %252, %254, %cst_96 {dimension_numbers = #tpu.dot_dimension_numbers<[1], [0], [0], [1], [0, 0, 1, 1], [], []>} : vector<48x64xbf16>, vector<64x64xbf16>, vector<48x64xf32> -> vector<48x64xf32>
    %c1_97 = arith.constant 1 : index
    %c0_98 = arith.constant 0 : index
    %c0_99 = arith.constant 0 : index
    %256 = vector.load %arg11[%c1_97, %c0_98, %c0_99] : memref<2x1x64xf32, #tpu.memory_space<vmem>>, vector<1x1x64xf32>
    %257 = vector.shape_cast %256 : vector<1x1x64xf32> to vector<1x64xf32>
    %258 = vector.broadcast %257 : vector<1x64xf32> to vector<48x64xf32>
    %259 = arith.addf %255, %258 : vector<48x64xf32>
    %260 = arith.addf %168, %259 : vector<48x64xf32>
    %c1_100 = arith.constant 1 : index
    %c0_101 = arith.constant 0 : index
    %c0_102 = arith.constant 0 : index
    %261 = vector.load %arg12[%c1_100, %c0_101, %c0_102] : memref<2x1x64xf32, #tpu.memory_space<vmem>>, vector<1x1x64xf32>
    %262 = vector.shape_cast %261 : vector<1x1x64xf32> to vector<1x64xf32>
    %c1_103 = arith.constant 1 : index
    %c0_104 = arith.constant 0 : index
    %c0_105 = arith.constant 0 : index
    %263 = vector.load %arg13[%c1_103, %c0_104, %c0_105] : memref<2x1x64xf32, #tpu.memory_space<vmem>>, vector<1x1x64xf32>
    %264 = vector.shape_cast %263 : vector<1x1x64xf32> to vector<1x64xf32>
    %cst_106 = arith.constant dense<0.000000e+00> : vector<48xf32>
    %265 = vector.multi_reduction <add>, %260, %cst_106 [1] : vector<48x64xf32> to vector<48xf32>
    %266 = vector.shape_cast %265 : vector<48xf32> to vector<48x1xf32>
    %cst_107 = arith.constant 6.400000e+01 : f32
    %267 = vector.broadcast %cst_107 : f32 to vector<48x1xf32>
    %268 = arith.divf %266, %267 : vector<48x1xf32>
    %269 = vector.broadcast %268 : vector<48x1xf32> to vector<48x64xf32>
    %270 = arith.subf %260, %269 : vector<48x64xf32>
    %271 = arith.mulf %270, %270 : vector<48x64xf32>
    %cst_108 = arith.constant dense<0.000000e+00> : vector<48xf32>
    %272 = vector.multi_reduction <add>, %271, %cst_108 [1] : vector<48x64xf32> to vector<48xf32>
    %273 = vector.shape_cast %272 : vector<48xf32> to vector<48x1xf32>
    %cst_109 = arith.constant 6.400000e+01 : f32
    %274 = vector.broadcast %cst_109 : f32 to vector<48x1xf32>
    %275 = arith.divf %273, %274 : vector<48x1xf32>
    %cst_110 = arith.constant 9.99999974E-6 : f32
    %276 = vector.broadcast %cst_110 : f32 to vector<48x1xf32>
    %277 = arith.addf %275, %276 : vector<48x1xf32>
    %278 = math.rsqrt %277 : vector<48x1xf32>
    %279 = vector.broadcast %278 : vector<48x1xf32> to vector<48x64xf32>
    %280 = arith.mulf %270, %279 : vector<48x64xf32>
    %281 = vector.broadcast %262 : vector<1x64xf32> to vector<48x64xf32>
    %282 = arith.mulf %280, %281 : vector<48x64xf32>
    %283 = vector.broadcast %264 : vector<1x64xf32> to vector<48x64xf32>
    %284 = arith.addf %282, %283 : vector<48x64xf32>
    %285 = arith.truncf %284 : vector<48x64xf32> to vector<48x64xbf16>
    %c1_111 = arith.constant 1 : index
    %c0_112 = arith.constant 0 : index
    %c0_113 = arith.constant 0 : index
    %286 = vector.load %arg14[%c1_111, %c0_112, %c0_113] : memref<2x64x256xbf16, #tpu.memory_space<vmem>>, vector<1x64x256xbf16>
    %287 = vector.shape_cast %286 : vector<1x64x256xbf16> to vector<64x256xbf16>
    %cst_114 = arith.constant dense<0.000000e+00> : vector<48x256xf32>
    %288 = tpu.matmul %285, %287, %cst_114 {dimension_numbers = #tpu.dot_dimension_numbers<[1], [0], [0], [1], [0, 0, 1, 1], [], []>} : vector<48x64xbf16>, vector<64x256xbf16>, vector<48x256xf32> -> vector<48x256xf32>
    %c1_115 = arith.constant 1 : index
    %c0_116 = arith.constant 0 : index
    %c0_117 = arith.constant 0 : index
    %289 = vector.load %arg15[%c1_115, %c0_116, %c0_117] : memref<2x1x256xf32, #tpu.memory_space<vmem>>, vector<1x1x256xf32>
    %290 = vector.shape_cast %289 : vector<1x1x256xf32> to vector<1x256xf32>
    %291 = vector.broadcast %290 : vector<1x256xf32> to vector<48x256xf32>
    %292 = arith.addf %288, %291 : vector<48x256xf32>
    %cst_118 = arith.constant 1.702000e+00 : f32
    %293 = vector.broadcast %cst_118 : f32 to vector<48x256xf32>
    %294 = arith.mulf %293, %292 : vector<48x256xf32>
    %295 = arith.negf %294 : vector<48x256xf32>
    %296 = math.exp %295 : vector<48x256xf32>
    %cst_119 = arith.constant 1.000000e+00 : f32
    %297 = vector.broadcast %cst_119 : f32 to vector<48x256xf32>
    %298 = arith.addf %297, %296 : vector<48x256xf32>
    %299 = arith.divf %297, %298 : vector<48x256xf32>
    %300 = arith.mulf %292, %299 : vector<48x256xf32>
    %301 = arith.truncf %300 : vector<48x256xf32> to vector<48x256xbf16>
    %c1_120 = arith.constant 1 : index
    %c0_121 = arith.constant 0 : index
    %c0_122 = arith.constant 0 : index
    %302 = vector.load %arg16[%c1_120, %c0_121, %c0_122] : memref<2x256x64xbf16, #tpu.memory_space<vmem>>, vector<1x256x64xbf16>
    %303 = vector.shape_cast %302 : vector<1x256x64xbf16> to vector<256x64xbf16>
    %cst_123 = arith.constant dense<0.000000e+00> : vector<48x64xf32>
    %304 = tpu.matmul %301, %303, %cst_123 {dimension_numbers = #tpu.dot_dimension_numbers<[1], [0], [0], [1], [0, 0, 1, 1], [], []>} : vector<48x256xbf16>, vector<256x64xbf16>, vector<48x64xf32> -> vector<48x64xf32>
    %c1_124 = arith.constant 1 : index
    %c0_125 = arith.constant 0 : index
    %c0_126 = arith.constant 0 : index
    %305 = vector.load %arg17[%c1_124, %c0_125, %c0_126] : memref<2x1x64xf32, #tpu.memory_space<vmem>>, vector<1x1x64xf32>
    %306 = vector.shape_cast %305 : vector<1x1x64xf32> to vector<1x64xf32>
    %307 = vector.broadcast %306 : vector<1x64xf32> to vector<48x64xf32>
    %308 = arith.addf %304, %307 : vector<48x64xf32>
    %309 = arith.addf %260, %308 : vector<48x64xf32>
    %c0_127 = arith.constant 0 : index
    %c0_128 = arith.constant 0 : index
    %310 = vector.load %arg18[%c0_127, %c0_128] : memref<48x64xf32, #tpu.memory_space<vmem>>, vector<48x64xf32>
    tpu.vector_store %arg18[%c0_127, %c0_128], %309 {strides = array<i32>} : memref<48x64xf32, #tpu.memory_space<vmem>>, vector<48x64xf32>,
    return
  }
}

</mosaic_0001>

<bundles_post_ra>
// kernel: clip_vision_forward.1
= control target key start
LH: loop header
LB: loop body
LE: loop exit
PB: predicated region body
PF: predicated region fallthrough
CT: control target
= control target key end

     0   :  { %v5845_v0 = vmov 0   ;;  %vm195_vm0 = vcmask 523264   ;;  %s5846_s28 = smov 64   ;;  %s5848_s30 = smov 96   ;;  %vm5851_vm1 = vmmov 0   ;;  %vm798_vm2 = vcmask 130048   ;;  %s7873_s1 = inlined_call_operand.vmem [shape: bf16[192,64], index: 1, kind: input, shape index: {}]   ;;  %s7874_s0 = inlined_call_operand.vmem [shape: bf16[48,192], index: 0, kind: input, shape index: {}]   ;;  %s7875_s2 = inlined_call_operand.vmem [shape: f32[48,64], index: 2, kind: input, shape index: {}]   ;;  %s7876_s4 = inlined_call_operand.vmem [shape: f32[1,64], index: 4, kind: input, shape index: {}]   ;;  %s7877_s5 = inlined_call_operand.vmem [shape: f32[1,64], index: 5, kind: input, shape index: {}]   ;;  %s7878_s8 = inlined_call_operand.vmem [shape: bf16[2,64,192], index: 8, kind: input, shape index: {}]   ;;  %s7879_s6 = inlined_call_operand.vmem [shape: f32[2,1,64], index: 6, kind: input, shape index: {}]   ;;  %s7880_s7 = inlined_call_operand.vmem [shape: f32[2,1,64], index: 7, kind: input, shape index: {}]   ;;  %s7881_s9 = inlined_call_operand.vmem [shape: f32[2,1,192], index: 9, kind: input, shape index: {}]   ;;  %s7882_s3 = inlined_call_operand.vmem [shape: f32[48,48], index: 3, kind: input, shape index: {}]   ;;  %s7883_s10 = inlined_call_operand.vmem [shape: bf16[2,64,64], index: 10, kind: input, shape index: {}]   ;;  %s7884_s11 = inlined_call_operand.vmem [shape: f32[2,1,64], index: 11, kind: input, shape index: {}]   ;;  %s7885_s14 = inlined_call_operand.vmem [shape: bf16[2,64,256], index: 14, kind: input, shape index: {}]   ;;  %s7886_s12 = inlined_call_operand.vmem [shape: f32[2,1,64], index: 12, kind: input, shape index: {}]   ;;  %s7887_s13 = inlined_call_operand.vmem [shape: f32[2,1,64], index: 13, kind: input, shape index: {}]   ;;  %s7888_s16 = inlined_call_operand.vmem [shape: bf16[2,256,64], index: 16, kind: input, shape index: {}]   ;;  %s7889_s15 = inlined_call_operand.vmem [shape: f32[2,1,256], index: 15, kind: input, shape index: {}]   ;;  %s7890_s17 = inlined_call_operand.vmem [shape: f32[2,1,64], index: 17, kind: input, shape index: {}]   ;;  %s7891_s18 = inlined_call_operand.vmem [shape: f32[48,64], index: 18, kind: output, shape index: {}]  }
   0x1   :  { %7895 = sst [smem:[#allocation2_spill]] %s7873_s1  ;;  %205 = vmatprep.subr.bf16.mxu0 %v5845_v0  ;;  %581 = vmatprep.mubr.bf16.mxu1 %v5845_v0  ;;  %s5849_s1 = smov 80   ;;  %vm1063_vm3 = vcmask 392192   ;;  %vm1694_vm4 = vcmask 261120  }
   0x2   :  { %7896 = sst [smem:[#allocation3_spill]] %s7874_s0  ;;  %s5852_s27 = smov 16  }
   0x3   :  { %7897 = sst [smem:[#allocation4_spill]] %s7875_s2  ;;  %s5853_s19 = smov 32  }
   0x4   :  { %s7898_s29 = sld [smem:[#allocation2_spill]] }
   0x5   :  { %s7899_s23 = sld [smem:[#allocation3_spill]] }
   0x6   :  { %s7900_s25 = sld [smem:[#allocation4_spill]] }
   0xa   :  { %v5382_v1 = vld [vmem:[%s7898_s29 + $0x38] sm:$0xff]   ;;  %v5383_v2 = vld [vmem:[%s7898_s29 + $0x30] sm:$0xff]   ;;  %v5384_v3 = vld [vmem:[%s7898_s29 + $0x28] sm:$0xff]  }
   0xb   :  { %206 = vmatpush1.bf16.msra.mxu0 %v5382_v1  ;;  %v5385_v4 = vld [vmem:[%s7898_s29 + $0x20] sm:$0xff]   ;;  %v5386_v6 = vld [vmem:[%s7898_s29 + $0x18] sm:$0xff]   ;;  %v5387_v7 = vld [vmem:[%s7898_s29 + $0x10] sm:$0xff]  }
   0xc   :  { %207 = vmatprep.subr.bf16.mxu0 %v5845_v0  ;;  %v5396_v5 = vld [vmem:[%s7899_s23 + $0x4] ss:$8 sps:$4 sm:$0xff]   ;;  %v5390_v10 = vld [vmem:[%s7898_s29 + $0x58] sm:$0xff]   ;;  %v5391_v11 = vld [vmem:[%s7898_s29 + $0x50] sm:$0xff]  }
   0xd   :  { %4384 = vmatprep.mubr.msk.bf16.mxu0 %vm195_vm0, %v5396_v5  ;;  %v5388_v8 = vld [vmem:[%s7898_s29 + $0x8] sm:$0xff]   ;;  %v5389_v9 = vld [vmem:[%s7898_s29] sm:$0xff]   ;;  %v5397_v15 = vld [vmem:[%s7899_s23 + $0x14] ss:$8 sps:$4 sm:$0xff]  }
   0xe   :  { %v5392_v12 = vld [vmem:[%s7898_s29 + $0x48] sm:$0xff]   ;;  %v5393_v13 = vld [vmem:[%s7898_s29 + $0x40] sm:$0xff]   ;;  %v5399_v16 = vld [vmem:[%s7899_s23 + $0x10] ss:$8 sps:$4 sm:$0xff]  }
   0xf   :  { %208 = vmatpush1.bf16.msra.mxu0 %v5383_v2  ;;  %v5394_v14 = vld [vmem:[%s7899_s23] ss:$8 sps:$4 sm:$0xff]   ;;  %v5400_v17 = vld [vmem:[%s7899_s23 + $0x24] ss:$8 sps:$4 sm:$0xff]   ;;  %v92_v28 = vld [vmem:[%s7900_s25 + $0x10] sm:$0xff] }
  0x10   :  { %209 = vmatprep.subr.bf16.mxu0 %v5845_v0  ;;  %v5402_v18 = vld [vmem:[%s7899_s23 + $0x20] ss:$8 sps:$4 sm:$0xff]   ;;  %v93_v33 = vld [vmem:[%s7900_s25 + $0x18] sm:$0xff]  ;;  %s5847_s23 = smov 112  }
  0x11   :  { %v90_v19 = vld [vmem:[%s7900_s25] sm:$0xff]  ;;  %v91_v23 = vld [vmem:[%s7900_s25 + $0x8] sm:$0xff] }
  0x12   :  { %v94_v38 = vld [vmem:[%s7900_s25 + $0x20] sm:$0xff]  ;;  %v95_v43 = vld [vmem:[%s7900_s25 + $0x28] sm:$0xff] }
  0x13   :  { %210 = vmatpush1.bf16.msra.mxu0 %v5384_v3 }
  0x14   :  { %211 = vmatprep.subr.bf16.mxu0 %v5845_v0 }
  0x17   :  { %212 = vmatpush1.bf16.msra.mxu0 %v5385_v4 }
  0x18   :  { %213 = vmatprep.subr.bf16.mxu0 %v5845_v0 }
  0x1b   :  { %214 = vmatpush1.bf16.msra.mxu0 %v5386_v6 }
  0x1c   :  { %215 = vmatprep.subr.bf16.mxu0 %v5845_v0 }
  0x1f   :  { %216 = vmatpush1.bf16.msra.mxu0 %v5387_v7 }
  0x20   :  { %217 = vmatprep.subr.bf16.mxu0 %v5845_v0 }
  0x23   :  { %218 = vmatpush1.bf16.msra.mxu0 %v5388_v8 }
  0x24   :  { %219 = vmatprep.subr.bf16.mxu0 %v5845_v0 }
  0x27   :  { %220 = vmatpush1.bf16.msra.mxu0 %v5389_v9 }
  0x28   :  { %229 = vmatprep.subr.bf16.mxu0 %v5845_v0 }
  0x2b   :  { %230 = vmatpush2.bf16.msra.mxu0 %v5390_v10 }
  0x2c   :  { %231 = vmatprep.subr.bf16.mxu0 %v5845_v0 }
  0x2f   :  { %232 = vmatpush2.bf16.msra.mxu0 %v5391_v11 }
  0x30   :  { %233 = vmatprep.subr.bf16.mxu0 %v5845_v0 }
  0x33   :  { %234 = vmatpush2.bf16.msra.mxu0 %v5392_v12 }
  0x34   :  { %235 = vmatprep.subr.bf16.mxu0 %v5845_v0 }
  0x37   :  { %236 = vmatpush2.bf16.msra.mxu0 %v5393_v13 }
  0x3a   :  { %238 = vmatmul.mubr.bf16.vlgmr.msra.gmra.mxu0 %v5394_v14 }
  0x3b   :  { %4385 = vmatprep.mubr.msk.bf16.mxu0 %vm195_vm0, %v5397_v15 }
  0x42   :  { %246 = vmatmul.mubr.bf16.gmra.mxu0 %v5399_v16 }
  0x43   :  { %4386 = vmatprep.mubr.msk.bf16.mxu0 %vm195_vm0, %v5400_v17 }
  0x4a   :  { %254 = vmatmul.mubr.bf16.gmra.mxu0 %v5402_v18 }
  0xfa   :  { %v239_v20 = vpop.f32.mrf.mxu0 }
  0xfb   :  { %v240_v21 = vadd.f32 %v239_v20, %v90_v19 }
  0xfc   :  { %v241_v22 = vpop.f32.mrf.mxu0 }
  0xfd   :  { %v264_v24 = vsel %vm195_vm0, %v240_v21, 0.0 }
  0xfe   :  { %v242_v25 = vpop.f32.mrf.mxu0  ;;  %265 = vadd.xlane.f32.xlu0 %v264_v24 }
  0xff   :  { %v243_v26 = vadd.f32 %v242_v25, %v91_v23 }
 0x100   :  { %v244_v27 = vpop.f32.mrf.mxu0 }
 0x101   :  { %v267_v29 = vsel %vm195_vm0, %v243_v26, 0.0 }
 0x102   :  { %v247_v30 = vpop.f32.mrf.mxu0  ;;  %268 = vadd.xlane.f32.xlu0 %v267_v29 }
 0x103   :  { %v248_v31 = vadd.f32 %v247_v30, %v92_v28 }
 0x104   :  { %v249_v32 = vpop.f32.mrf.mxu0 }
 0x105   :  { %v270_v34 = vsel %vm195_vm0, %v248_v31, 0.0 }
 0x106   :  { %v250_v35 = vpop.f32.mrf.mxu0  ;;  %271 = vadd.xlane.f32.xlu1 %v270_v34 }
 0x107   :  { %v251_v36 = vadd.f32 %v250_v35, %v93_v33  ;;  %v4388_v35 = vld [vmem:[%s7877_s5] ss:$0 sm:$0xff]  ;;  %s5854_s5 = smov 48  }
 0x108   :  { %v252_v37 = vpop.f32.mrf.mxu0 }
 0x109   :  { %v273_v39 = vsel %vm195_vm0, %v251_v36, 0.0 }
 0x10a   :  { %v255_v40 = vpop.f32.mrf.mxu0  ;;  %274 = vadd.xlane.f32.xlu1 %v273_v39 }
 0x10b   :  { %v256_v41 = vadd.f32 %v255_v40, %v94_v38 }
 0x10c   :  { %v257_v42 = vpop.f32.mrf.mxu0 }
 0x10d   :  { %v276_v44 = vsel %vm195_vm0, %v256_v41, 0.0 }
 0x10e   :  { %v258_v45 = vpop.f32.mrf.mxu0  ;;  %277 = vadd.xlane.f32.xlu0 %v276_v44 }
 0x10f   :  { %v259_v46 = vadd.f32 %v258_v45, %v95_v43 }
 0x110   :  { %v260_v47 = vpop.f32.mrf.mxu0 }
 0x111   :  { %v279_v48 = vsel %vm195_vm0, %v259_v46, 0.0 }
 0x112   :  { %280 = vadd.xlane.f32.xlu1 %v279_v48 }
 0x187   :  { %v266_v49 = vpop.xlane.xlu0 %265 }
 0x188   :  { %v283_v50 = vmul.f32 0.015625, %v266_v49 }
 0x18a   :  { %v289_v51 = vsub.f32 %v240_v21, %v283_v50 }
 0x18b   :  { %v269_v52 = vpop.xlane.xlu0 %268 }
 0x18c   :  { %v284_v53 = vmul.f32 0.015625, %v269_v52  ;;  %v295_v54 = vmul.f32 %v289_v51, %v289_v51 }
 0x18e   :  { %v290_v55 = vsub.f32 %v243_v26, %v284_v53  ;;  %v301_v56 = vsel %vm195_vm0, %v295_v54, 0.0 }
 0x18f   :  { %v272_v57 = vpop.xlane.xlu1 %271  ;;  %302 = vadd.xlane.f32.xlu0 %v301_v56 }
 0x190   :  { %v285_v58 = vmul.f32 0.015625, %v272_v57  ;;  %v296_v59 = vmul.f32 %v290_v55, %v290_v55 }
 0x192   :  { %v6045_v60 = vsub.f32 %v248_v31, %v285_v58  ;;  %v304_v61 = vsel %vm195_vm0, %v296_v59, 0.0  ;;  %v4387_v31 = vld [vmem:[%s7876_s4] ss:$0 sm:$0xff] }
 0x193   :  { %v275_v62 = vpop.xlane.xlu1 %274  ;;  %305 = vadd.xlane.f32.xlu1 %v304_v61 }
 0x194   :  { %v286_v63 = vmul.f32 0.015625, %v275_v62  ;;  %v297_v1 = vmul.f32 %v6045_v60, %v6045_v60 }
 0x196   :  { %v6050_v2 = vsub.f32 %v251_v36, %v286_v63  ;;  %v307_v3 = vsel %vm195_vm0, %v297_v1, 0.0 }
 0x197   :  { %308 = vadd.xlane.f32.xlu0 %v307_v3  ;;  %v278_v4 = vpop.xlane.xlu0 %277 }
 0x198   :  { %v287_v5 = vmul.f32 0.015625, %v278_v4  ;;  %v298_v6 = vmul.f32 %v6050_v2, %v6050_v2 }
 0x19a   :  { %v6055_v7 = vsub.f32 %v256_v41, %v287_v5  ;;  %v310_v8 = vsel %vm195_vm0, %v298_v6, 0.0 }
 0x19b   :  { %v281_v9 = vpop.xlane.xlu1 %280  ;;  %311 = vadd.xlane.f32.xlu1 %v310_v8 }
 0x19c   :  { %v288_v10 = vmul.f32 0.015625, %v281_v9  ;;  %v299_v11 = vmul.f32 %v6055_v7, %v6055_v7 }
 0x19e   :  { %v6060_v12 = vsub.f32 %v259_v46, %v288_v10  ;;  %v313_v13 = vsel %vm195_vm0, %v299_v11, 0.0 }
 0x19f   :  { %314 = vadd.xlane.f32.xlu0 %v313_v13 }
 0x1a0   :  { %v300_v14 = vmul.f32 %v6060_v12, %v6060_v12 }
 0x1a2   :  { %v316_v15 = vsel %vm195_vm0, %v300_v14, 0.0 }
 0x1a3   :  { %317 = vadd.xlane.f32.xlu1 %v316_v15 }
 0x218   :  { %v303_v16 = vpop.xlane.xlu0 %302 }
 0x219   :  { %v319_v17 = vmul.f32 0.015625, %v303_v16 }
 0x21b   :  { %v325_v18 = vadd.f32 1e-05, %v319_v17 }
 0x21c   :  { %v306_v19 = vpop.xlane.xlu1 %305 }
 0x21d   :  { %5491 = vrsqrt.f32 %v325_v18  ;;  %v320_v20 = vmul.f32 0.015625, %v306_v19 }
 0x21f   :  { %v326_v21 = vadd.f32 1e-05, %v320_v20 }
 0x220   :  { %v309_v22 = vpop.xlane.xlu0 %308 }
 0x221   :  { %5493 = vrsqrt.f32 %v326_v21  ;;  %v321_v23 = vmul.f32 0.015625, %v309_v22 }
 0x223   :  { %v327_v24 = vadd.f32 1e-05, %v321_v23 }
 0x224   :  { %v312_v25 = vpop.xlane.xlu1 %311 }
 0x225   :  { %5495 = vrsqrt.f32 %v327_v24  ;;  %v322_v26 = vmul.f32 0.015625, %v312_v25 }
 0x227   :  { %v328_v27 = vadd.f32 1e-05, %v322_v26 }
 0x228   :  { %v315_v28 = vpop.xlane.xlu0 %314 }
 0x229   :  { %5497 = vrsqrt.f32 %v328_v27  ;;  %v323_v29 = vmul.f32 0.015625, %v315_v28 }
 0x22a   :  { %v5492_v30 = vpop.eup %5491 }
 0x22b   :  { %v329_v32 = vadd.f32 1e-05, %v323_v29  ;;  %v337_v33 = vmul.f32 %v5492_v30, %v289_v51 }
 0x22c   :  { %v318_v34 = vpop.xlane.xlu1 %317 }
 0x22d   :  { %5499 = vrsqrt.f32 %v329_v32  ;;  %v324_v36 = vmul.f32 0.015625, %v318_v34  ;;  %v349_v37 = vmul.f32 %v4387_v31, %v337_v33  ;;  %v5403_v33 = vld [vmem:[%s7878_s8 + $0x34] ss:$8 sps:$4 sm:$0xff]   ;;  %v5405_v34 = vld [vmem:[%s7878_s8 + $0x30] ss:$8 sps:$4 sm:$0xff]  }
 0x22e   :  { %v5494_v38 = vpop.eup %5493  ;;  %557 = vmatprep.subr.bf16.mxu1 %v5403_v33  ;;  %v490_v33 = vlaneseq }
 0x22f   :  { %v330_v39 = vadd.f32 1e-05, %v324_v36  ;;  %v6072_v40 = vadd.f32 %v4388_v35, %v349_v37  ;;  %v338_v41 = vmul.f32 %v5494_v38, %v290_v55  ;;  %558 = vmatpush1.bf16.msra.mxu1 %v5405_v34  ;;  %v5408_v36 = vld [vmem:[%s7878_s8 + $0x20] ss:$8 sps:$4 sm:$0xff]   ;;  %v5409_v37 = vld [vmem:[%s7878_s8 + $0x14] ss:$8 sps:$4 sm:$0xff]  }
 0x230   :  { %v5411_v38 = vld [vmem:[%s7878_s8 + $0x10] ss:$8 sps:$4 sm:$0xff]   ;;  %v491_v34 = vshrl.u32 %v490_v33, 7 }
 0x231   :  { %5501 = vrsqrt.f32 %v330_v39  ;;  %v375_v42 = vsel %vm195_vm0, %v6072_v40, 0.0  ;;  %v350_v43 = vmul.f32 %v4387_v31, %v338_v41  ;;  %v5412_v39 = vld [vmem:[%s7878_s8 + $0x4] ss:$8 sps:$4 sm:$0xff]   ;;  %v5414_v41 = vld [vmem:[%s7878_s8] ss:$8 sps:$4 sm:$0xff]  }
 0x232   :  { %v5496_v44 = vpop.eup %5495  ;;  %376 = vadd.xlane.f32.xlu0 %v375_v42 }
 0x233   :  { %v6076_v45 = vadd.f32 %v4388_v35, %v350_v43  ;;  %v339_v46 = vmul.f32 %v5496_v44, %v6045_v60 }
 0x235   :  { %v378_v47 = vsel %vm195_vm0, %v6076_v45, 0.0  ;;  %v351_v48 = vmul.f32 %v4387_v31, %v339_v46 }
 0x236   :  { %v5498_v49 = vpop.eup %5497  ;;  %379 = vadd.xlane.f32.xlu1 %v378_v47 }
 0x237   :  { %v6081_v50 = vadd.f32 %v4388_v35, %v351_v48  ;;  %v340_v51 = vmul.f32 %v5498_v49, %v6050_v2 }
 0x239   :  { %v381_v52 = vsel %vm195_vm0, %v6081_v50, 0.0  ;;  %v352_v53 = vmul.f32 %v4387_v31, %v340_v51 }
 0x23a   :  { %v5500_v54 = vpop.eup %5499  ;;  %382 = vadd.xlane.f32.xlu0 %v381_v52 }
 0x23b   :  { %v6086_v55 = vadd.f32 %v4388_v35, %v352_v53  ;;  %v341_v56 = vmul.f32 %v5500_v54, %v6055_v7 }
 0x23d   :  { %v384_v57 = vsel %vm195_vm0, %v6086_v55, 0.0  ;;  %v353_v58 = vmul.f32 %v4387_v31, %v341_v56 }
 0x23e   :  { %v5502_v59 = vpop.eup %5501  ;;  %385 = vadd.xlane.f32.xlu1 %v384_v57 }
 0x23f   :  { %v6091_v60 = vadd.f32 %v4388_v35, %v353_v58  ;;  %v342_v61 = vmul.f32 %v5502_v59, %v6060_v12 }
 0x241   :  { %v387_v62 = vsel %vm195_vm0, %v6091_v60, 0.0  ;;  %v354_v63 = vmul.f32 %v4387_v31, %v342_v61 }
 0x242   :  { %388 = vadd.xlane.f32.xlu0 %v387_v62 }
 0x243   :  { %v6096_v1 = vadd.f32 %v4388_v35, %v354_v63  ;;  %v5406_v35 = vld [vmem:[%s7878_s8 + $0x24] ss:$8 sps:$4 sm:$0xff]  }
 0x244   :  { %559 = vmatprep.subr.bf16.mxu1 %v5406_v35  ;;  %v6177_v35 = vsub.s32 0, %v491_v34 }
 0x245   :  { %v390_v2 = vsel %vm195_vm0, %v6096_v1, 0.0  ;;  %560 = vmatpush1.bf16.msra.mxu1 %v5408_v36 }
 0x246   :  { %391 = vadd.xlane.f32.xlu1 %v390_v2  ;;  %561 = vmatprep.subr.bf16.mxu1 %v5409_v37  ;;  %v4389_v2 = vld [vmem:[%s7879_s6] ss:$0 sm:$0xff] }
 0x249   :  { %562 = vmatpush1.bf16.msra.mxu1 %v5411_v38 }
 0x24a   :  { %563 = vmatprep.subr.bf16.mxu1 %v5412_v39 }
 0x24d   :  { %564 = vmatpush1.bf16.msra.mxu1 %v5414_v41 }
 0x2bb   :  { %v377_v3 = vpop.xlane.xlu0 %376 }
 0x2bc   :  { %v393_v4 = vmul.f32 0.015625, %v377_v3 }
 0x2be   :  { %v6101_v5 = vsub.f32 %v6072_v40, %v393_v4 }
 0x2bf   :  { %v380_v6 = vpop.xlane.xlu1 %379 }
 0x2c0   :  { %v394_v7 = vmul.f32 0.015625, %v380_v6  ;;  %v405_v8 = vmul.f32 %v6101_v5, %v6101_v5 }
 0x2c2   :  { %v6106_v9 = vsub.f32 %v6076_v45, %v394_v7  ;;  %v411_v10 = vsel %vm195_vm0, %v405_v8, 0.0 }
 0x2c3   :  { %412 = vadd.xlane.f32.xlu0 %v411_v10  ;;  %v383_v11 = vpop.xlane.xlu0 %382  ;;  %v4390_v10 = vld [vmem:[%s7880_s7] ss:$0 sm:$0xff] }
 0x2c4   :  { %v395_v12 = vmul.f32 0.015625, %v383_v11  ;;  %v406_v13 = vmul.f32 %v6106_v9, %v6106_v9 }
 0x2c6   :  { %v6112_v14 = vsub.f32 %v6081_v50, %v395_v12  ;;  %v414_v15 = vsel %vm195_vm0, %v406_v13, 0.0 }
 0x2c7   :  { %415 = vadd.xlane.f32.xlu1 %v414_v15  ;;  %v386_v16 = vpop.xlane.xlu1 %385 }
 0x2c8   :  { %v396_v17 = vmul.f32 0.015625, %v386_v16  ;;  %v407_v18 = vmul.f32 %v6112_v14, %v6112_v14 }
 0x2ca   :  { %v6118_v19 = vsub.f32 %v6086_v55, %v396_v17  ;;  %v417_v20 = vsel %vm195_vm0, %v407_v18, 0.0 }
 0x2cb   :  { %418 = vadd.xlane.f32.xlu0 %v417_v20  ;;  %v389_v21 = vpop.xlane.xlu0 %388 }
 0x2cc   :  { %v397_v22 = vmul.f32 0.015625, %v389_v21  ;;  %v408_v23 = vmul.f32 %v6118_v19, %v6118_v19 }
 0x2ce   :  { %v6124_v24 = vsub.f32 %v6091_v60, %v397_v22  ;;  %v420_v25 = vsel %vm195_vm0, %v408_v23, 0.0 }
 0x2cf   :  { %421 = vadd.xlane.f32.xlu1 %v420_v25  ;;  %v392_v26 = vpop.xlane.xlu1 %391 }
 0x2d0   :  { %v398_v27 = vmul.f32 0.015625, %v392_v26  ;;  %v409_v28 = vmul.f32 %v6124_v24, %v6124_v24 }
 0x2d2   :  { %v6130_v29 = vsub.f32 %v6096_v1, %v398_v27  ;;  %v423_v30 = vsel %vm195_vm0, %v409_v28, 0.0 }
 0x2d3   :  { %424 = vadd.xlane.f32.xlu0 %v423_v30 }
 0x2d4   :  { %v410_v31 = vmul.f32 %v6130_v29, %v6130_v29 }
 0x2d6   :  { %v426_v32 = vsel %vm195_vm0, %v410_v31, 0.0 }
 0x2d7   :  { %427 = vadd.xlane.f32.xlu1 %v426_v32 }
 0x34c   :  { %v413_v42 = vpop.xlane.xlu0 %412 }
 0x34d   :  { %v429_v43 = vmul.f32 0.015625, %v413_v42 }
 0x34f   :  { %v435_v44 = vadd.f32 1e-05, %v429_v43 }
 0x350   :  { %v416_v46 = vpop.xlane.xlu1 %415 }
 0x351   :  { %5503 = vrsqrt.f32 %v435_v44  ;;  %v430_v47 = vmul.f32 0.015625, %v416_v46 }
 0x353   :  { %v436_v48 = vadd.f32 1e-05, %v430_v47 }
 0x354   :  { %v419_v49 = vpop.xlane.xlu0 %418 }
 0x355   :  { %5505 = vrsqrt.f32 %v436_v48  ;;  %v431_v51 = vmul.f32 0.015625, %v419_v49 }
 0x357   :  { %v437_v52 = vadd.f32 1e-05, %v431_v51 }
 0x358   :  { %v422_v53 = vpop.xlane.xlu1 %421 }
 0x359   :  { %5507 = vrsqrt.f32 %v437_v52  ;;  %v432_v54 = vmul.f32 0.015625, %v422_v53 }
 0x35b   :  { %v438_v56 = vadd.f32 1e-05, %v432_v54 }
 0x35c   :  { %v425_v57 = vpop.xlane.xlu0 %424 }
 0x35d   :  { %5509 = vrsqrt.f32 %v438_v56  ;;  %v433_v58 = vmul.f32 0.015625, %v425_v57 }
 0x35e   :  { %v5504_v59 = vpop.eup %5503 }
 0x35f   :  { %v439_v61 = vadd.f32 1e-05, %v433_v58  ;;  %v447_v62 = vmul.f32 %v5504_v59, %v6101_v5 }
 0x360   :  { %v428_v63 = vpop.xlane.xlu1 %427 }
 0x361   :  { %5511 = vrsqrt.f32 %v439_v61  ;;  %v434_v3 = vmul.f32 0.015625, %v428_v63  ;;  %v459_v8 = vmul.f32 %v4389_v2, %v447_v62 }
 0x362   :  { %v5506_v4 = vpop.eup %5505 }
 0x363   :  { %v440_v6 = vadd.f32 1e-05, %v434_v3  ;;  %v448_v7 = vmul.f32 %v5506_v4, %v6106_v9  ;;  %v471_v5 = vadd.f32 %v4390_v10, %v459_v8 }
 0x365   :  { %5513 = vrsqrt.f32 %v440_v6  ;;  %v460_v11 = vmul.f32 %v4389_v2, %v448_v7 }
 0x366   :  { %v5508_v12 = vpop.eup %5507 }
 0x367   :  { %v472_v13 = vadd.f32 %v4390_v10, %v460_v11  ;;  %v449_v15 = vmul.f32 %v5508_v12, %v6112_v14 }
 0x369   :  { %v477_v16 = vpack.c.bf16 %v472_v13, %v471_v5  ;;  %v461_v20 = vmul.f32 %v4389_v2, %v449_v15 }
 0x36a   :  { %v5510_v17 = vpop.eup %5509 }
 0x36b   :  { %4399 = vmatmul.mubr.msk.bf16.vlgmr.msra.gmra.mxu1 %vm195_vm0, %v477_v16  ;;  %v450_v18 = vmul.f32 %v5510_v17, %v6118_v19  ;;  %v473_v22 = vadd.f32 %v4390_v10, %v461_v20 }
 0x36c   :  { %591 = vmatprep.mubr.bf16.mxu1 %v5845_v0 }
 0x36d   :  { %v462_v9 = vmul.f32 %v4389_v2, %v450_v18 }
 0x36e   :  { %v5512_v21 = vpop.eup %5511 }
 0x36f   :  { %v474_v23 = vadd.f32 %v4390_v10, %v462_v9  ;;  %v451_v25 = vmul.f32 %v5512_v21, %v6124_v24  ;;  %v488_v24 = vld [vmem:[%s7881_s9] sm:$0x3]  ;;  %v5850_v9 = vmov 0.0  }
 0x370   :  { %v493_v36 = vrot.slane %v488_v24, %v6177_v35  ;;  %4789 = vmatprep.subr.bf16.mxu1 %v5850_v9  ;;  %4817 = vmatprep.subr.bf16.mxu0 %v5850_v9 }
 0x371   :  { %v478_v26 = vpack.c.bf16 %v474_v23, %v473_v22  ;;  %v463_v28 = vmul.f32 %v4389_v2, %v451_v25  ;;  %4819 = vmatprep.mubr.msk.bf16.mxu0 %vm5851_vm1, %v5850_v9 }
 0x372   :  { %v5514_v27 = vpop.eup %5513 }
 0x373   :  { %4400 = vmatmul.mubr.msk.bf16.gmra.mxu1 %vm195_vm0, %v478_v26  ;;  %v452_v14 = vmul.f32 %v5514_v27, %v6130_v29  ;;  %v475_v19 = vadd.f32 %v4390_v10, %v463_v28  ;;  %v6183_v29 = vsub.s32 1, %v491_v34 }
 0x374   :  { %601 = vmatprep.mubr.bf16.mxu1 %v5845_v0 }
 0x375   :  { %v464_v30 = vmul.f32 %v4389_v2, %v452_v14  ;;  %v497_v41 = vrot.slane %v488_v24, %v6183_v29 }
 0x377   :  { %v476_v31 = vadd.f32 %v4390_v10, %v464_v30 }
 0x379   :  { %v479_v32 = vpack.c.bf16 %v476_v31, %v475_v19 }
 0x37b   :  { %4401 = vmatmul.mubr.msk.bf16.gmra.mxu1 %vm195_vm0, %v479_v32 }
 0x37c   :  { %4791 = vmatprep.mubr.msk.bf16.mxu1 %vm5851_vm1, %v5850_v9 }
 0x42b   :  { %v583_v37 = vpop.f32.mrf.mxu1 }
 0x42c   :  { %v6185_v38 = vadd.f32 %v583_v37, %v493_v36 }
 0x42d   :  { %v585_v39 = vpop.f32.mrf.mxu1 }
 0x42e   :  { %618 = vrot.lane.b32.xlu0 %v6185_v38, %s5846_s28  ;;  %v6192_v46 = vadd.f32 %v585_v39, %v497_v41 }
 0x42f   :  { %v587_v42 = vpop.f32.mrf.mxu1 }
 0x430   :  { %v6190_v43 = vadd.f32 %v587_v42, %v493_v36 }
 0x431   :  { %v589_v44 = vpop.f32.mrf.mxu1 }
 0x432   :  { %v782_v47 = vpack.c.bf16 %v6190_v43, %v6185_v38  ;;  %v6196_v48 = vadd.f32 %v589_v44, %v497_v41  ;;  %620 = vrot.lane.b32.xlu1 %v6190_v43, %s5846_s28  ;;  %v5097_v13 = vpack.i.bf16 %v6190_v43, %v6185_v38 }
 0x433   :  { %v593_v49 = vpop.f32.mrf.mxu1 }
 0x434   :  { %v6200_v51 = vadd.f32 %v593_v49, %v493_v36  ;;  %v1340_v52 = vpack.c.bf16 %v6196_v48, %v6192_v46  ;;  %v6206_v53 = vpack.i.bf16 %v6196_v48, %v6192_v46 }
 0x435   :  { %v595_v54 = vpop.f32.mrf.mxu1 }
 0x436   :  { %v6208_v56 = vadd.f32 %v595_v54, %v497_v41  ;;  %622 = vrot.lane.b32.xlu1 %v6200_v51, %s5846_s28 }
 0x437   :  { %v597_v57 = vpop.f32.mrf.mxu1 }
 0x438   :  { %v6212_v58 = vadd.f32 %v597_v57, %v493_v36 }
 0x439   :  { %v599_v59 = vpop.f32.mrf.mxu1 }
 0x43a   :  { %v6214_v61 = vadd.f32 %v599_v59, %v497_v41  ;;  %624 = vrot.lane.b32.xlu1 %v6212_v58, %s5846_s28  ;;  %v783_v63 = vpack.c.bf16 %v6212_v58, %v6200_v51  ;;  %v5102_v17 = vpack.i.bf16 %v6212_v58, %v6200_v51 }
 0x43b   :  { %v603_v62 = vpop.f32.mrf.mxu1 }
 0x43c   :  { %v6220_v2 = vadd.f32 %v603_v62, %v493_v36  ;;  %v6224_v3 = vpack.i.bf16 %v6214_v61, %v6208_v56  ;;  %v1341_v4 = vpack.c.bf16 %v6214_v61, %v6208_v56 }
 0x43d   :  { %v605_v6 = vpop.f32.mrf.mxu1 }
 0x43e   :  { %626 = vrot.lane.b32.xlu0 %v6220_v2, %s5846_s28  ;;  %v6232_v11 = vadd.f32 %v605_v6, %v497_v41 }
 0x43f   :  { %v607_v7 = vpop.f32.mrf.mxu1 }
 0x440   :  { %v6230_v8 = vadd.f32 %v607_v7, %v493_v36 }
 0x441   :  { %v609_v10 = vpop.f32.mrf.mxu1 }
 0x442   :  { %v6234_v12 = vadd.f32 %v609_v10, %v497_v41  ;;  %628 = vrot.lane.b32.xlu1 %v6230_v8, %s5846_s28  ;;  %v784_v5 = vpack.c.bf16 %v6230_v8, %v6220_v2  ;;  %v5107_v18 = vpack.i.bf16 %v6230_v8, %v6220_v2 }
 0x444   :  { %v1342_v15 = vpack.c.bf16 %v6234_v12, %v6232_v11  ;;  %v6246_v16 = vpack.i.bf16 %v6234_v12, %v6232_v11 }
 0x446   :  { %5098 = vrot.lane.b32.xlu1 %v5097_v13, %s5847_s23 }
 0x44a   :  { %5103 = vrot.lane.b32.xlu1 %v5102_v17, %s5847_s23 }
 0x44e   :  { %5108 = vrot.lane.b32.xlu1 %v5107_v18, %s5847_s23 }
 0x452   :  { %5113 = vrot.lane.b32.xlu1 %v5107_v18, %s5848_s30 }
 0x456   :  { %5118 = vrot.lane.b32.xlu1 %v5097_v13, %s5848_s30 }
 0x45a   :  { %5123 = vrot.lane.b32.xlu1 %v5097_v13, %s5849_s1 }
 0x45e   :  { %5128 = vrot.lane.b32.xlu1 %v5102_v17, %s5848_s30 }
 0x462   :  { %5133 = vrot.lane.b32.xlu1 %v5102_v17, %s5849_s1 }
 0x466   :  { %5138 = vrot.lane.b32.xlu1 %v5107_v18, %s5849_s1 }
 0x46a   :  { %5143 = vrot.lane.b32.xlu1 %v6246_v16, %s5847_s23 }
 0x46e   :  { %5153 = vrot.lane.b32.xlu1 %v6206_v53, %s5847_s23 }
 0x4a0   :  { %v619_v20 = vpop.permute.xlu0 %618 }
 0x4a1   :  { %636 = vxpose.xlu0.b32.start [1/6] (short) (narrow) %v619_v20, 64 }
 0x4a4   :  { %v621_v21 = vpop.permute.xlu1 %620 }
 0x4a5   :  { %637 = vxpose.xlu0.b32.cont [2/6] (short) (narrow) %v621_v21, 64 }
 0x4a8   :  { %v623_v22 = vpop.permute.xlu1 %622 }
 0x4a9   :  { %638 = vxpose.xlu0.b32.cont [3/6] (short) (narrow) %v623_v22, 64 }
 0x4ac   :  { %v625_v23 = vpop.permute.xlu1 %624 }
 0x4ad   :  { %639 = vxpose.xlu0.b32.cont [4/6] (short) (narrow) %v625_v23, 64 }
 0x4b0   :  { %v627_v25 = vpop.permute.xlu0 %626 }
 0x4b1   :  { %640 = vxpose.xlu0.b32.cont [5/6] (short) (narrow) %v627_v25, 64 }
 0x4b4   :  { %v629_v26 = vpop.permute.xlu1 %628 }
 0x4b5   :  { %641 = vxpose.xlu0.b32.end [6/6] (short) (narrow) %v629_v26, 64 }
 0x4b8   :  { %v5099_v27 = vpop.permute.xlu1 %5098 }
 0x4b9   :  { %v5101_v49 = vunpack.i.h.bf16 %v5099_v27  ;;  %v5100_v51 = vunpack.i.l.bf16 %v5099_v27 }
 0x4bb   :  { %v785_v58 = vpack.c.bf16 %v5101_v49, %v5100_v51 }
 0x4bc   :  { %v5104_v14 = vpop.permute.xlu1 %5103 }
 0x4bd   :  { %v5106_v62 = vunpack.i.h.bf16 %v5104_v14 }
 0x4c0   :  { %v5109_v30 = vpop.permute.xlu1 %5108 }
 0x4c1   :  { %v5111_v46 = vunpack.i.h.bf16 %v5109_v30  ;;  %v5110_v48 = vunpack.i.l.bf16 %v5109_v30 }
 0x4c3   :  { %v787_v2 = vpack.c.bf16 %v5111_v46, %v5110_v48  ;;  %v6383_v46 = vld [vmem:[%s7882_s3 + $0x20] sm:$0xff] }
 0x4c4   :  { %v6273_v32 = vpop.permute.xlu1 %5113 }
 0x4c5   :  { %v5115_v6 = vunpack.i.l.bf16 %v6273_v32 }
 0x4c8   :  { %v5119_v24 = vpop.permute.xlu1 %5118 }
 0x4c9   :  { %v5121_v38 = vunpack.i.h.bf16 %v5119_v24  ;;  %v5120_v41 = vunpack.i.l.bf16 %v5119_v24  ;;  %v6345_v24 = vld [vmem:[%s7882_s3] sm:$0xff] }
 0x4cb   :  { %v788_v44 = vpack.c.bf16 %v5121_v38, %v5120_v41  ;;  %v6353_v38 = vld [vmem:[%s7882_s3 + $0x8] sm:$0xff] }
 0x4cc   :  { %v5124_v39 = vpop.permute.xlu1 %5123 }
 0x4cd   :  { %v5125_v13 = vunpack.i.l.bf16 %v5124_v39 }
 0x4e6   :  { %5148 = vrot.lane.b32.xlu0 %v6224_v3, %s5847_s23 }
 0x51d   :  { %v652_v28 = vpop.trf.xlu0 }
 0x521   :  { %v653_v19 = vpop.trf.xlu0 }
 0x522   :  { %v794_v31 = vpack.c.bf16 %v653_v19, %v652_v28 }
 0x524   :  { %4790 = vmatpush3.bf16.msra.mxu1 %v794_v31 }
 0x525   :  { %v654_v33 = vpop.trf.xlu0  ;;  %4803 = vmatprep.subr.bf16.mxu1 %v5850_v9 }
 0x527   :  { %4792 = vmatmul.mubr.msk.bf16.vlgmr.msra.gmra.mxu1 %vm798_vm2, %v782_v47  ;;  %v5129_v47 = vpop.permute.xlu1 %5128 }
 0x528   :  { %4795 = vmatprep.mubr.msk.bf16.mxu1 %vm5851_vm1, %v5850_v9  ;;  %v5131_v54 = vunpack.i.h.bf16 %v5129_v47  ;;  %v5130_v57 = vunpack.i.l.bf16 %v5129_v47  ;;  %v6363_v47 = vld [vmem:[%s7882_s3 + $0x10] sm:$0xff] }
 0x529   :  { %v655_v34 = vpop.trf.xlu0 }
 0x52a   :  { %v795_v36 = vpack.c.bf16 %v655_v34, %v654_v33  ;;  %v789_v59 = vpack.c.bf16 %v5131_v54, %v5130_v57 }
 0x52c   :  { %4804 = vmatpush3.bf16.msra.mxu1 %v795_v36 }
 0x52d   :  { %v656_v37 = vpop.trf.xlu0  ;;  %5085 = vmatprep.subr.bf16.mxu1 %v5850_v9 }
 0x52f   :  { %4796 = vmatmul.mubr.msk.bf16.gmra.mxu1 %vm798_vm2, %v783_v63  ;;  %v5105_v63 = vunpack.i.l.bf16 %v5104_v14 }
 0x530   :  { %4799 = vmatprep.mubr.msk.bf16.mxu1 %vm5851_vm1, %v5850_v9 }
 0x531   :  { %v657_v42 = vpop.trf.xlu0  ;;  %v786_v56 = vpack.c.bf16 %v5106_v62, %v5105_v63 }
 0x532   :  { %v796_v43 = vpack.c.bf16 %v657_v42, %v656_v37 }
 0x534   :  { %4818 = vmatpush3.bf16.msra.mxu0 %v796_v43 }
 0x535   :  { %4845 = vmatprep.subr.bf16.mxu0 %v5850_v9  ;;  %v658_v61 = vpop.trf.xlu0 }
 0x537   :  { %4800 = vmatmul.mubr.msk.bf16.gmra.mxu1 %vm798_vm2, %v784_v5  ;;  %4820 = vmatmul.mubr.msk.bf16.vlgmr.msra.gmra.mxu0 %vm798_vm2, %v788_v44  ;;  %v5126_v5 = vunpack.i.h.bf16 %v5124_v39 }
 0x538   :  { %4846 = vmatpush3.bf16.msra.mxu0 %v1342_v15  ;;  %4805 = vmatprep.mubr.msk.bf16.mxu1 %vm5851_vm1, %v5850_v9 }
 0x539   :  { %4847 = vmatprep.subr.bf16.mxu0 %v5850_v9  ;;  %4823 = vmatprep.mubr.msk.bf16.mxu0 %vm5851_vm1, %v5850_v9  ;;  %v659_v8 = vpop.trf.xlu0  ;;  %v791_v20 = vpack.c.bf16 %v5126_v5, %v5125_v13 }
 0x53a   :  { %v797_v10 = vpack.c.bf16 %v659_v8, %v658_v61 }
 0x53c   :  { %4848 = vmatpush3.bf16.msra.mxu0 %v1341_v4  ;;  %v5116_v4 = vunpack.i.h.bf16 %v6273_v32 }
 0x53d   :  { %4849 = vmatprep.subr.bf16.mxu0 %v5850_v9 }
 0x53e   :  { %v790_v11 = vpack.c.bf16 %v5116_v4, %v5115_v6 }
 0x53f   :  { %4806 = vmatmul.mubr.msk.bf16.vlgmr.msra.gmra.mxu1 %vm798_vm2, %v785_v58  ;;  %4824 = vmatmul.mubr.msk.bf16.gmra.mxu0 %vm798_vm2, %v789_v59  ;;  %v6373_v58 = vld [vmem:[%s7882_s3 + $0x18] sm:$0xff] }
 0x540   :  { %5086 = vmatpush3.bf16.msra.mxu1 %v796_v43  ;;  %4850 = vmatpush3.bf16.msra.mxu0 %v1340_v52  ;;  %v5134_v52 = vpop.permute.xlu1 %5133 }
 0x541   :  { %4809 = vmatprep.mubr.msk.bf16.mxu1 %vm5851_vm1, %v5850_v9  ;;  %4831 = vmatprep.subr.bf16.mxu1 %v5850_v9  ;;  %v5136_v26 = vunpack.i.h.bf16 %v5134_v52  ;;  %v5135_v27 = vunpack.i.l.bf16 %v5134_v52 }
 0x542   :  { %4851 = vmatprep.mubr.msk.bf16.mxu0 %vm5851_vm1, %v5850_v9  ;;  %4881 = vmatprep.subr.bf16.mxu0 %v5850_v9 }
 0x543   :  { %v792_v19 = vpack.c.bf16 %v5136_v26, %v5135_v27 }
 0x544   :  { %v5139_v7 = vpop.permute.xlu1 %5138 }
 0x545   :  { %v5141_v32 = vunpack.i.h.bf16 %v5139_v7  ;;  %v5140_v33 = vunpack.i.l.bf16 %v5139_v7  ;;  %v6393_v7 = vld [vmem:[%s7882_s3 + $0x28] sm:$0xff] }
 0x547   :  { %4810 = vmatmul.mubr.msk.bf16.gmra.mxu1 %vm798_vm2, %v786_v56  ;;  %v793_v34 = vpack.c.bf16 %v5141_v32, %v5140_v33 }
 0x548   :  { %4813 = vmatprep.mubr.msk.bf16.mxu1 %vm5851_vm1, %v5850_v9  ;;  %v5144_v12 = vpop.permute.xlu1 %5143 }
 0x549   :  { %v5146_v15 = vunpack.i.h.bf16 %v5144_v12  ;;  %v5145_v17 = vunpack.i.l.bf16 %v5144_v12 }
 0x54b   :  { %v1345_v21 = vpack.c.bf16 %v5146_v15, %v5145_v17 }
 0x54c   :  { %v5154_v25 = vpop.permute.xlu1 %5153 }
 0x54d   :  { %v5156_v14 = vunpack.i.h.bf16 %v5154_v25  ;;  %v5155_v28 = vunpack.i.l.bf16 %v5154_v25 }
 0x54f   :  { %4814 = vmatmul.mubr.msk.bf16.gmra.mxu1 %vm798_vm2, %v787_v2  ;;  %v1343_v31 = vpack.c.bf16 %v5156_v14, %v5155_v28 }
 0x550   :  { %4827 = vmatprep.mubr.msk.bf16.mxu1 %vm5851_vm1, %v5850_v9 }
 0x557   :  { %4828 = vmatmul.mubr.msk.bf16.vlgmr.msra.gmra.mxu1 %vm798_vm2, %v790_v11 }
 0x558   :  { %4832 = vmatpush3.bf16.msra.mxu1 %v797_v10  ;;  %4833 = vmatprep.mubr.msk.bf16.mxu1 %vm5851_vm1, %v5850_v9  ;;  %v5149_v18 = vpop.permute.xlu0 %5148 }
 0x559   :  { %4863 = vmatprep.subr.bf16.mxu1 %v5850_v9  ;;  %v5151_v22 = vunpack.i.h.bf16 %v5149_v18  ;;  %v5150_v23 = vunpack.i.l.bf16 %v5149_v18 }
 0x55b   :  { %v1344_v30 = vpack.c.bf16 %v5151_v22, %v5150_v23 }
 0x55f   :  { %4834 = vmatmul.mubr.msk.bf16.vlgmr.msra.gmra.mxu1 %vm798_vm2, %v791_v20 }
 0x560   :  { %4864 = vmatpush3.bf16.msra.mxu1 %v1345_v21  ;;  %4837 = vmatprep.mubr.msk.bf16.mxu1 %vm5851_vm1, %v5850_v9 }
 0x561   :  { %4865 = vmatprep.subr.bf16.mxu1 %v5850_v9 }
 0x564   :  { %4866 = vmatpush3.bf16.msra.mxu1 %v1344_v30 }
 0x565   :  { %4867 = vmatprep.subr.bf16.mxu1 %v5850_v9 }
 0x567   :  { %4838 = vmatmul.mubr.msk.bf16.gmra.mxu1 %vm798_vm2, %v792_v19 }
 0x568   :  { %4868 = vmatpush3.bf16.msra.mxu1 %v1343_v31  ;;  %4841 = vmatprep.mubr.msk.bf16.mxu1 %vm5851_vm1, %v5850_v9 }
 0x569   :  { %4899 = vmatprep.subr.bf16.mxu1 %v5850_v9 }
 0x56f   :  { %4842 = vmatmul.mubr.msk.bf16.gmra.mxu1 %vm798_vm2, %v793_v34 }
 0x570   :  { %4869 = vmatprep.mubr.msk.bf16.mxu1 %vm5851_vm1, %v5850_v9 }
 0x5e7   :  { %v842_v36 = vpop.f32.mrf.mxu1 }
 0x5e8   :  { %v6348_v37 = vadd.f32 %v842_v36, %v6345_v24 }
 0x5e9   :  { %v4793_v39 = vpop.f32.mrf.mxu1 }
 0x5ea   :  { %v1064_v41 = vsel %vm1063_vm3, %v6348_v37, -inf }
 0x5eb   :  { %1065 = vmax.xlane.f32.xlu1 %v1064_v41  ;;  %v845_v42 = vpop.f32.mrf.mxu1 }
 0x5ec   :  { %v6358_v43 = vadd.f32 %v845_v42, %v6353_v38 }
 0x5ed   :  { %v4794_v44 = vpop.f32.mrf.mxu1 }
 0x5ee   :  { %v1067_v49 = vsel %vm1063_vm3, %v6358_v43, -inf }
 0x5ef   :  { %1068 = vmax.xlane.f32.xlu0 %v1067_v49  ;;  %v850_v51 = vpop.f32.mrf.mxu1 }
 0x5f0   :  { %v6368_v54 = vadd.f32 %v850_v51, %v6363_v47 }
 0x5f1   :  { %v4797_v57 = vpop.f32.mrf.mxu1 }
 0x5f2   :  { %v1070_v59 = vsel %vm1063_vm3, %v6368_v54, -inf }
 0x5f3   :  { %1071 = vmax.xlane.f32.xlu1 %v1070_v59  ;;  %v853_v62 = vpop.f32.mrf.mxu1 }
 0x5f4   :  { %v6378_v63 = vadd.f32 %v853_v62, %v6373_v58 }
 0x5f5   :  { %v4798_v56 = vpop.f32.mrf.mxu1 }
 0x5f6   :  { %v1073_v48 = vsel %vm1063_vm3, %v6378_v63, -inf }
 0x5f7   :  { %1074 = vmax.xlane.f32.xlu1 %v1073_v48  ;;  %v858_v52 = vpop.f32.mrf.mxu1  ;;  %v974_v61 = vpop.f32.mrf.mxu0 }
 0x5f8   :  { %v6388_v2 = vadd.f32 %v858_v52, %v6383_v46  ;;  %v6396_v8 = vadd.f32 %v974_v61, %v6345_v24 }
 0x5f9   :  { %v4801_v4 = vpop.f32.mrf.mxu1  ;;  %v4821_v6 = vpop.f32.mrf.mxu0 }
 0x5fa   :  { %v1076_v10 = vsel %vm1063_vm3, %v6388_v2, -inf  ;;  %v1100_v20 = vsel %vm1063_vm3, %v6396_v8, -inf }
 0x5fb   :  { %1077 = vmax.xlane.f32.xlu1 %v1076_v10  ;;  %v861_v11 = vpop.f32.mrf.mxu1  ;;  %v977_v12 = vpop.f32.mrf.mxu0 }
 0x5fc   :  { %v6401_v5 = vadd.f32 %v861_v11, %v6393_v7  ;;  %v6404_v17 = vadd.f32 %v977_v12, %v6353_v38 }
 0x5fd   :  { %v4802_v13 = vpop.f32.mrf.mxu1  ;;  %v4822_v15 = vpop.f32.mrf.mxu0 }
 0x5fe   :  { %v1079_v18 = vsel %vm1063_vm3, %v6401_v5, -inf  ;;  %v1103_v28 = vsel %vm1063_vm3, %v6404_v17, -inf }
 0x5ff   :  { %1080 = vmax.xlane.f32.xlu0 %v1079_v18  ;;  %v908_v21 = vpop.f32.mrf.mxu1  ;;  %1101 = vmax.xlane.f32.xlu1 %v1100_v20  ;;  %v982_v22 = vpop.f32.mrf.mxu0 }
 0x600   :  { %v6411_v23 = vadd.f32 %v908_v21, %v6345_v24  ;;  %v6414_v27 = vadd.f32 %v982_v22, %v6363_v47 }
 0x601   :  { %v4807_v25 = vpop.f32.mrf.mxu1  ;;  %v4825_v26 = vpop.f32.mrf.mxu0 }
 0x602   :  { %v1082_v14 = vsel %vm1063_vm3, %v6411_v23, -inf  ;;  %v1106_v36 = vsel %vm1063_vm3, %v6414_v27, -inf }
 0x603   :  { %v911_v30 = vpop.f32.mrf.mxu1  ;;  %1083 = vmax.xlane.f32.xlu1 %v1082_v14  ;;  %1104 = vmax.xlane.f32.xlu0 %v1103_v28  ;;  %v985_v19 = vpop.f32.mrf.mxu0 }
 0x604   :  { %v6421_v31 = vadd.f32 %v985_v19, %v6373_v58  ;;  %v6424_v34 = vadd.f32 %v911_v30, %v6353_v38 }
 0x605   :  { %v4808_v32 = vpop.f32.mrf.mxu1  ;;  %v4826_v33 = vpop.f32.mrf.mxu0 }
 0x606   :  { %v1109_v39 = vsel %vm1063_vm3, %v6421_v31, -inf  ;;  %v1085_v49 = vsel %vm1063_vm3, %v6424_v34, -inf }
 0x607   :  { %v916_v41 = vpop.f32.mrf.mxu1  ;;  %1107 = vmax.xlane.f32.xlu1 %v1106_v36  ;;  %1110 = vmax.xlane.f32.xlu0 %v1109_v39 }
 0x608   :  { %v6431_v44 = vadd.f32 %v916_v41, %v6363_v47 }
 0x609   :  { %v4811_v42 = vpop.f32.mrf.mxu1 }
 0x60a   :  { %v1088_v62 = vsel %vm1063_vm3, %v6431_v44, -inf }
 0x60b   :  { %v919_v51 = vpop.f32.mrf.mxu1  ;;  %1086 = vmax.xlane.f32.xlu1 %v1085_v49 }
 0x60c   :  { %v6436_v59 = vadd.f32 %v919_v51, %v6373_v58 }
 0x60d   :  { %v4812_v57 = vpop.f32.mrf.mxu1 }
 0x60e   :  { %v1091_v61 = vsel %vm1063_vm3, %v6436_v59, -inf }
 0x60f   :  { %v924_v56 = vpop.f32.mrf.mxu1  ;;  %1089 = vmax.xlane.f32.xlu1 %v1088_v62 }
 0x610   :  { %v6441_v52 = vadd.f32 %v924_v56, %v6383_v46 }
 0x611   :  { %v4815_v48 = vpop.f32.mrf.mxu1 }
 0x612   :  { %v1094_v11 = vsel %vm1063_vm3, %v6441_v52, -inf }
 0x613   :  { %v927_v4 = vpop.f32.mrf.mxu1  ;;  %1092 = vmax.xlane.f32.xlu1 %v1091_v61 }
 0x614   :  { %v6446_v6 = vadd.f32 %v927_v4, %v6393_v7 }
 0x615   :  { %v4816_v10 = vpop.f32.mrf.mxu1 }
 0x616   :  { %v1097_v12 = vsel %vm1063_vm3, %v6446_v6, -inf }
 0x617   :  { %v990_v13 = vpop.f32.mrf.mxu1  ;;  %1095 = vmax.xlane.f32.xlu1 %v1094_v11  ;;  %1098 = vmax.xlane.f32.xlu0 %v1097_v12 }
 0x618   :  { %v6453_v15 = vadd.f32 %v990_v13, %v6383_v46 }
 0x619   :  { %v4829_v18 = vpop.f32.mrf.mxu1 }
 0x61a   :  { %v1112_v20 = vsel %vm1063_vm3, %v6453_v15, -inf }
 0x61b   :  { %v993_v21 = vpop.f32.mrf.mxu1  ;;  %1113 = vmax.xlane.f32.xlu1 %v1112_v20 }
 0x61c   :  { %v6458_v22 = vadd.f32 %v993_v21, %v6393_v7 }
 0x61d   :  { %v4830_v25 = vpop.f32.mrf.mxu1 }
 0x61e   :  { %v1115_v26 = vsel %vm1063_vm3, %v6458_v22, -inf }
 0x61f   :  { %1116 = vmax.xlane.f32.xlu0 %v1115_v26  ;;  %v1040_v14 = vpop.f32.mrf.mxu1 }
 0x620   :  { %v6463_v28 = vadd.f32 %v1040_v14, %v6345_v24 }
 0x621   :  { %v4835_v30 = vpop.f32.mrf.mxu1 }
 0x622   :  { %v1118_v19 = vsel %vm1063_vm3, %v6463_v28, -inf }
 0x623   :  { %1119 = vmax.xlane.f32.xlu1 %v1118_v19  ;;  %v1043_v32 = vpop.f32.mrf.mxu1 }
 0x624   :  { %v6468_v33 = vadd.f32 %v1043_v32, %v6353_v38 }
 0x625   :  { %v4836_v36 = vpop.f32.mrf.mxu1 }
 0x626   :  { %v1121_v39 = vsel %vm1063_vm3, %v6468_v33, -inf }
 0x627   :  { %1122 = vmax.xlane.f32.xlu0 %v1121_v39  ;;  %v1048_v41 = vpop.f32.mrf.mxu1 }
 0x628   :  { %v6473_v42 = vadd.f32 %v1048_v41, %v6363_v47 }
 0x629   :  { %v4839_v24 = vpop.f32.mrf.mxu1 }
 0x62a   :  { %v1124_v49 = vsel %vm1063_vm3, %v6473_v42, -inf }
 0x62b   :  { %1125 = vmax.xlane.f32.xlu1 %v1124_v49  ;;  %v1051_v51 = vpop.f32.mrf.mxu1 }
 0x62c   :  { %v6478_v57 = vadd.f32 %v1051_v51, %v6373_v58 }
 0x62d   :  { %v4840_v38 = vpop.f32.mrf.mxu1 }
 0x62e   :  { %v1127_v62 = vsel %vm1063_vm3, %v6478_v57, -inf }
 0x62f   :  { %1128 = vmax.xlane.f32.xlu0 %v1127_v62  ;;  %v1056_v56 = vpop.f32.mrf.mxu1 }
 0x630   :  { %v6483_v48 = vadd.f32 %v1056_v56, %v6383_v46 }
 0x631   :  { %v4843_v47 = vpop.f32.mrf.mxu1 }
 0x632   :  { %v1130_v61 = vsel %vm1063_vm3, %v6483_v48, -inf }
 0x633   :  { %1131 = vmax.xlane.f32.xlu1 %v1130_v61  ;;  %v1059_v4 = vpop.f32.mrf.mxu1 }
 0x634   :  { %v6488_v10 = vadd.f32 %v1059_v4, %v6393_v7 }
 0x635   :  { %v4844_v58 = vpop.f32.mrf.mxu1 }
 0x636   :  { %v1133_v11 = vsel %vm1063_vm3, %v6488_v10, -inf }
 0x637   :  { %1134 = vmax.xlane.f32.xlu0 %v1133_v11 }
 0x644   :  { %5163 = vrot.lane.b32.xlu1 %v6246_v16, %s5849_s1 }
 0x648   :  { %5168 = vrot.lane.b32.xlu1 %v6224_v3, %s5848_s30 }
 0x64d   :  { %5158 = vrot.lane.b32.xlu0 %v6246_v16, %s5848_s30 }
 0x674   :  { %v1066_v46 = vpop.xlane.xlu1 %1065 }
 0x675   :  { %v1136_v12 = vsub.f32 %v6348_v37, %v1066_v46 }
 0x677   :  { %v1160_v13 = vmul.f32 1.442695, %v1136_v12 }
 0x678   :  { %v1069_v7 = vpop.xlane.xlu0 %1068 }
 0x679   :  { %5515 = vpow2.f32 %v1160_v13  ;;  %v1137_v18 = vsub.f32 %v6358_v43, %v1069_v7 }
 0x67b   :  { %v1162_v20 = vmul.f32 1.442695, %v1137_v18 }
 0x67c   :  { %v1072_v21 = vpop.xlane.xlu1 %1071 }
 0x67d   :  { %5517 = vpow2.f32 %v1162_v20  ;;  %v1138_v25 = vsub.f32 %v6368_v54, %v1072_v21 }
 0x67f   :  { %v1164_v26 = vmul.f32 1.442695, %v1138_v25 }
 0x680   :  { %v1075_v14 = vpop.xlane.xlu1 %1074 }
 0x681   :  { %5519 = vpow2.f32 %v1164_v26  ;;  %v1139_v30 = vsub.f32 %v6378_v63, %v1075_v14 }
 0x683   :  { %v1166_v19 = vmul.f32 1.442695, %v1139_v30 }
 0x684   :  { %v1078_v16 = vpop.xlane.xlu1 %1077 }
 0x685   :  { %5521 = vpow2.f32 %v1166_v19  ;;  %v1140_v37 = vsub.f32 %v6388_v2, %v1078_v16 }
 0x686   :  { %v6503_v32 = vpop.eup %5515 }
 0x687   :  { %v1168_v36 = vmul.f32 1.442695, %v1140_v37  ;;  %v1208_v43 = vsel %vm1063_vm3, %v6503_v32, 0.0 }
 0x688   :  { %v1102_v39 = vpop.xlane.xlu1 %1101  ;;  %1209 = vadd.xlane.f32.xlu1 %v1208_v43  ;;  %v1081_v41 = vpop.xlane.xlu0 %1080 }
 0x689   :  { %5523 = vpow2.f32 %v1168_v36  ;;  %v1148_v54 = vsub.f32 %v6396_v8, %v1102_v39  ;;  %v1141_v24 = vsub.f32 %v6401_v5, %v1081_v41 }
 0x68a   :  { %v6509_v63 = vpop.eup %5517 }
 0x68b   :  { %v1184_v49 = vmul.f32 1.442695, %v1148_v54  ;;  %v1170_v51 = vmul.f32 1.442695, %v1141_v24  ;;  %v1211_v2 = vsel %vm1063_vm3, %v6509_v63, 0.0 }
 0x68c   :  { %v1084_v38 = vpop.xlane.xlu1 %1083  ;;  %1212 = vadd.xlane.f32.xlu0 %v1211_v2  ;;  %v1105_v62 = vpop.xlane.xlu0 %1104 }
 0x68d   :  { %5525 = vpow2.f32 %v1184_v49  ;;  %v1142_v56 = vsub.f32 %v6411_v23, %v1084_v38  ;;  %v1149_v47 = vsub.f32 %v6404_v17, %v1105_v62 }
 0x68e   :  { %v6515_v61 = vpop.eup %5519  ;;  %5527 = vpow2.f32 %v1170_v51 }
 0x68f   :  { %v1172_v8 = vmul.f32 1.442695, %v1142_v56  ;;  %v1186_v5 = vmul.f32 1.442695, %v1149_v47  ;;  %v1214_v4 = vsel %vm1063_vm3, %v6515_v61, 0.0 }
 0x690   :  { %v1108_v58 = vpop.xlane.xlu1 %1107  ;;  %1215 = vadd.xlane.f32.xlu1 %v1214_v4  ;;  %v1111_v46 = vpop.xlane.xlu0 %1110 }
 0x691   :  { %5529 = vpow2.f32 %v1172_v8  ;;  %v1150_v11 = vsub.f32 %v6414_v27, %v1108_v58  ;;  %v1151_v13 = vsub.f32 %v6421_v31, %v1111_v46 }
 0x692   :  { %v6520_v12 = vpop.eup %5521  ;;  %5531 = vpow2.f32 %v1186_v5 }
 0x693   :  { %v1188_v23 = vmul.f32 1.442695, %v1150_v11  ;;  %v1217_v17 = vsel %vm1063_vm3, %v6520_v12, 0.0  ;;  %v1190_v25 = vmul.f32 1.442695, %v1151_v13 }
 0x694   :  { %v1087_v7 = vpop.xlane.xlu1 %1086  ;;  %1218 = vadd.xlane.f32.xlu0 %v1217_v17 }
 0x695   :  { %5533 = vpow2.f32 %v1188_v23  ;;  %v1143_v18 = vsub.f32 %v6424_v34, %v1087_v7 }
 0x696   :  { %v6526_v20 = vpop.eup %5523 }
 0x697   :  { %v1174_v21 = vmul.f32 1.442695, %v1143_v18  ;;  %v1220_v27 = vsel %vm1063_vm3, %v6526_v20, 0.0 }
 0x698   :  { %v1090_v26 = vpop.xlane.xlu1 %1089  ;;  %1221 = vadd.xlane.f32.xlu1 %v1220_v27 }
 0x699   :  { %5535 = vpow2.f32 %v1174_v21  ;;  %v1144_v14 = vsub.f32 %v6431_v44, %v1090_v26 }
 0x69a   :  { %v6531_v30 = vpop.eup %5525  ;;  %5537 = vpow2.f32 %v1190_v25 }
 0x69b   :  { %v6533_v31 = vpop.eup %5527  ;;  %v1176_v19 = vmul.f32 1.442695, %v1144_v14  ;;  %v1244_v34 = vsel %vm1063_vm3, %v6531_v30, 0.0 }
 0x69c   :  { %v1093_v16 = vpop.xlane.xlu1 %1092  ;;  %1245 = vadd.xlane.f32.xlu1 %v1244_v34  ;;  %v1223_v37 = vsel %vm1063_vm3, %v6533_v31, 0.0 }
 0x69d   :  { %5539 = vpow2.f32 %v1176_v19  ;;  %v1145_v36 = vsub.f32 %v6436_v59, %v1093_v16  ;;  %1224 = vadd.xlane.f32.xlu0 %v1223_v37 }
 0x69e   :  { %v6540_v43 = vpop.eup %5529 }
 0x69f   :  { %v6542_v44 = vpop.eup %5531  ;;  %v1178_v39 = vmul.f32 1.442695, %v1145_v36  ;;  %v1226_v41 = vsel %vm1063_vm3, %v6540_v43, 0.0 }
 0x6a0   :  { %v1096_v54 = vpop.xlane.xlu1 %1095  ;;  %1227 = vadd.xlane.f32.xlu1 %v1226_v41  ;;  %v1247_v24 = vsel %vm1063_vm3, %v6542_v44, 0.0  ;;  %v1099_v49 = vpop.xlane.xlu0 %1098 }
 0x6a1   :  { %5541 = vpow2.f32 %v1178_v39  ;;  %v1146_v51 = vsub.f32 %v6441_v52, %v1096_v54  ;;  %1248 = vadd.xlane.f32.xlu0 %v1247_v24  ;;  %v1147_v59 = vsub.f32 %v6446_v6, %v1099_v49 }
 0x6a2   :  { %v6550_v2 = vpop.eup %5533 }
 0x6a3   :  { %v1180_v38 = vmul.f32 1.442695, %v1146_v51  ;;  %v1182_v62 = vmul.f32 1.442695, %v1147_v59  ;;  %v1250_v56 = vsel %vm1063_vm3, %v6550_v2, 0.0 }
 0x6a4   :  { %v1114_v47 = vpop.xlane.xlu1 %1113 }
 0x6a5   :  { %5543 = vpow2.f32 %v1180_v38  ;;  %v1152_v8 = vsub.f32 %v6453_v15, %v1114_v47  ;;  %1251 = vadd.xlane.f32.xlu0 %v1250_v56 }
 0x6a6   :  { %v6555_v5 = vpop.eup %5535  ;;  %5545 = vpow2.f32 %v1182_v62 }
 0x6a7   :  { %v1192_v4 = vmul.f32 1.442695, %v1152_v8  ;;  %v1229_v52 = vsel %vm1063_vm3, %v6555_v5, 0.0  ;;  %v6559_v58 = vpop.eup %5537 }
 0x6a8   :  { %v1117_v6 = vpop.xlane.xlu0 %1116  ;;  %v1253_v13 = vsel %vm1063_vm3, %v6559_v58, 0.0 }
 0x6a9   :  { %5547 = vpow2.f32 %v1192_v4  ;;  %1230 = vadd.xlane.f32.xlu0 %v1229_v52  ;;  %v1153_v11 = vsub.f32 %v6458_v22, %v1117_v6 }
 0x6aa   :  { %v6562_v46 = vpop.eup %5539 }
 0x6ab   :  { %v1194_v23 = vmul.f32 1.442695, %v1153_v11  ;;  %v1232_v15 = vsel %vm1063_vm3, %v6562_v46, 0.0 }
 0x6ac   :  { %v1120_v17 = vpop.xlane.xlu1 %1119  ;;  %1233 = vadd.xlane.f32.xlu1 %v1232_v15 }
 0x6ad   :  { %5549 = vpow2.f32 %v1194_v23  ;;  %v1154_v7 = vsub.f32 %v6463_v28, %v1120_v17  ;;  %1254 = vadd.xlane.f32.xlu0 %v1253_v13 }
 0x6ae   :  { %v6569_v18 = vpop.eup %5541 }
 0x6af   :  { %v1196_v21 = vmul.f32 1.442695, %v1154_v7  ;;  %v1235_v22 = vsel %vm1063_vm3, %v6569_v18, 0.0 }
 0x6b0   :  { %v1123_v27 = vpop.xlane.xlu0 %1122 }
 0x6b1   :  { %5551 = vpow2.f32 %v1196_v21  ;;  %1236 = vadd.xlane.f32.xlu0 %v1235_v22  ;;  %v1155_v25 = vsub.f32 %v6468_v33, %v1123_v27 }
 0x6b2   :  { %v6574_v26 = vpop.eup %5543 }
 0x6b3   :  { %v6576_v14 = vpop.eup %5545  ;;  %v1198_v19 = vmul.f32 1.442695, %v1155_v25  ;;  %v1238_v28 = vsel %vm1063_vm3, %v6574_v26, 0.0 }
 0x6b4   :  { %v1126_v34 = vpop.xlane.xlu1 %1125  ;;  %1239 = vadd.xlane.f32.xlu1 %v1238_v28  ;;  %v1241_v16 = vsel %vm1063_vm3, %v6576_v14, 0.0 }
 0x6b5   :  { %5553 = vpow2.f32 %v1198_v19  ;;  %v1156_v37 = vsub.f32 %v6473_v42, %v1126_v34  ;;  %1242 = vadd.xlane.f32.xlu0 %v1241_v16 }
 0x6b6   :  { %v6583_v36 = vpop.eup %5547 }
 0x6b7   :  { %v1200_v33 = vmul.f32 1.442695, %v1156_v37  ;;  %v1256_v39 = vsel %vm1063_vm3, %v6583_v36, 0.0 }
 0x6b8   :  { %1257 = vadd.xlane.f32.xlu1 %v1256_v39  ;;  %v1129_v41 = vpop.xlane.xlu0 %1128 }
 0x6b9   :  { %5555 = vpow2.f32 %v1200_v33  ;;  %v1157_v54 = vsub.f32 %v6478_v57, %v1129_v41 }
 0x6ba   :  { %v6588_v24 = vpop.eup %5549 }
 0x6bb   :  { %v1202_v49 = vmul.f32 1.442695, %v1157_v54  ;;  %v1259_v51 = vsel %vm1063_vm3, %v6588_v24, 0.0 }
 0x6bc   :  { %v1132_v59 = vpop.xlane.xlu1 %1131  ;;  %1260 = vadd.xlane.f32.xlu0 %v1259_v51 }
 0x6bd   :  { %5557 = vpow2.f32 %v1202_v49  ;;  %v1158_v42 = vsub.f32 %v6483_v48, %v1132_v59 }
 0x6be   :  { %v6593_v38 = vpop.eup %5551 }
 0x6bf   :  { %v1204_v62 = vmul.f32 1.442695, %v1158_v42  ;;  %v1262_v56 = vsel %vm1063_vm3, %v6593_v38, 0.0 }
 0x6c0   :  { %1263 = vadd.xlane.f32.xlu1 %v1262_v56  ;;  %v1135_v23 = vpop.xlane.xlu0 %1134  ;;  %v6624_v21 = vpop.permute.xlu1 %5163 }
 0x6c1   :  { %5559 = vpow2.f32 %v1204_v62  ;;  %v1159_v15 = vsub.f32 %v6488_v10, %v1135_v23 }
 0x6c2   :  { %v6597_v57 = vpop.eup %5553 }
 0x6c3   :  { %v1265_v47 = vsel %vm1063_vm3, %v6597_v57, 0.0  ;;  %v1206_v17 = vmul.f32 1.442695, %v1159_v15 }
 0x6c4   :  { %1266 = vadd.xlane.f32.xlu0 %v1265_v47  ;;  %v5169_v22 = vpop.permute.xlu1 %5168  ;;  %v5159_v27 = vpop.permute.xlu0 %5158 }
 0x6c5   :  { %5561 = vpow2.f32 %v1206_v17  ;;  %v5161_v37 = vunpack.i.h.bf16 %v5159_v27  ;;  %v5160_v33 = vunpack.i.l.bf16 %v5159_v27  ;;  %v5171_v49 = vunpack.i.h.bf16 %v5169_v22 }
 0x6c6   :  { %v6601_v8 = vpop.eup %5555  ;;  %v5170_v51 = vunpack.i.l.bf16 %v5169_v22 }
 0x6c7   :  { %v1268_v4 = vsel %vm1063_vm3, %v6601_v8, 0.0  ;;  %v1348_v59 = vpack.c.bf16 %v5161_v37, %v5160_v33 }
 0x6c8   :  { %1269 = vadd.xlane.f32.xlu0 %v1268_v4 }
 0x6ca   :  { %v6605_v48 = vpop.eup %5557 }
 0x6cb   :  { %v1271_v52 = vsel %vm1063_vm3, %v6605_v48, 0.0 }
 0x6cc   :  { %1272 = vadd.xlane.f32.xlu0 %v1271_v52 }
 0x6ce   :  { %v6609_v6 = vpop.eup %5559 }
 0x6cf   :  { %v1274_v11 = vsel %vm1063_vm3, %v6609_v6, 0.0 }
 0x6d0   :  { %1275 = vadd.xlane.f32.xlu0 %v1274_v11 }
 0x6d1   :  { %5178 = vrot.lane.b32.xlu1 %v6206_v53, %s5848_s30 }
 0x6d2   :  { %v6618_v13 = vpop.eup %5561 }
 0x6d3   :  { %v1277_v7 = vsel %vm1063_vm3, %v6618_v13, 0.0 }
 0x6e6   :  { %5173 = vrot.lane.b32.xlu0 %v6224_v3, %s5849_s1 }
 0x6f5   :  { %1278 = vadd.xlane.f32.xlu1 %v1277_v7 }
 0x706   :  { %5183 = vrot.lane.b32.xlu1 %v6206_v53, %s5849_s1 }
 0x711   :  { %v1210_v25 = vpop.xlane.xlu1 %1209 }
 0x712   :  { %5563 = vrcp.f32 %v1210_v25 }
 0x715   :  { %v1213_v10 = vpop.xlane.xlu0 %1212 }
 0x716   :  { %5565 = vrcp.f32 %v1213_v10 }
 0x719   :  { %v1216_v19 = vpop.xlane.xlu1 %1215 }
 0x71a   :  { %5567 = vrcp.f32 %v1216_v19 }
 0x71d   :  { %v1219_v3 = vpop.xlane.xlu0 %1218 }
 0x71e   :  { %5569 = vrcp.f32 %v1219_v3 }
 0x71f   :  { %v5564_v28 = vpop.eup %5563 }
 0x720   :  { %v1304_v39 = vmul.f32 %v5564_v28, %v6503_v32 }
 0x721   :  { %v1222_v34 = vpop.xlane.xlu1 %1221 }
 0x722   :  { %5571 = vrcp.f32 %v1222_v34  ;;  %v5165_v34 = vunpack.i.l.bf16 %v6624_v21 }
 0x723   :  { %v5566_v16 = vpop.eup %5565 }
 0x724   :  { %v1305_v53 = vmul.f32 %v5566_v16, %v6509_v63  ;;  %v1347_v63 = vpack.c.bf16 %v5171_v49, %v5170_v51 }
 0x725   :  { %v1246_v42 = vpop.xlane.xlu1 %1245 }
 0x726   :  { %v1225_v41 = vpop.xlane.xlu0 %1224  ;;  %v1328_v54 = vpack.c.bf16 %v1305_v53, %v1304_v39 }
 0x727   :  { %5573 = vrcp.f32 %v1225_v41  ;;  %v5568_v62 = vpop.eup %5567 }
 0x728   :  { %4852 = vmatmul.mubr.msk.bf16.vlgmr.msra.gmra.mxu0 %vm1063_vm3, %v1328_v54  ;;  %v1306_v47 = vmul.f32 %v5568_v62, %v6515_v61 }
 0x729   :  { %4882 = vmatpush3.bf16.msra.mxu0 %v1348_v59  ;;  %4855 = vmatprep.mubr.msk.bf16.mxu0 %vm5851_vm1, %v5850_v9  ;;  %v1228_v52 = vpop.xlane.xlu1 %1227 }
 0x72a   :  { %v1249_v56 = vpop.xlane.xlu0 %1248  ;;  %4883 = vmatprep.subr.bf16.mxu0 %v5850_v9  ;;  %5575 = vrcp.f32 %v1228_v52 }
 0x72b   :  { %v5570_v32 = vpop.eup %5569 }
 0x72c   :  { %v1307_v4 = vmul.f32 %v5570_v32, %v6520_v12 }
 0x72d   :  { %4884 = vmatpush3.bf16.msra.mxu0 %v1347_v63 }
 0x72e   :  { %v1252_v11 = vpop.xlane.xlu0 %1251  ;;  %v1329_v23 = vpack.c.bf16 %v1307_v4, %v1306_v47  ;;  %4885 = vmatprep.subr.bf16.mxu0 %v5850_v9 }
 0x72f   :  { %v5572_v15 = vpop.eup %5571 }
 0x730   :  { %4856 = vmatmul.mubr.msk.bf16.gmra.mxu0 %vm1063_vm3, %v1329_v23  ;;  %v1308_v61 = vmul.f32 %v5572_v15, %v6526_v20 }
 0x731   :  { %4859 = vmatprep.mubr.msk.bf16.mxu0 %vm5851_vm1, %v5850_v9 }
 0x732   :  { %v1231_v17 = vpop.xlane.xlu0 %1230 }
 0x733   :  { %5577 = vrcp.f32 %v1231_v17 }
 0x734   :  { %v5574_v7 = vpop.eup %5573 }
 0x735   :  { %v1309_v12 = vmul.f32 %v5574_v7, %v6533_v31  ;;  %v1234_v22 = vpop.xlane.xlu1 %1233  ;;  %v5166_v31 = vunpack.i.h.bf16 %v6624_v21 }
 0x736   :  { %v1255_v27 = vpop.xlane.xlu0 %1254  ;;  %5579 = vrcp.f32 %v1234_v22 }
 0x737   :  { %v1330_v25 = vpack.c.bf16 %v1309_v12, %v1308_v61  ;;  %v5576_v3 = vpop.eup %5575  ;;  %v1351_v39 = vpack.c.bf16 %v5166_v31, %v5165_v34 }
 0x738   :  { %v1310_v16 = vmul.f32 %v5576_v3, %v6540_v43 }
 0x739   :  { %4860 = vmatmul.mubr.msk.bf16.gmra.mxu0 %vm1063_vm3, %v1330_v25 }
 0x73a   :  { %v1237_v10 = vpop.xlane.xlu0 %1236  ;;  %4887 = vmatprep.mubr.msk.bf16.mxu0 %vm5851_vm1, %v5850_v9 }
 0x73b   :  { %5581 = vrcp.f32 %v1237_v10 }
 0x73c   :  { %5583 = vrcp.f32 %v1249_v56 }
 0x73d   :  { %v1240_v19 = vpop.xlane.xlu1 %1239 }
 0x73e   :  { %5585 = vrcp.f32 %v1240_v19  ;;  %v1243_v28 = vpop.xlane.xlu0 %1242 }
 0x73f   :  { %5587 = vrcp.f32 %v1243_v28 }
 0x740   :  { %v5578_v20 = vpop.eup %5577  ;;  %5589 = vrcp.f32 %v1246_v42 }
 0x741   :  { %v1311_v37 = vmul.f32 %v5578_v20, %v6555_v5  ;;  %v1258_v53 = vpop.xlane.xlu1 %1257  ;;  %5591 = vrcp.f32 %v1255_v27 }
 0x742   :  { %5593 = vrcp.f32 %v1252_v11 }
 0x743   :  { %v1331_v33 = vpack.c.bf16 %v1311_v37, %v1310_v16  ;;  %v5580_v41 = vpop.eup %5579 }
 0x744   :  { %v1312_v43 = vmul.f32 %v5580_v41, %v6562_v46 }
 0x745   :  { %4870 = vmatmul.mubr.msk.bf16.vlgmr.msra.gmra.mxu1 %vm1063_vm3, %v1331_v33  ;;  %v1261_v21 = vpop.xlane.xlu0 %1260 }
 0x746   :  { %4900 = vmatpush3.bf16.msra.mxu1 %v1351_v39  ;;  %4873 = vmatprep.mubr.msk.bf16.mxu1 %vm5851_vm1, %v5850_v9  ;;  %5595 = vrcp.f32 %v1261_v21 }
 0x747   :  { %4901 = vmatprep.subr.bf16.mxu1 %v5850_v9  ;;  %5597 = vrcp.f32 %v1258_v53 }
 0x748   :  { %v5582_v54 = vpop.eup %5581 }
 0x749   :  { %v1264_v49 = vpop.xlane.xlu1 %1263  ;;  %v1313_v5 = vmul.f32 %v5582_v54, %v6569_v18  ;;  %v5584_v51 = vpop.eup %5583 }
 0x74a   :  { %v1317_v52 = vmul.f32 %v5584_v51, %v6542_v44 }
 0x74b   :  { %v5586_v59 = vpop.eup %5585  ;;  %v1332_v42 = vpack.c.bf16 %v1313_v5, %v1312_v43 }
 0x74c   :  { %v5588_v62 = vpop.eup %5587  ;;  %v1314_v46 = vmul.f32 %v5586_v59, %v6574_v26 }
 0x74d   :  { %4874 = vmatmul.mubr.msk.bf16.gmra.mxu1 %vm1063_vm3, %v1332_v42  ;;  %v5179_v56 = vpop.permute.xlu1 %5178  ;;  %v1267_v32 = vpop.xlane.xlu0 %1266  ;;  %v1315_v18 = vmul.f32 %v5588_v62, %v6576_v14 }
 0x74e   :  { %v5590_v63 = vpop.eup %5589  ;;  %v5181_v47 = vunpack.i.h.bf16 %v5179_v56  ;;  %v5180_v4 = vunpack.i.l.bf16 %v5179_v56  ;;  %4877 = vmatprep.mubr.msk.bf16.mxu1 %vm5851_vm1, %v5850_v9  ;;  %5599 = vrcp.f32 %v1267_v32 }
 0x74f   :  { %v1316_v23 = vmul.f32 %v5590_v63, %v6531_v30  ;;  %v1333_v17 = vpack.c.bf16 %v1315_v18, %v1314_v46  ;;  %v5592_v61 = vpop.eup %5591  ;;  %5601 = vrcp.f32 %v1264_v49 }
 0x750   :  { %v1346_v11 = vpack.c.bf16 %v5181_v47, %v5180_v4  ;;  %v5594_v44 = vpop.eup %5593  ;;  %v1319_v30 = vmul.f32 %v5592_v61, %v6559_v58 }
 0x751   :  { %v1270_v15 = vpop.xlane.xlu0 %1269  ;;  %v1334_v7 = vpack.c.bf16 %v1317_v52, %v1316_v23  ;;  %v1318_v14 = vmul.f32 %v5594_v44, %v6550_v2 }
 0x752   :  { %4886 = vmatpush3.bf16.msra.mxu0 %v1346_v11 }
 0x753   :  { %4917 = vmatprep.subr.bf16.mxu0 %v5850_v9  ;;  %v1335_v22 = vpack.c.bf16 %v1319_v30, %v1318_v14  ;;  %v5596_v27 = vpop.eup %5595 }
 0x754   :  { %v5598_v10 = vpop.eup %5597  ;;  %v1321_v28 = vmul.f32 %v5596_v27, %v6588_v24 }
 0x755   :  { %4878 = vmatmul.mubr.msk.bf16.gmra.mxu1 %vm1063_vm3, %v1333_v17  ;;  %v1273_v12 = vpop.xlane.xlu0 %1272  ;;  %4888 = vmatmul.mubr.msk.bf16.vlgmr.msra.gmra.mxu0 %vm1063_vm3, %v1334_v7  ;;  %v1320_v31 = vmul.f32 %v5598_v10, %v6583_v36 }
 0x756   :  { %4891 = vmatprep.mubr.msk.bf16.mxu0 %vm5851_vm1, %v5850_v9  ;;  %4905 = vmatprep.mubr.msk.bf16.mxu1 %vm5851_vm1, %v5850_v9  ;;  %5603 = vrcp.f32 %v1273_v12 }
 0x757   :  { %v1336_v58 = vpack.c.bf16 %v1321_v28, %v1320_v31  ;;  %5605 = vrcp.f32 %v1270_v15  ;;  %v5415_v31 = vld [vmem:[%s7883_s10 + $0x18] sm:$0xff]  }
 0x758   :  { %4918 = vmatpush3.bf16.msra.mxu0 %v5415_v31 }
 0x759   :  { %v1276_v26 = vpop.xlane.xlu0 %1275  ;;  %4919 = vmatprep.subr.bf16.mxu0 %v5850_v9 }
 0x75b   :  { %v5600_v34 = vpop.eup %5599 }
 0x75c   :  { %v5602_v24 = vpop.eup %5601  ;;  %v1323_v36 = vmul.f32 %v5600_v34, %v6597_v57 }
 0x75d   :  { %v5174_v25 = vpop.permute.xlu0 %5173  ;;  %4892 = vmatmul.mubr.msk.bf16.gmra.mxu0 %vm1063_vm3, %v1335_v22  ;;  %v1322_v53 = vmul.f32 %v5602_v24, %v6593_v38 }
 0x75e   :  { %v5176_v19 = vunpack.i.h.bf16 %v5174_v25  ;;  %v5175_v3 = vunpack.i.l.bf16 %v5174_v25  ;;  %4895 = vmatprep.mubr.msk.bf16.mxu0 %vm5851_vm1, %v5850_v9 }
 0x75f   :  { %v1337_v41 = vpack.c.bf16 %v1323_v36, %v1322_v53 }
 0x760   :  { %v1350_v20 = vpack.c.bf16 %v5176_v19, %v5175_v3 }
 0x762   :  { %4902 = vmatpush3.bf16.msra.mxu1 %v1350_v20 }
 0x763   :  { %4903 = vmatprep.subr.bf16.mxu1 %v5850_v9  ;;  %v5604_v54 = vpop.eup %5603 }
 0x764   :  { %v5606_v21 = vpop.eup %5605  ;;  %v1325_v49 = vmul.f32 %v5604_v54, %v6605_v48  ;;  %v5418_v54 = vld [vmem:[%s7883_s10] sm:$0xff]  }
 0x765   :  { %4896 = vmatmul.mubr.msk.bf16.gmra.mxu0 %vm1063_vm3, %v1336_v58  ;;  %v1324_v43 = vmul.f32 %v5606_v21, %v6601_v8 }
 0x766   :  { %4925 = vmatprep.mubr.msk.bf16.mxu0 %vm5851_vm1, %v5850_v9 }
 0x767   :  { %v1338_v5 = vpack.c.bf16 %v1325_v49, %v1324_v43 }
 0x77e   :  { %v1279_v2 = vpop.xlane.xlu1 %1278 }
 0x77f   :  { %5607 = vrcp.f32 %v1279_v2  ;;  %v5416_v2 = vld [vmem:[%s7883_s10 + $0x10] sm:$0xff]  }
 0x780   :  { %5609 = vrcp.f32 %v1276_v26  ;;  %4920 = vmatpush3.bf16.msra.mxu0 %v5416_v2 }
 0x781   :  { %4921 = vmatprep.subr.bf16.mxu0 %v5850_v9 }
 0x782   :  { %v5184_v16 = vpop.permute.xlu1 %5183 }
 0x783   :  { %v5186_v37 = vunpack.i.h.bf16 %v5184_v16  ;;  %v5185_v33 = vunpack.i.l.bf16 %v5184_v16 }
 0x785   :  { %v1349_v39 = vpack.c.bf16 %v5186_v37, %v5185_v33  ;;  %v5417_v37 = vld [vmem:[%s7883_s10 + $0x8] sm:$0xff]  }
 0x786   :  { %4922 = vmatpush3.bf16.msra.mxu0 %v5417_v37 }
 0x787   :  { %4904 = vmatpush3.bf16.msra.mxu1 %v1349_v39  ;;  %4923 = vmatprep.subr.bf16.mxu0 %v5850_v9 }
 0x78a   :  { %4906 = vmatmul.mubr.msk.bf16.vlgmr.msra.gmra.mxu1 %vm1063_vm3, %v1337_v41  ;;  %4924 = vmatpush3.bf16.msra.mxu0 %v5418_v54 }
 0x78b   :  { %4909 = vmatprep.mubr.msk.bf16.mxu1 %vm5851_vm1, %v5850_v9 }
 0x78c   :  { %v5608_v57 = vpop.eup %5607 }
 0x78d   :  { %v5610_v51 = vpop.eup %5609  ;;  %v1327_v38 = vmul.f32 %v5608_v57, %v6618_v13 }
 0x78e   :  { %v1326_v59 = vmul.f32 %v5610_v51, %v6609_v6 }
 0x790   :  { %v1339_v42 = vpack.c.bf16 %v1327_v38, %v1326_v59 }
 0x792   :  { %4910 = vmatmul.mubr.msk.bf16.gmra.mxu1 %vm1063_vm3, %v1338_v5 }
 0x793   :  { %4913 = vmatprep.mubr.msk.bf16.mxu1 %vm5851_vm1, %v5850_v9 }
 0x79a   :  { %4914 = vmatmul.mubr.msk.bf16.gmra.mxu1 %vm1063_vm3, %v1339_v42 }
 0x79b   :  { %2029 = vmatprep.mubr.bf16.mxu1 %v5845_v0 }
 0x7e8   :  { %v6692_v48 = vpop.f32.mrf.mxu0 }
 0x7ea   :  { %v4853_v8 = vpop.f32.mrf.mxu0 }
 0x7ec   :  { %v6694_v62 = vpop.f32.mrf.mxu0 }
 0x7ee   :  { %v4854_v56 = vpop.f32.mrf.mxu0 }
 0x7f0   :  { %v6696_v32 = vpop.f32.mrf.mxu0 }
 0x7f2   :  { %v4857_v63 = vpop.f32.mrf.mxu0 }
 0x7f4   :  { %v6698_v47 = vpop.f32.mrf.mxu0 }
 0x7f6   :  { %v4858_v4 = vpop.f32.mrf.mxu0 }
 0x7f9   :  { %v6700_v13 = vpop.f32.mrf.mxu0 }
 0x7fb   :  { %v4861_v6 = vpop.f32.mrf.mxu0 }
 0x7fd   :  { %v6702_v52 = vpop.f32.mrf.mxu0 }
 0x7ff   :  { %v4862_v46 = vpop.f32.mrf.mxu0 }
 0x805   :  { %v1461_v18 = vpop.f32.mrf.mxu1 }
 0x807   :  { %v4871_v11 = vpop.f32.mrf.mxu1 }
 0x809   :  { %v1464_v23 = vpop.f32.mrf.mxu1 }
 0x80a   :  { %v5187_v15 = vpack.i.bf16 %v1464_v23, %v1461_v18 }
 0x80b   :  { %v4872_v17 = vpop.f32.mrf.mxu1 }
 0x80c   :  { %5188 = vrot.lane.b32.xlu1 %v5187_v15, %s5852_s27 }
 0x80d   :  { %v1469_v7 = vpop.f32.mrf.mxu1 }
 0x80f   :  { %v4875_v61 = vpop.f32.mrf.mxu1 }
 0x811   :  { %v1472_v12 = vpop.f32.mrf.mxu1 }
 0x812   :  { %v5202_v44 = vpack.i.bf16 %v1472_v12, %v1469_v7 }
 0x813   :  { %v4876_v30 = vpop.f32.mrf.mxu1 }
 0x815   :  { %v1477_v26 = vpop.f32.mrf.mxu1  ;;  %v1527_v14 = vpop.f32.mrf.mxu0 }
 0x817   :  { %v4879_v22 = vpop.f32.mrf.mxu1  ;;  %v4889_v27 = vpop.f32.mrf.mxu0 }
 0x819   :  { %v1480_v25 = vpop.f32.mrf.mxu1  ;;  %v1530_v10 = vpop.f32.mrf.mxu0 }
 0x81a   :  { %v5192_v19 = vpack.i.bf16 %v1530_v10, %v1527_v14  ;;  %v5217_v36 = vpack.i.bf16 %v1480_v25, %v1477_v26 }
 0x81b   :  { %v4880_v3 = vpop.f32.mrf.mxu1  ;;  %v4890_v28 = vpop.f32.mrf.mxu0 }
 0x81c   :  { %5193 = vrot.lane.b32.xlu1 %v5192_v19, %s5853_s19 }
 0x81d   :  { %v1535_v20 = vpop.f32.mrf.mxu0 }
 0x81f   :  { %v4893_v58 = vpop.f32.mrf.mxu0 }
 0x821   :  { %v1538_v34 = vpop.f32.mrf.mxu0 }
 0x822   :  { %v5207_v16 = vpack.i.bf16 %v1538_v34, %v1535_v20 }
 0x823   :  { %v4894_v24 = vpop.f32.mrf.mxu0 }
 0x824   :  { %5208 = vrot.lane.b32.xlu0 %v5207_v16, %s5853_s19 }
 0x825   :  { %v1543_v33 = vpop.f32.mrf.mxu0 }
 0x827   :  { %v4897_v39 = vpop.f32.mrf.mxu0 }
 0x828   :  { %5218 = vrot.lane.b32.xlu0 %v5217_v36, %s5852_s27 }
 0x829   :  { %v1546_v53 = vpop.f32.mrf.mxu0 }
 0x82a   :  { %v5222_v63 = vpack.i.bf16 %v1546_v53, %v1543_v33 }
 0x82b   :  { %v4898_v41 = vpop.f32.mrf.mxu0 }
 0x84a   :  { %v1593_v21 = vpop.f32.mrf.mxu1 }
 0x84c   :  { %v4907_v49 = vpop.f32.mrf.mxu1 }
 0x84e   :  { %v1596_v43 = vpop.f32.mrf.mxu1 }
 0x84f   :  { %v5197_v5 = vpack.i.bf16 %v1596_v43, %v1593_v21 }
 0x850   :  { %v4908_v57 = vpop.f32.mrf.mxu1 }
 0x851   :  { %5198 = vrot.lane.b32.xlu1 %v5197_v5, %s5854_s5 }
 0x852   :  { %v1601_v51 = vpop.f32.mrf.mxu1 }
 0x854   :  { %v4911_v38 = vpop.f32.mrf.mxu1 }
 0x855   :  { %5203 = vrot.lane.b32.xlu1 %v5202_v44, %s5852_s27 }
 0x856   :  { %v1604_v59 = vpop.f32.mrf.mxu1 }
 0x857   :  { %v5212_v42 = vpack.i.bf16 %v1604_v59, %v1601_v51 }
 0x858   :  { %v4912_v8 = vpop.f32.mrf.mxu1 }
 0x859   :  { %5213 = vrot.lane.b32.xlu1 %v5212_v42, %s5854_s5 }
 0x85a   :  { %v1609_v56 = vpop.f32.mrf.mxu1 }
 0x85c   :  { %v4915_v4 = vpop.f32.mrf.mxu1 }
 0x85d   :  { %5223 = vrot.lane.b32.xlu1 %v5222_v63, %s5853_s19 }
 0x85e   :  { %v1612_v6 = vpop.f32.mrf.mxu1 }
 0x85f   :  { %v5227_v46 = vpack.i.bf16 %v1612_v6, %v1609_v56 }
 0x860   :  { %v4916_v18 = vpop.f32.mrf.mxu1 }
 0x861   :  { %5228 = vrot.lane.b32.xlu0 %v5227_v46, %s5854_s5 }
 0x87e   :  { %v5189_v11 = vpop.permute.xlu1 %5188 }
 0x87f   :  { %v5191_v15 = vunpack.i.h.bf16 %v5189_v11  ;;  %v5190_v17 = vunpack.i.l.bf16 %v5189_v11 }
 0x881   :  { %v1689_v44 = vsel %vm798_vm2, %v6694_v62, %v5191_v15  ;;  %v1688_v30 = vsel %vm798_vm2, %v6692_v48, %v5190_v17 }
 0x88e   :  { %v5194_v23 = vpop.permute.xlu1 %5193 }
 0x88f   :  { %v5196_v7 = vunpack.i.h.bf16 %v5194_v23  ;;  %v5195_v61 = vunpack.i.l.bf16 %v5194_v23 }
 0x891   :  { %v1695_v22 = vsel %vm1694_vm4, %v1688_v30, %v5195_v61  ;;  %v1696_v27 = vsel %vm1694_vm4, %v1689_v44, %v5196_v7 }
 0x896   :  { %v5209_v19 = vpop.permute.xlu0 %5208 }
 0x897   :  { %v5211_v58 = vunpack.i.h.bf16 %v5209_v19  ;;  %v5210_v2 = vunpack.i.l.bf16 %v5209_v19 }
 0x89a   :  { %v5219_v37 = vpop.permute.xlu0 %5218 }
 0x89b   :  { %v5220_v54 = vunpack.i.l.bf16 %v5219_v37 }
 0x89d   :  { %v1692_v57 = vsel %vm798_vm2, %v6700_v13, %v5220_v54 }
 0x8c3   :  { %v5199_v12 = vpop.permute.xlu1 %5198 }
 0x8c4   :  { %v5201_v26 = vunpack.i.h.bf16 %v5199_v12  ;;  %v5200_v14 = vunpack.i.l.bf16 %v5199_v12 }
 0x8c6   :  { %v1702_v25 = vsel %vm1063_vm3, %v1696_v27, %v5201_v26  ;;  %v1701_v10 = vsel %vm1063_vm3, %v1695_v22, %v5200_v14 }
 0x8c7   :  { %v1707_v3 = vpack.c.bf16 %v1702_v25, %v1701_v10  ;;  %v5204_v28 = vpop.permute.xlu1 %5203 }
 0x8c8   :  { %v5206_v20 = vunpack.i.h.bf16 %v5204_v28  ;;  %v5205_v31 = vunpack.i.l.bf16 %v5204_v28 }
 0x8c9   :  { %4926 = vmatmul.mubr.msk.bf16.vlgmr.msra.gmra.mxu0 %vm195_vm0, %v1707_v3 }
 0x8ca   :  { %v1691_v48 = vsel %vm798_vm2, %v6698_v47, %v5206_v20  ;;  %v1690_v62 = vsel %vm798_vm2, %v6696_v32, %v5205_v31  ;;  %4929 = vmatprep.mubr.msk.bf16.mxu0 %vm5851_vm1, %v5850_v9  ;;  %v5221_v32 = vunpack.i.h.bf16 %v5219_v37 }
 0x8cb   :  { %v5214_v34 = vpop.permute.xlu1 %5213  ;;  %v1697_v33 = vsel %vm1694_vm4, %v1690_v62, %v5210_v2  ;;  %v1698_v36 = vsel %vm1694_vm4, %v1691_v48, %v5211_v58 }
 0x8cc   :  { %v5216_v16 = vunpack.i.h.bf16 %v5214_v34  ;;  %v5215_v24 = vunpack.i.l.bf16 %v5214_v34  ;;  %v1693_v5 = vsel %vm798_vm2, %v6702_v52, %v5221_v32  ;;  %v4426_v52 = vld [vmem:[%s7884_s11] ss:$0 sm:$0xff] }
 0x8ce   :  { %v1704_v39 = vsel %vm1063_vm3, %v1698_v36, %v5216_v16  ;;  %v1703_v47 = vsel %vm1063_vm3, %v1697_v33, %v5215_v24 }
 0x8cf   :  { %v5224_v53 = vpop.permute.xlu1 %5223  ;;  %v1708_v41 = vpack.c.bf16 %v1704_v39, %v1703_v47 }
 0x8d0   :  { %v5226_v21 = vunpack.i.h.bf16 %v5224_v53  ;;  %v5225_v49 = vunpack.i.l.bf16 %v5224_v53 }
 0x8d1   :  { %4930 = vmatmul.mubr.msk.bf16.gmra.mxu0 %vm195_vm0, %v1708_v41 }
 0x8d2   :  { %4933 = vmatprep.mubr.msk.bf16.mxu0 %vm5851_vm1, %v5850_v9  ;;  %v1700_v59 = vsel %vm1694_vm4, %v1693_v5, %v5226_v21  ;;  %v1699_v42 = vsel %vm1694_vm4, %v1692_v57, %v5225_v49 }
 0x8d3   :  { %v5229_v43 = vpop.permute.xlu0 %5228 }
 0x8d4   :  { %v5231_v51 = vunpack.i.h.bf16 %v5229_v43  ;;  %v5230_v38 = vunpack.i.l.bf16 %v5229_v43 }
 0x8d6   :  { %v1706_v8 = vsel %vm1063_vm3, %v1700_v59, %v5231_v51  ;;  %v1705_v56 = vsel %vm1063_vm3, %v1699_v42, %v5230_v38 }
 0x8d7   :  { %v1709_v63 = vpack.c.bf16 %v1706_v8, %v1705_v56 }
 0x8d9   :  { %4934 = vmatmul.mubr.msk.bf16.gmra.mxu0 %vm195_vm0, %v1709_v63 }
 0x989   :  { %v1792_v4 = vpop.f32.mrf.mxu0 }
 0x98a   :  { %v1793_v6 = vadd.f32 %v4426_v52, %v1792_v4  ;;  %v5421_v4 = vld [vmem:[%s7885_s14 + $0x34] ss:$8 sps:$4 sm:$0xff]  }
 0x98b   :  { %v4927_v13 = vpop.f32.mrf.mxu0  ;;  %2005 = vmatprep.subr.bf16.mxu1 %v5421_v4 }
 0x98c   :  { %v6763_v46 = vadd.f32 %v1793_v6, %v6072_v40  ;;  %v5419_v6 = vld [vmem:[%s7885_s14 + $0x30] ss:$8 sps:$4 sm:$0xff]   ;;  %v5424_v13 = vld [vmem:[%s7885_s14 + $0x24] ss:$8 sps:$4 sm:$0xff]  }
 0x98d   :  { %v1795_v18 = vpop.f32.mrf.mxu0  ;;  %2006 = vmatpush1.bf16.msra.mxu1 %v5419_v6 }
 0x98e   :  { %v1796_v11 = vadd.f32 %v4426_v52, %v1795_v18  ;;  %v1823_v23 = vsel %vm195_vm0, %v6763_v46, 0.0  ;;  %v5422_v18 = vld [vmem:[%s7885_s14 + $0x20] ss:$8 sps:$4 sm:$0xff]   ;;  %2007 = vmatprep.subr.bf16.mxu1 %v5424_v13 }
 0x98f   :  { %v4928_v15 = vpop.f32.mrf.mxu0  ;;  %1824 = vadd.xlane.f32.xlu1 %v1823_v23  ;;  %v5425_v23 = vld [vmem:[%s7885_s14 + $0x10] ss:$8 sps:$4 sm:$0xff]  }
 0x990   :  { %v6768_v17 = vadd.f32 %v1796_v11, %v6076_v45  ;;  %v5427_v11 = vld [vmem:[%s7885_s14 + $0x14] ss:$8 sps:$4 sm:$0xff]   ;;  %v5430_v15 = vld [vmem:[%s7885_s14 + $0x4] ss:$8 sps:$4 sm:$0xff]  }
 0x991   :  { %v1800_v7 = vpop.f32.mrf.mxu0  ;;  %2008 = vmatpush1.bf16.msra.mxu1 %v5422_v18  ;;  %v5432_v18 = vld [vmem:[%s7888_s16 + $0x38] sm:$0xff]  }
 0x992   :  { %v1801_v61 = vadd.f32 %v4426_v52, %v1800_v7  ;;  %v1826_v12 = vsel %vm195_vm0, %v6768_v17, 0.0  ;;  %2009 = vmatprep.subr.bf16.mxu1 %v5427_v11  ;;  %v5428_v7 = vld [vmem:[%s7885_s14] ss:$8 sps:$4 sm:$0xff]   ;;  %v5434_v11 = vld [vmem:[%s7888_s16 + $0x30] sm:$0xff]  }
 0x993   :  { %v4931_v44 = vpop.f32.mrf.mxu0  ;;  %1827 = vadd.xlane.f32.xlu0 %v1826_v12 }
 0x994   :  { %v6773_v40 = vadd.f32 %v1801_v61, %v6081_v50 }
 0x995   :  { %v1803_v30 = vpop.f32.mrf.mxu0  ;;  %2010 = vmatpush1.bf16.msra.mxu1 %v5425_v23  ;;  %v5435_v23 = vld [vmem:[%s7888_s16 + $0x68] sm:$0xff]  }
 0x996   :  { %v1804_v26 = vadd.f32 %v4426_v52, %v1803_v30  ;;  %v1829_v14 = vsel %vm195_vm0, %v6773_v40, 0.0  ;;  %2011 = vmatprep.subr.bf16.mxu1 %v5430_v15  ;;  %v5436_v15 = vld [vmem:[%s7888_s16 + $0x28] sm:$0xff]  }
 0x997   :  { %v4932_v22 = vpop.f32.mrf.mxu0  ;;  %1830 = vadd.xlane.f32.xlu0 %v1829_v14 }
 0x998   :  { %v6778_v45 = vadd.f32 %v1804_v26, %v6086_v55 }
 0x999   :  { %v1808_v27 = vpop.f32.mrf.mxu0  ;;  %2012 = vmatpush1.bf16.msra.mxu1 %v5428_v7  ;;  %v5437_v7 = vld [vmem:[%s7888_s16 + $0x60] sm:$0xff]  }
 0x99a   :  { %v1809_v25 = vadd.f32 %v4426_v52, %v1808_v27  ;;  %v1832_v10 = vsel %vm195_vm0, %v6778_v45, 0.0 }
 0x99b   :  { %1833 = vadd.xlane.f32.xlu0 %v1832_v10  ;;  %v4935_v19 = vpop.f32.mrf.mxu0 }
 0x99c   :  { %v6783_v50 = vadd.f32 %v1809_v25, %v6091_v60 }
 0x99d   :  { %v1811_v3 = vpop.f32.mrf.mxu0 }
 0x99e   :  { %v1812_v28 = vadd.f32 %v4426_v52, %v1811_v3  ;;  %v1835_v20 = vsel %vm195_vm0, %v6783_v50, 0.0 }
 0x99f   :  { %1836 = vadd.xlane.f32.xlu1 %v1835_v20  ;;  %v4936_v31 = vpop.f32.mrf.mxu0 }
 0x9a0   :  { %v6788_v55 = vadd.f32 %v1812_v28, %v6096_v1 }
 0x9a2   :  { %v1838_v48 = vsel %vm195_vm0, %v6788_v55, 0.0 }
 0x9a3   :  { %1839 = vadd.xlane.f32.xlu0 %v1838_v48 }
 0xa18   :  { %v1825_v62 = vpop.xlane.xlu1 %1824 }
 0xa19   :  { %v1841_v58 = vmul.f32 0.015625, %v1825_v62 }
 0xa1b   :  { %v6793_v2 = vsub.f32 %v6763_v46, %v1841_v58  ;;  %v4434_v58 = vld [vmem:[%s7886_s12] ss:$0 sm:$0xff] }
 0xa1c   :  { %v1828_v60 = vpop.xlane.xlu0 %1827 }
 0xa1d   :  { %v1842_v34 = vmul.f32 0.015625, %v1828_v60  ;;  %v1853_v16 = vmul.f32 %v6793_v2, %v6793_v2 }
 0xa1f   :  { %v6798_v24 = vsub.f32 %v6768_v17, %v1842_v34  ;;  %v1859_v1 = vsel %vm195_vm0, %v1853_v16, 0.0 }
 0xa20   :  { %v1831_v37 = vpop.xlane.xlu0 %1830  ;;  %1860 = vadd.xlane.f32.xlu1 %v1859_v1 }
 0xa21   :  { %v1843_v33 = vmul.f32 0.015625, %v1831_v37  ;;  %v1854_v36 = vmul.f32 %v6798_v24, %v6798_v24 }
 0xa23   :  { %v6804_v39 = vsub.f32 %v6773_v40, %v1843_v33  ;;  %v1862_v47 = vsel %vm195_vm0, %v1854_v36, 0.0  ;;  %v4435_v36 = vld [vmem:[%s7887_s13] ss:$0 sm:$0xff] }
 0xa24   :  { %v1834_v53 = vpop.xlane.xlu0 %1833  ;;  %1863 = vadd.xlane.f32.xlu0 %v1862_v47 }
 0xa25   :  { %v1844_v41 = vmul.f32 0.015625, %v1834_v53  ;;  %v1855_v32 = vmul.f32 %v6804_v39, %v6804_v39 }
 0xa27   :  { %v6810_v54 = vsub.f32 %v6778_v45, %v1844_v41  ;;  %v1865_v21 = vsel %vm195_vm0, %v1855_v32, 0.0 }
 0xa28   :  { %1866 = vadd.xlane.f32.xlu1 %v1865_v21  ;;  %v1837_v49 = vpop.xlane.xlu1 %1836 }
 0xa29   :  { %v1845_v43 = vmul.f32 0.015625, %v1837_v49  ;;  %v1856_v5 = vmul.f32 %v6810_v54, %v6810_v54 }
 0xa2b   :  { %v6816_v57 = vsub.f32 %v6783_v50, %v1845_v43  ;;  %v1868_v51 = vsel %vm195_vm0, %v1856_v5, 0.0 }
 0xa2c   :  { %1869 = vadd.xlane.f32.xlu0 %v1868_v51  ;;  %v1840_v38 = vpop.xlane.xlu0 %1839 }
 0xa2d   :  { %v1846_v59 = vmul.f32 0.015625, %v1840_v38  ;;  %v1857_v42 = vmul.f32 %v6816_v57, %v6816_v57 }
 0xa2f   :  { %v6822_v8 = vsub.f32 %v6788_v55, %v1846_v59  ;;  %v1871_v56 = vsel %vm195_vm0, %v1857_v42, 0.0 }
 0xa30   :  { %1872 = vadd.xlane.f32.xlu1 %v1871_v56 }
 0xa31   :  { %v1858_v63 = vmul.f32 %v6822_v8, %v6822_v8 }
 0xa33   :  { %v1874_v52 = vsel %vm195_vm0, %v1858_v63, 0.0 }
 0xa34   :  { %1875 = vadd.xlane.f32.xlu0 %v1874_v52 }
 0xaa9   :  { %v1861_v61 = vpop.xlane.xlu1 %1860 }
 0xaaa   :  { %v1877_v12 = vmul.f32 0.015625, %v1861_v61  ;;  %v5438_v61 = vld [vmem:[%s7888_s16 + $0x20] sm:$0xff]  }
 0xaac   :  { %v1883_v44 = vadd.f32 1e-05, %v1877_v12  ;;  %v5439_v12 = vld [vmem:[%s7888_s16 + $0x58] sm:$0xff]  }
 0xaad   :  { %v1864_v30 = vpop.xlane.xlu0 %1863 }
 0xaae   :  { %5611 = vrsqrt.f32 %v1883_v44  ;;  %v1878_v26 = vmul.f32 0.015625, %v1864_v30  ;;  %v5440_v44 = vld [vmem:[%s7888_s16 + $0x18] sm:$0xff]   ;;  %v5441_v30 = vld [vmem:[%s7888_s16 + $0x50] sm:$0xff]  }
 0xab0   :  { %v1884_v14 = vadd.f32 1e-05, %v1878_v26  ;;  %v5442_v26 = vld [vmem:[%s7888_s16 + $0x10] sm:$0xff]  }
 0xab1   :  { %v1867_v22 = vpop.xlane.xlu1 %1866 }
 0xab2   :  { %5613 = vrsqrt.f32 %v1884_v14  ;;  %v1879_v27 = vmul.f32 0.015625, %v1867_v22  ;;  %v5443_v14 = vld [vmem:[%s7888_s16 + $0x48] sm:$0xff]  }
 0xab3   :  { %v5444_v22 = vld [vmem:[%s7888_s16 + $0x8] sm:$0xff]  }
 0xab4   :  { %v1885_v25 = vadd.f32 1e-05, %v1879_v27  ;;  %v5445_v27 = vld [vmem:[%s7888_s16 + $0x40] sm:$0xff]  }
 0xab5   :  { %v1870_v10 = vpop.xlane.xlu0 %1869 }
 0xab6   :  { %5615 = vrsqrt.f32 %v1885_v25  ;;  %v1880_v19 = vmul.f32 0.015625, %v1870_v10  ;;  %v5446_v25 = vld [vmem:[%s7888_s16] sm:$0xff]  }
 0xab7   :  { %v1936_v10 = vld [vmem:[%s7889_s15] sm:$0x3] }
 0xab8   :  { %v1886_v3 = vadd.f32 1e-05, %v1880_v19  ;;  %v1941_v19 = vrot.slane %v1936_v10, %v6177_v35 }
 0xab9   :  { %v1873_v28 = vpop.xlane.xlu1 %1872 }
 0xaba   :  { %5617 = vrsqrt.f32 %v1886_v3  ;;  %v1881_v20 = vmul.f32 0.015625, %v1873_v28  ;;  %v1945_v3 = vrot.slane %v1936_v10, %v6183_v29 }
 0xabb   :  { %v5612_v31 = vpop.eup %5611 }
 0xabc   :  { %v1895_v48 = vmul.f32 %v5612_v31, %v6793_v2  ;;  %v1887_v62 = vadd.f32 1e-05, %v1881_v20 }
 0xabd   :  { %v1876_v60 = vpop.xlane.xlu0 %1875 }
 0xabe   :  { %5619 = vrsqrt.f32 %v1887_v62  ;;  %v1882_v34 = vmul.f32 0.015625, %v1876_v60  ;;  %v1907_v1 = vmul.f32 %v4434_v58, %v1895_v48 }
 0xabf   :  { %v5614_v16 = vpop.eup %5613 }
 0xac0   :  { %v1896_v37 = vmul.f32 %v5614_v16, %v6798_v24  ;;  %v1888_v33 = vadd.f32 1e-05, %v1882_v34  ;;  %v1919_v53 = vadd.f32 %v4435_v36, %v1907_v1 }
 0xac2   :  { %v1908_v47 = vmul.f32 %v4434_v58, %v1896_v37  ;;  %5621 = vrsqrt.f32 %v1888_v33 }
 0xac3   :  { %v5616_v2 = vpop.eup %5615 }
 0xac4   :  { %v1920_v41 = vadd.f32 %v4435_v36, %v1908_v47  ;;  %v1897_v32 = vmul.f32 %v5616_v2, %v6804_v39 }
 0xac6   :  { %v1925_v21 = vpack.c.bf16 %v1920_v41, %v1919_v53  ;;  %v1909_v5 = vmul.f32 %v4434_v58, %v1897_v32 }
 0xac7   :  { %v5618_v49 = vpop.eup %5617 }
 0xac8   :  { %4444 = vmatmul.mubr.msk.bf16.vlgmr.msra.gmra.mxu1 %vm195_vm0, %v1925_v21  ;;  %v1898_v43 = vmul.f32 %v5618_v49, %v6810_v54  ;;  %v1921_v38 = vadd.f32 %v4435_v36, %v1909_v5 }
 0xac9   :  { %2039 = vmatprep.mubr.bf16.mxu1 %v5845_v0 }
 0xaca   :  { %v1910_v24 = vmul.f32 %v4434_v58, %v1898_v43 }
 0xacb   :  { %v5620_v51 = vpop.eup %5619 }
 0xacc   :  { %v1922_v59 = vadd.f32 %v4435_v36, %v1910_v24  ;;  %v1899_v42 = vmul.f32 %v5620_v51, %v6816_v57  ;;  %v5431_v57 = vld [vmem:[%s7888_s16 + $0x78] sm:$0xff]  }
 0xacd   :  { %4674 = vmatprep.subr.bf16.mxu0 %v5431_v57 }
 0xace   :  { %v1926_v56 = vpack.c.bf16 %v1922_v59, %v1921_v38  ;;  %v1911_v52 = vmul.f32 %v4434_v58, %v1899_v42  ;;  %4675 = vmatpush3.bf16.msra.mxu0 %v5432_v18 }
 0xacf   :  { %v5622_v63 = vpop.eup %5621 }
 0xad0   :  { %4445 = vmatmul.mubr.msk.bf16.gmra.mxu1 %vm195_vm0, %v1926_v56  ;;  %v1900_v39 = vmul.f32 %v5622_v63, %v6822_v8  ;;  %v1923_v54 = vadd.f32 %v4435_v36, %v1911_v52  ;;  %v5433_v8 = vld [vmem:[%s7888_s16 + $0x70] sm:$0xff]  }
 0xad1   :  { %2049 = vmatprep.mubr.bf16.mxu1 %v5845_v0  ;;  %4676 = vmatprep.subr.bf16.mxu0 %v5433_v8 }
 0xad2   :  { %v1912_v4 = vmul.f32 %v4434_v58, %v1900_v39  ;;  %4677 = vmatpush3.bf16.msra.mxu0 %v5434_v11 }
 0xad3   :  { %4678 = vmatprep.subr.bf16.mxu0 %v5435_v23 }
 0xad4   :  { %v1924_v6 = vadd.f32 %v4435_v36, %v1912_v4 }
 0xad6   :  { %v1927_v13 = vpack.c.bf16 %v1924_v6, %v1923_v54  ;;  %4679 = vmatpush3.bf16.msra.mxu0 %v5436_v15 }
 0xad7   :  { %4680 = vmatprep.subr.bf16.mxu0 %v5437_v7 }
 0xad8   :  { %4446 = vmatmul.mubr.msk.bf16.gmra.mxu1 %vm195_vm0, %v1927_v13 }
 0xad9   :  { %2572 = vmatprep.mubr.bf16.mxu1 %v5845_v0 }
 0xada   :  { %4681 = vmatpush3.bf16.msra.mxu0 %v5438_v61 }
 0xadb   :  { %4682 = vmatprep.subr.bf16.mxu0 %v5439_v12 }
 0xade   :  { %4683 = vmatpush3.bf16.msra.mxu0 %v5440_v44 }
 0xadf   :  { %4684 = vmatprep.subr.bf16.mxu0 %v5441_v30 }
 0xae2   :  { %4685 = vmatpush3.bf16.msra.mxu0 %v5442_v26 }
 0xae3   :  { %4686 = vmatprep.subr.bf16.mxu0 %v5443_v14 }
 0xae6   :  { %4687 = vmatpush3.bf16.msra.mxu0 %v5444_v22 }
 0xae7   :  { %4688 = vmatprep.subr.bf16.mxu0 %v5445_v27 }
 0xaea   :  { %4689 = vmatpush3.bf16.msra.mxu0 %v5446_v25 }
 0xaeb   :  { %4937 = vmatprep.subr.bf16.mxu0 %v5850_v9 }
 0xb88   :  { %v2031_v28 = vpop.f32.mrf.mxu1 }
 0xb89   :  { %v6924_v20 = vadd.f32 %v2031_v28, %v1941_v19 }
 0xb8a   :  { %v2033_v31 = vpop.f32.mrf.mxu1 }
 0xb8b   :  { %v4447_v48 = vmul.f32 -1.702, %v6924_v20  ;;  %v6927_v62 = vadd.f32 %v2033_v31, %v1945_v3 }
 0xb8c   :  { %v2035_v58 = vpop.f32.mrf.mxu1 }
 0xb8d   :  { %v2084_v60 = vmul.f32 1.442695, %v4447_v48  ;;  %v4448_v34 = vmul.f32 -1.702, %v6927_v62  ;;  %v6930_v16 = vadd.f32 %v2035_v58, %v1941_v19 }
 0xb8e   :  { %v2037_v1 = vpop.f32.mrf.mxu1 }
 0xb8f   :  { %5623 = vpow2.f32 %v2084_v60  ;;  %v2086_v37 = vmul.f32 1.442695, %v4448_v34  ;;  %v4449_v33 = vmul.f32 -1.702, %v6930_v16  ;;  %v6933_v36 = vadd.f32 %v2037_v1, %v1945_v3 }
 0xb90   :  { %v2041_v47 = vpop.f32.mrf.mxu1 }
 0xb91   :  { %5625 = vpow2.f32 %v2086_v37  ;;  %v2088_v2 = vmul.f32 1.442695, %v4449_v33  ;;  %v4450_v53 = vmul.f32 -1.702, %v6933_v36  ;;  %v6936_v41 = vadd.f32 %v2041_v47, %v1941_v19 }
 0xb92   :  { %v2043_v32 = vpop.f32.mrf.mxu1 }
 0xb93   :  { %5627 = vpow2.f32 %v2088_v2  ;;  %v2090_v21 = vmul.f32 1.442695, %v4450_v53  ;;  %v4451_v49 = vmul.f32 -1.702, %v6936_v41  ;;  %v6939_v43 = vadd.f32 %v2043_v32, %v1945_v3 }
 0xb94   :  { %v2045_v5 = vpop.f32.mrf.mxu1 }
 0xb95   :  { %5629 = vpow2.f32 %v2090_v21  ;;  %v2092_v24 = vmul.f32 1.442695, %v4451_v49  ;;  %v4452_v51 = vmul.f32 -1.702, %v6939_v43  ;;  %v6942_v38 = vadd.f32 %v2045_v5, %v1941_v19 }
 0xb96   :  { %v2047_v59 = vpop.f32.mrf.mxu1 }
 0xb97   :  { %v2094_v42 = vmul.f32 1.442695, %v4452_v51  ;;  %v4453_v56 = vmul.f32 -1.702, %v6942_v38  ;;  %v6945_v63 = vadd.f32 %v2047_v59, %v1945_v3  ;;  %5631 = vpow2.f32 %v2092_v24 }
 0xb98   :  { %v2051_v39 = vpop.f32.mrf.mxu1 }
 0xb99   :  { %5633 = vpow2.f32 %v2094_v42  ;;  %v2096_v52 = vmul.f32 1.442695, %v4453_v56  ;;  %v4454_v4 = vmul.f32 -1.702, %v6945_v63  ;;  %v6948_v54 = vadd.f32 %v2051_v39, %v1941_v19 }
 0xb9a   :  { %v2053_v6 = vpop.f32.mrf.mxu1 }
 0xb9b   :  { %5635 = vpow2.f32 %v2096_v52  ;;  %v2098_v13 = vmul.f32 1.442695, %v4454_v4  ;;  %v4455_v57 = vmul.f32 -1.702, %v6948_v54  ;;  %v6951_v18 = vadd.f32 %v2053_v6, %v1945_v3 }
 0xb9c   :  { %v5624_v8 = vpop.eup %5623  ;;  %v2055_v11 = vpop.f32.mrf.mxu1 }
 0xb9d   :  { %v2108_v23 = vadd.f32 1.0, %v5624_v8  ;;  %5637 = vpow2.f32 %v2098_v13  ;;  %v2100_v15 = vmul.f32 1.442695, %v4455_v57  ;;  %v4456_v7 = vmul.f32 -1.702, %v6951_v18 }
 0xb9e   :  { %v5626_v61 = vpop.eup %5625  ;;  %v6954_v12 = vadd.f32 %v2055_v11, %v1941_v19  ;;  %v2057_v44 = vpop.f32.mrf.mxu1 }
 0xb9f   :  { %5639 = vrcp.f32 %v2108_v23  ;;  %v2109_v30 = vadd.f32 1.0, %v5626_v61  ;;  %v2102_v26 = vmul.f32 1.442695, %v4456_v7  ;;  %v6956_v14 = vadd.f32 %v2057_v44, %v1945_v3 }
 0xba0   :  { %v5628_v22 = vpop.eup %5627  ;;  %5641 = vpow2.f32 %v2100_v15  ;;  %v4457_v27 = vmul.f32 -1.702, %v6954_v12 }
 0xba1   :  { %5643 = vrcp.f32 %v2109_v30  ;;  %v2110_v25 = vadd.f32 1.0, %v5628_v22  ;;  %v4458_v10 = vmul.f32 -1.702, %v6956_v14 }
 0xba2   :  { %v5630_v28 = vpop.eup %5629  ;;  %5645 = vpow2.f32 %v2102_v26  ;;  %v2104_v31 = vmul.f32 1.442695, %v4457_v27 }
 0xba3   :  { %5647 = vrcp.f32 %v2110_v25  ;;  %v2111_v19 = vadd.f32 1.0, %v5630_v28  ;;  %v2106_v48 = vmul.f32 1.442695, %v4458_v10 }
 0xba4   :  { %5649 = vpow2.f32 %v2104_v31  ;;  %v5632_v58 = vpop.eup %5631  ;;  %v4459_v31 = vld [vmem:[%s7890_s17] ss:$0 sm:$0xff] }
 0xba5   :  { %5651 = vrcp.f32 %v2111_v19  ;;  %v2112_v1 = vadd.f32 1.0, %v5632_v58 }
 0xba6   :  { %v5634_v60 = vpop.eup %5633  ;;  %5653 = vpow2.f32 %v2106_v48 }
 0xba7   :  { %v2113_v3 = vadd.f32 1.0, %v5634_v60 }
 0xba8   :  { %v5636_v34 = vpop.eup %5635 }
 0xba9   :  { %v2114_v37 = vadd.f32 1.0, %v5636_v34  ;;  %5655 = vrcp.f32 %v2113_v3 }
 0xbaa   :  { %v5638_v33 = vpop.eup %5637 }
 0xbab   :  { %5657 = vrcp.f32 %v2114_v37  ;;  %v2115_v47 = vadd.f32 1.0, %v5638_v33 }
 0xbac   :  { %v5640_v2 = vpop.eup %5639  ;;  %5659 = vrcp.f32 %v2112_v1 }
 0xbad   :  { %v5642_v53 = vpop.eup %5641  ;;  %5661 = vrcp.f32 %v2115_v47  ;;  %v2144_v6 = vmul.f32 %v5640_v2, %v6924_v20 }
 0xbae   :  { %v5644_v32 = vpop.eup %5643  ;;  %v2116_v51 = vadd.f32 1.0, %v5642_v53 }
 0xbaf   :  { %v5646_v21 = vpop.eup %5645  ;;  %v2145_v52 = vmul.f32 %v5644_v32, %v6927_v62 }
 0xbb0   :  { %v5648_v49 = vpop.eup %5647  ;;  %v2117_v5 = vadd.f32 1.0, %v5646_v21 }
 0xbb1   :  { %v5650_v24 = vpop.eup %5649  ;;  %v2146_v42 = vmul.f32 %v5648_v49, %v6930_v16 }
 0xbb2   :  { %v5652_v59 = vpop.eup %5651  ;;  %v2118_v56 = vadd.f32 1.0, %v5650_v24  ;;  %5663 = vrcp.f32 %v2117_v5 }
 0xbb3   :  { %v5654_v39 = vpop.eup %5653  ;;  %v2147_v4 = vmul.f32 %v5652_v59, %v6933_v36  ;;  %v2156_v8 = vpack.c.bf16 %v2146_v42, %v2144_v6 }
 0xbb4   :  { %5665 = vrcp.f32 %v2118_v56  ;;  %v2119_v13 = vadd.f32 1.0, %v5654_v39 }
 0xbb5   :  { %5667 = vrcp.f32 %v2116_v51  ;;  %v2157_v57 = vpack.c.bf16 %v2147_v4, %v2145_v52 }
 0xbb6   :  { %5669 = vrcp.f32 %v2119_v13  ;;  %v5656_v11 = vpop.eup %5655 }
 0xbb7   :  { %2329 = vmatprep.mubr.bf16.mxu0 %v2157_v57  ;;  %v2149_v62 = vmul.f32 %v5656_v11, %v6939_v43 }
 0xbb8   :  { %v5658_v23 = vpop.eup %5657  ;;  %2330 = vmatmul.mubr.bf16.vlgmr.msra.gmra.mxu0 %v2156_v8 }
 0xbb9   :  { %v5660_v16 = vpop.eup %5659  ;;  %v2150_v7 = vmul.f32 %v5658_v23, %v6942_v38 }
 0xbba   :  { %v5662_v15 = vpop.eup %5661  ;;  %v2148_v20 = vmul.f32 %v5660_v16, %v6936_v41 }
 0xbbb   :  { %v2151_v36 = vmul.f32 %v5662_v15, %v6945_v63 }
 0xbbc   :  { %v2158_v44 = vpack.c.bf16 %v2150_v7, %v2148_v20 }
 0xbbd   :  { %v2159_v61 = vpack.c.bf16 %v2151_v36, %v2149_v62 }
 0xbbf   :  { %2337 = vmatprep.mubr.bf16.mxu0 %v2159_v61  ;;  %v5664_v30 = vpop.eup %5663 }
 0xbc0   :  { %2338 = vmatmul.mubr.bf16.gmra.mxu0 %v2158_v44  ;;  %v2153_v10 = vmul.f32 %v5664_v30, %v6951_v18 }
 0xbc1   :  { %v5666_v26 = vpop.eup %5665 }
 0xbc2   :  { %v5668_v22 = vpop.eup %5667  ;;  %v2154_v25 = vmul.f32 %v5666_v26, %v6954_v12 }
 0xbc3   :  { %v5670_v27 = vpop.eup %5669  ;;  %v2152_v43 = vmul.f32 %v5668_v22, %v6948_v54 }
 0xbc4   :  { %v2155_v38 = vmul.f32 %v5670_v27, %v6956_v14 }
 0xbc5   :  { %v2160_v63 = vpack.c.bf16 %v2154_v25, %v2152_v43 }
 0xbc6   :  { %v2161_v28 = vpack.c.bf16 %v2155_v38, %v2153_v10 }
 0xbc8   :  { %2345 = vmatprep.mubr.bf16.mxu0 %v2161_v28 }
 0xbc9   :  { %2346 = vmatmul.mubr.bf16.gmra.mxu0 %v2160_v63 }
 0xbca   :  { %4939 = vmatprep.mubr.msk.bf16.mxu0 %vm5851_vm1, %v5850_v9 }
 0xc78   :  { %v4690_v41 = vpop.f32.mrf.mxu0 }
 0xc7a   :  { %v4691_v19 = vpop.f32.mrf.mxu0 }
 0xc7b   :  { %v4692_v12 = vadd.f32 %v4691_v19, %v4690_v41 }
 0xc7c   :  { %v4693_v48 = vpop.f32.mrf.mxu0 }
 0xc7d   :  { %v2332_v18 = vadd.f32 %v4692_v12, %v4459_v31 }
 0xc7e   :  { %v4694_v58 = vpop.f32.mrf.mxu0 }
 0xc7f   :  { %v6978_v14 = vadd.f32 %v2332_v18, %v6763_v46  ;;  %v4695_v54 = vadd.f32 %v4694_v58, %v4693_v48 }
 0xc80   :  { %v4696_v60 = vpop.f32.mrf.mxu0 }
 0xc81   :  { %v2335_v3 = vadd.f32 %v4695_v54, %v4459_v31  ;;  %v2364_v34 = vsel %vm195_vm0, %v6978_v14, 0.0  ;;  %v5449_v54 = vld [vmem:[%s7878_s8 + $0x74] ss:$8 sps:$4 sm:$0xff]  }
 0xc82   :  { %v4697_v1 = vpop.f32.mrf.mxu0  ;;  %2365 = vadd.xlane.f32.xlu1 %v2364_v34  ;;  %2548 = vmatprep.subr.bf16.mxu1 %v5449_v54  ;;  %v5450_v34 = vld [vmem:[%s7878_s8 + $0x60] ss:$8 sps:$4 sm:$0xff]  }
 0xc83   :  { %v6983_v37 = vadd.f32 %v2335_v3, %v6768_v17  ;;  %v4698_v33 = vadd.f32 %v4697_v1, %v4696_v60  ;;  %v5447_v60 = vld [vmem:[%s7878_s8 + $0x70] ss:$8 sps:$4 sm:$0xff]   ;;  %v5452_v3 = vld [vmem:[%s7878_s8 + $0x64] ss:$8 sps:$4 sm:$0xff]   ;;  %v5455_v1 = vld [vmem:[%s7878_s8 + $0x54] ss:$8 sps:$4 sm:$0xff]  }
 0xc84   :  { %v4699_v47 = vpop.f32.mrf.mxu0  ;;  %2549 = vmatpush1.bf16.msra.mxu1 %v5447_v60 }
 0xc85   :  { %v2340_v2 = vadd.f32 %v4698_v33, %v4459_v31  ;;  %v2367_v53 = vsel %vm195_vm0, %v6983_v37, 0.0  ;;  %2550 = vmatprep.subr.bf16.mxu1 %v5452_v3  ;;  %v5453_v33 = vld [vmem:[%s7878_s8 + $0x50] ss:$8 sps:$4 sm:$0xff]  }
 0xc86   :  { %v4700_v32 = vpop.f32.mrf.mxu0  ;;  %2368 = vadd.xlane.f32.xlu0 %v2367_v53 }
 0xc87   :  { %v6988_v46 = vadd.f32 %v2340_v2, %v6773_v40  ;;  %v4701_v21 = vadd.f32 %v4700_v32, %v4699_v47  ;;  %v5456_v47 = vld [vmem:[%s7878_s8 + $0x40] ss:$8 sps:$4 sm:$0xff]   ;;  %v5458_v2 = vld [vmem:[%s7878_s8 + $0x44] ss:$8 sps:$4 sm:$0xff]  }
 0xc88   :  { %2551 = vmatpush1.bf16.msra.mxu1 %v5450_v34 }
 0xc89   :  { %v2343_v49 = vadd.f32 %v4701_v21, %v4459_v31  ;;  %v4702_v5 = vpop.f32.mrf.mxu0  ;;  %v2370_v24 = vsel %vm195_vm0, %v6988_v46, 0.0  ;;  %2552 = vmatprep.subr.bf16.mxu1 %v5455_v1 }
 0xc8a   :  { %2371 = vadd.xlane.f32.xlu1 %v2370_v24 }
 0xc8b   :  { %v6993_v17 = vadd.f32 %v2343_v49, %v6778_v45  ;;  %v4703_v51 = vpop.f32.mrf.mxu0 }
 0xc8c   :  { %v4704_v59 = vadd.f32 %v4703_v51, %v4702_v5  ;;  %2553 = vmatpush1.bf16.msra.mxu1 %v5453_v33 }
 0xc8d   :  { %v4705_v42 = vpop.f32.mrf.mxu0  ;;  %v2373_v56 = vsel %vm195_vm0, %v6993_v17, 0.0  ;;  %2554 = vmatprep.subr.bf16.mxu1 %v5458_v2 }
 0xc8e   :  { %v2348_v39 = vadd.f32 %v4704_v59, %v4459_v31  ;;  %2374 = vadd.xlane.f32.xlu0 %v2373_v56 }
 0xc8f   :  { %v4706_v40 = vpop.f32.mrf.mxu0 }
 0xc90   :  { %v6998_v52 = vadd.f32 %v2348_v39, %v6783_v50  ;;  %v4707_v4 = vadd.f32 %v4706_v40, %v4705_v42  ;;  %2555 = vmatpush1.bf16.msra.mxu1 %v5456_v47 }
 0xc91   :  { %4951 = vmatprep.subr.bf16.mxu1 %v5850_v9 }
 0xc92   :  { %v2351_v6 = vadd.f32 %v4707_v4, %v4459_v31  ;;  %v2376_v13 = vsel %vm195_vm0, %v6998_v52, 0.0 }
 0xc93   :  { %2377 = vadd.xlane.f32.xlu1 %v2376_v13  ;;  %v4478_v13 = vld [vmem:[%s7879_s6 + $0x1] ss:$0 sm:$0xff] }
 0xc94   :  { %v7003_v45 = vadd.f32 %v2351_v6, %v6788_v55 }
 0xc96   :  { %v2379_v57 = vsel %vm195_vm0, %v7003_v45, 0.0 }
 0xc97   :  { %2380 = vadd.xlane.f32.xlu0 %v2379_v57 }
 0xd0b   :  { %v2366_v8 = vpop.xlane.xlu1 %2365 }
 0xd0c   :  { %v2382_v11 = vmul.f32 0.015625, %v2366_v8 }
 0xd0e   :  { %v7008_v23 = vsub.f32 %v6978_v14, %v2382_v11  ;;  %v4479_v11 = vld [vmem:[%s7880_s7 + $0x1] ss:$0 sm:$0xff] }
 0xd0f   :  { %v2369_v50 = vpop.xlane.xlu0 %2368 }
 0xd10   :  { %v2383_v16 = vmul.f32 0.015625, %v2369_v50  ;;  %v2394_v15 = vmul.f32 %v7008_v23, %v7008_v23 }
 0xd12   :  { %v7013_v7 = vsub.f32 %v6983_v37, %v2383_v16  ;;  %v2400_v55 = vsel %vm195_vm0, %v2394_v15, 0.0 }
 0xd13   :  { %2401 = vadd.xlane.f32.xlu1 %v2400_v55  ;;  %v2372_v62 = vpop.xlane.xlu1 %2371 }
 0xd14   :  { %v2384_v36 = vmul.f32 0.015625, %v2372_v62  ;;  %v2395_v20 = vmul.f32 %v7013_v7, %v7013_v7 }
 0xd16   :  { %v7019_v61 = vsub.f32 %v6988_v46, %v2384_v36  ;;  %v2403_v44 = vsel %vm195_vm0, %v2395_v20, 0.0 }
 0xd17   :  { %2404 = vadd.xlane.f32.xlu0 %v2403_v44  ;;  %v2375_v30 = vpop.xlane.xlu0 %2374 }
 0xd18   :  { %v2385_v26 = vmul.f32 0.015625, %v2375_v30  ;;  %v2396_v22 = vmul.f32 %v7019_v61, %v7019_v61 }
 0xd1a   :  { %v7025_v27 = vsub.f32 %v6993_v17, %v2385_v26  ;;  %v2406_v25 = vsel %vm195_vm0, %v2396_v22, 0.0 }
 0xd1b   :  { %2407 = vadd.xlane.f32.xlu1 %v2406_v25 }
 0xd1c   :  { %v2378_v10 = vpop.xlane.xlu1 %2377  ;;  %v2397_v38 = vmul.f32 %v7025_v27, %v7025_v27 }
 0xd1d   :  { %v2386_v43 = vmul.f32 0.015625, %v2378_v10 }
 0xd1e   :  { %v2409_v28 = vsel %vm195_vm0, %v2397_v38, 0.0 }
 0xd1f   :  { %v7032_v63 = vsub.f32 %v6998_v52, %v2386_v43  ;;  %2410 = vadd.xlane.f32.xlu0 %v2409_v28 }
 0xd20   :  { %v2381_v41 = vpop.xlane.xlu0 %2380 }
 0xd21   :  { %v2387_v31 = vmul.f32 0.015625, %v2381_v41  ;;  %v2398_v19 = vmul.f32 %v7032_v63, %v7032_v63 }
 0xd23   :  { %v7037_v12 = vsub.f32 %v7003_v45, %v2387_v31  ;;  %v2412_v48 = vsel %vm195_vm0, %v2398_v19, 0.0 }
 0xd24   :  { %2413 = vadd.xlane.f32.xlu1 %v2412_v48 }
 0xd25   :  { %v2399_v18 = vmul.f32 %v7037_v12, %v7037_v12 }
 0xd27   :  { %v2415_v58 = vsel %vm195_vm0, %v2399_v18, 0.0 }
 0xd28   :  { %2416 = vadd.xlane.f32.xlu0 %v2415_v58 }
 0xd9c   :  { %v2402_v53 = vpop.xlane.xlu1 %2401 }
 0xd9d   :  { %v2418_v32 = vmul.f32 0.015625, %v2402_v53 }
 0xd9f   :  { %v2424_v21 = vadd.f32 1e-05, %v2418_v32 }
 0xda0   :  { %v2405_v49 = vpop.xlane.xlu0 %2404 }
 0xda1   :  { %5671 = vrsqrt.f32 %v2424_v21  ;;  %v2419_v5 = vmul.f32 0.015625, %v2405_v49 }
 0xda3   :  { %v2425_v24 = vadd.f32 1e-05, %v2419_v5 }
 0xda4   :  { %v2408_v51 = vpop.xlane.xlu1 %2407 }
 0xda5   :  { %5673 = vrsqrt.f32 %v2425_v24  ;;  %v2420_v59 = vmul.f32 0.015625, %v2408_v51 }
 0xda7   :  { %v2426_v42 = vadd.f32 1e-05, %v2420_v59 }
 0xda8   :  { %v2411_v56 = vpop.xlane.xlu0 %2410 }
 0xda9   :  { %5675 = vrsqrt.f32 %v2426_v42  ;;  %v2421_v39 = vmul.f32 0.015625, %v2411_v56 }
 0xdab   :  { %v2427_v40 = vadd.f32 1e-05, %v2421_v39 }
 0xdad   :  { %5677 = vrsqrt.f32 %v2427_v40  ;;  %v2414_v4 = vpop.xlane.xlu1 %2413 }
 0xdae   :  { %v5672_v6 = vpop.eup %5671  ;;  %v2422_v57 = vmul.f32 0.015625, %v2414_v4 }
 0xdaf   :  { %v2436_v8 = vmul.f32 %v5672_v6, %v7008_v23 }
 0xdb0   :  { %v2428_v50 = vadd.f32 1e-05, %v2422_v57 }
 0xdb1   :  { %v2448_v16 = vmul.f32 %v4478_v13, %v2436_v8  ;;  %v2417_v15 = vpop.xlane.xlu0 %2416 }
 0xdb2   :  { %v5674_v55 = vpop.eup %5673  ;;  %5679 = vrsqrt.f32 %v2428_v50  ;;  %v2423_v62 = vmul.f32 0.015625, %v2417_v15 }
 0xdb3   :  { %v2437_v36 = vmul.f32 %v5674_v55, %v7013_v7  ;;  %v2460_v20 = vadd.f32 %v4479_v11, %v2448_v16 }
 0xdb4   :  { %v2429_v44 = vadd.f32 1e-05, %v2423_v62 }
 0xdb5   :  { %v2449_v30 = vmul.f32 %v4478_v13, %v2437_v36 }
 0xdb6   :  { %v5676_v26 = vpop.eup %5675  ;;  %5681 = vrsqrt.f32 %v2429_v44 }
 0xdb7   :  { %v2461_v22 = vadd.f32 %v4479_v11, %v2449_v30  ;;  %v2438_v23 = vmul.f32 %v5676_v26, %v7019_v61 }
 0xdb9   :  { %v2466_v25 = vpack.c.bf16 %v2461_v22, %v2460_v20  ;;  %v2450_v10 = vmul.f32 %v4478_v13, %v2438_v23 }
 0xdba   :  { %v5678_v38 = vpop.eup %5677 }
 0xdbb   :  { %4497 = vmatmul.mubr.msk.bf16.vlgmr.msra.gmra.mxu1 %vm195_vm0, %v2466_v25  ;;  %v2439_v43 = vmul.f32 %v5678_v38, %v7025_v27  ;;  %v2462_v28 = vadd.f32 %v4479_v11, %v2450_v10 }
 0xdbc   :  { %2582 = vmatprep.mubr.bf16.mxu1 %v5845_v0 }
 0xdbd   :  { %v2451_v41 = vmul.f32 %v4478_v13, %v2439_v43 }
 0xdbf   :  { %v5680_v7 = vpop.eup %5679  ;;  %v2463_v31 = vadd.f32 %v4479_v11, %v2451_v41 }
 0xdc0   :  { %v2440_v19 = vmul.f32 %v5680_v7, %v7032_v63  ;;  %v4488_v63 = vld [vmem:[%s7881_s9 + $0x2] sm:$0x3] }
 0xdc1   :  { %v2467_v48 = vpack.c.bf16 %v2463_v31, %v2462_v28  ;;  %v2484_v1 = vrot.slane %v4488_v63, %v6177_v35  ;;  %v2488_v47 = vrot.slane %v4488_v63, %v6183_v29 }
 0xdc2   :  { %v2452_v18 = vmul.f32 %v4478_v13, %v2440_v19 }
 0xdc3   :  { %v5682_v58 = vpop.eup %5681  ;;  %4498 = vmatmul.mubr.msk.bf16.gmra.mxu1 %vm195_vm0, %v2467_v48 }
 0xdc4   :  { %2592 = vmatprep.mubr.bf16.mxu1 %v5845_v0  ;;  %v2441_v61 = vmul.f32 %v5682_v58, %v7037_v12  ;;  %v2464_v54 = vadd.f32 %v4479_v11, %v2452_v18 }
 0xdc6   :  { %v2453_v60 = vmul.f32 %v4478_v13, %v2441_v61 }
 0xdc8   :  { %v2465_v27 = vadd.f32 %v4479_v11, %v2453_v60 }
 0xdca   :  { %v2468_v3 = vpack.c.bf16 %v2465_v27, %v2464_v54 }
 0xdcc   :  { %4499 = vmatmul.mubr.msk.bf16.gmra.mxu1 %vm195_vm0, %v2468_v3 }
 0xdcd   :  { %4953 = vmatprep.mubr.msk.bf16.mxu1 %vm5851_vm1, %v5850_v9 }
 0xe7b   :  { %v2574_v34 = vpop.f32.mrf.mxu1 }
 0xe7c   :  { %v7092_v2 = vadd.f32 %v2574_v34, %v2484_v1 }
 0xe7d   :  { %v2576_v33 = vpop.f32.mrf.mxu1 }
 0xe7e   :  { %v7096_v21 = vadd.f32 %v2576_v33, %v2488_v47 }
 0xe7f   :  { %v2578_v12 = vpop.f32.mrf.mxu1 }
 0xe80   :  { %v7094_v53 = vadd.f32 %v2578_v12, %v2484_v1 }
 0xe81   :  { %v2580_v32 = vpop.f32.mrf.mxu1 }
 0xe82   :  { %v2773_v49 = vpack.c.bf16 %v7094_v53, %v7092_v2  ;;  %v7100_v5 = vadd.f32 %v2580_v32, %v2488_v47  ;;  %v5232_v24 = vpack.i.bf16 %v7094_v53, %v7092_v2 }
 0xe83   :  { %v2584_v51 = vpop.f32.mrf.mxu1 }
 0xe84   :  { %5233 = vrot.lane.b32.xlu1 %v5232_v24, %s5846_s28  ;;  %v3329_v59 = vpack.c.bf16 %v7100_v5, %v7096_v21  ;;  %v7109_v42 = vpack.i.bf16 %v7100_v5, %v7096_v21  ;;  %v7113_v4 = vadd.f32 %v2584_v51, %v2484_v1 }
 0xe85   :  { %v2586_v56 = vpop.f32.mrf.mxu1 }
 0xe86   :  { %v7111_v39 = vadd.f32 %v2586_v56, %v2488_v47 }
 0xe87   :  { %v2588_v40 = vpop.f32.mrf.mxu1 }
 0xe88   :  { %v7115_v6 = vadd.f32 %v2588_v40, %v2484_v1 }
 0xe89   :  { %v2590_v13 = vpop.f32.mrf.mxu1 }
 0xe8a   :  { %v7117_v57 = vadd.f32 %v2590_v13, %v2488_v47  ;;  %v5237_v8 = vpack.i.bf16 %v7115_v6, %v7113_v4  ;;  %v2774_v11 = vpack.c.bf16 %v7115_v6, %v7113_v4 }
 0xe8c   :  { %v2594_v50 = vpop.f32.mrf.mxu1  ;;  %5238 = vrot.lane.b32.xlu0 %v5237_v8, %s5846_s28  ;;  %v7126_v16 = vpack.i.bf16 %v7117_v57, %v7111_v39  ;;  %v3330_v15 = vpack.c.bf16 %v7117_v57, %v7111_v39 }
 0xe8d   :  { %v7130_v36 = vadd.f32 %v2594_v50, %v2484_v1 }
 0xe8e   :  { %v2596_v55 = vpop.f32.mrf.mxu1 }
 0xe8f   :  { %v7134_v30 = vadd.f32 %v2596_v55, %v2488_v47 }
 0xe90   :  { %v2598_v62 = vpop.f32.mrf.mxu1 }
 0xe91   :  { %v7132_v20 = vadd.f32 %v2598_v62, %v2484_v1 }
 0xe92   :  { %v2600_v44 = vpop.f32.mrf.mxu1 }
 0xe93   :  { %v7136_v26 = vadd.f32 %v2600_v44, %v2488_v47  ;;  %v5242_v22 = vpack.i.bf16 %v7132_v20, %v7130_v36  ;;  %v2775_v23 = vpack.c.bf16 %v7132_v20, %v7130_v36 }
 0xe95   :  { %5243 = vrot.lane.b32.xlu1 %v5242_v22, %s5846_s28  ;;  %v3331_v25 = vpack.c.bf16 %v7136_v26, %v7134_v30  ;;  %v7147_v10 = vpack.i.bf16 %v7136_v26, %v7134_v30 }
 0xe99   :  { %5248 = vrot.lane.b32.xlu1 %v5232_v24, %s5847_s23 }
 0xe9d   :  { %5253 = vrot.lane.b32.xlu1 %v5237_v8, %s5847_s23 }
 0xea1   :  { %5258 = vrot.lane.b32.xlu1 %v5242_v22, %s5847_s23 }
 0xea5   :  { %5263 = vrot.lane.b32.xlu1 %v5232_v24, %s5848_s30 }
 0xea9   :  { %5268 = vrot.lane.b32.xlu1 %v5232_v24, %s5849_s1 }
 0xead   :  { %5273 = vrot.lane.b32.xlu1 %v5237_v8, %s5848_s30 }
 0xeb1   :  { %5278 = vrot.lane.b32.xlu1 %v5237_v8, %s5849_s1 }
 0xeb5   :  { %5283 = vrot.lane.b32.xlu1 %v5242_v22, %s5848_s30 }
 0xeb9   :  { %5288 = vrot.lane.b32.xlu1 %v5242_v22, %s5849_s1 }
 0xebd   :  { %5293 = vrot.lane.b32.xlu1 %v7147_v10, %s5847_s23 }
 0xec1   :  { %5303 = vrot.lane.b32.xlu1 %v7109_v42, %s5847_s23 }
 0xef6   :  { %v5234_v38 = vpop.permute.xlu1 %5233 }
 0xef7   :  { %v5235_v43 = vunpack.i.l.bf16 %v5234_v38  ;;  %v5236_v28 = vunpack.i.h.bf16 %v5234_v38 }
 0xef9   :  { %2627 = vxpose.xlu0.b32.start [1/6] (short) (narrow) %v5235_v43, 64 }
 0xefd   :  { %2628 = vxpose.xlu0.b32.cont [2/6] (short) (narrow) %v5236_v28, 64 }
 0xefe   :  { %v5239_v41 = vpop.permute.xlu0 %5238 }
 0xeff   :  { %v5240_v7 = vunpack.i.l.bf16 %v5239_v41  ;;  %v5241_v31 = vunpack.i.h.bf16 %v5239_v41 }
 0xf01   :  { %2629 = vxpose.xlu0.b32.cont [3/6] (short) (narrow) %v5240_v7, 64 }
 0xf05   :  { %2630 = vxpose.xlu0.b32.cont [4/6] (short) (narrow) %v5241_v31, 64 }
 0xf07   :  { %v5244_v19 = vpop.permute.xlu1 %5243 }
 0xf08   :  { %v5245_v48 = vunpack.i.l.bf16 %v5244_v19  ;;  %v5246_v18 = vunpack.i.h.bf16 %v5244_v19 }
 0xf0a   :  { %2631 = vxpose.xlu0.b32.cont [5/6] (short) (narrow) %v5245_v48, 64 }
 0xf0b   :  { %v5249_v58 = vpop.permute.xlu1 %5248 }
 0xf0c   :  { %v5251_v47 = vunpack.i.h.bf16 %v5249_v58  ;;  %v5250_v12 = vunpack.i.l.bf16 %v5249_v58 }
 0xf0e   :  { %2632 = vxpose.xlu0.b32.end [6/6] (short) (narrow) %v5246_v18, 64  ;;  %v2776_v51 = vpack.c.bf16 %v5251_v47, %v5250_v12  ;;  %v7231_v47 = vld [vmem:[%s7882_s3] sm:$0xff] }
 0xf0f   :  { %v5254_v61 = vpop.permute.xlu1 %5253 }
 0xf10   :  { %v5256_v2 = vunpack.i.h.bf16 %v5254_v61  ;;  %v5255_v53 = vunpack.i.l.bf16 %v5254_v61 }
 0xf12   :  { %v2777_v50 = vpack.c.bf16 %v5256_v2, %v5255_v53 }
 0xf13   :  { %v5259_v54 = vpop.permute.xlu1 %5258 }
 0xf14   :  { %v5261_v4 = vunpack.i.h.bf16 %v5259_v54  ;;  %v5260_v6 = vunpack.i.l.bf16 %v5259_v54 }
 0xf16   :  { %v2778_v43 = vpack.c.bf16 %v5261_v4, %v5260_v6  ;;  %v7254_v4 = vld [vmem:[%s7882_s3 + $0x10] sm:$0xff] }
 0xf17   :  { %v5264_v60 = vpop.permute.xlu1 %5263 }
 0xf18   :  { %v5265_v62 = vunpack.i.l.bf16 %v5264_v60 }
 0xf1b   :  { %v5269_v3 = vpop.permute.xlu1 %5268 }
 0xf1c   :  { %v5270_v28 = vunpack.i.l.bf16 %v5269_v3 }
 0xf1f   :  { %v5274_v33 = vpop.permute.xlu1 %5273 }
 0xf20   :  { %v5276_v41 = vunpack.i.h.bf16 %v5274_v33  ;;  %v5275_v7 = vunpack.i.l.bf16 %v5274_v33 }
 0xf22   :  { %v2780_v26 = vpack.c.bf16 %v5276_v41, %v5275_v7  ;;  %v5842_v7 = vld [vmem:[%s7882_s3 + $0x18] sm:$0xff] }
 0xf23   :  { %v5279_v56 = vpop.permute.xlu1 %5278 }
 0xf24   :  { %v5281_v48 = vunpack.i.h.bf16 %v5279_v56  ;;  %v5280_v18 = vunpack.i.l.bf16 %v5279_v56  ;;  %v7241_v56 = vld [vmem:[%s7882_s3 + $0x8] sm:$0xff] }
 0xf26   :  { %v2783_v39 = vpack.c.bf16 %v5281_v48, %v5280_v18 }
 0xf27   :  { %v5284_v8 = vpop.permute.xlu1 %5283 }
 0xf28   :  { %v5286_v58 = vunpack.i.h.bf16 %v5284_v8  ;;  %v5285_v61 = vunpack.i.l.bf16 %v5284_v8 }
 0xf2a   :  { %v2781_v57 = vpack.c.bf16 %v5286_v58, %v5285_v61 }
 0xf2b   :  { %v5289_v44 = vpop.permute.xlu1 %5288 }
 0xf2c   :  { %v5291_v21 = vunpack.i.h.bf16 %v5289_v44  ;;  %v5290_v5 = vunpack.i.l.bf16 %v5289_v44 }
 0xf2f   :  { %v5294_v20 = vpop.permute.xlu1 %5293 }
 0xf30   :  { %v5296_v31 = vunpack.i.h.bf16 %v5294_v20  ;;  %v5295_v19 = vunpack.i.l.bf16 %v5294_v20 }
 0xf3f   :  { %5298 = vrot.lane.b32.xlu0 %v7126_v16, %s5847_s23 }
 0xf76   :  { %v2643_v27 = vpop.trf.xlu0 }
 0xf7a   :  { %v2644_v63 = vpop.trf.xlu0 }
 0xf7b   :  { %v2785_v34 = vpack.c.bf16 %v2644_v63, %v2643_v27 }
 0xf7d   :  { %4938 = vmatpush3.bf16.msra.mxu0 %v2785_v34 }
 0xf7e   :  { %v2645_v1 = vpop.trf.xlu0  ;;  %4965 = vmatprep.subr.bf16.mxu0 %v5850_v9 }
 0xf80   :  { %4940 = vmatmul.mubr.msk.bf16.vlgmr.msra.gmra.mxu0 %vm798_vm2, %v2773_v49 }
 0xf81   :  { %4943 = vmatprep.mubr.msk.bf16.mxu0 %vm5851_vm1, %v5850_v9 }
 0xf82   :  { %v2646_v32 = vpop.trf.xlu0 }
 0xf83   :  { %v2786_v24 = vpack.c.bf16 %v2646_v32, %v2645_v1 }
 0xf85   :  { %4952 = vmatpush3.bf16.msra.mxu1 %v2786_v24 }
 0xf86   :  { %v2647_v40 = vpop.trf.xlu0  ;;  %4979 = vmatprep.subr.bf16.mxu1 %v5850_v9 }
 0xf88   :  { %4944 = vmatmul.mubr.msk.bf16.gmra.mxu0 %vm798_vm2, %v2774_v11  ;;  %4954 = vmatmul.mubr.msk.bf16.vlgmr.msra.gmra.mxu1 %vm798_vm2, %v2776_v51  ;;  %v5266_v11 = vunpack.i.h.bf16 %v5264_v60 }
 0xf89   :  { %4947 = vmatprep.mubr.msk.bf16.mxu0 %vm5851_vm1, %v5850_v9  ;;  %4957 = vmatprep.mubr.msk.bf16.mxu1 %vm5851_vm1, %v5850_v9 }
 0xf8a   :  { %v2648_v49 = vpop.trf.xlu0  ;;  %v2779_v36 = vpack.c.bf16 %v5266_v11, %v5265_v62 }
 0xf8b   :  { %v2787_v13 = vpack.c.bf16 %v2648_v49, %v2647_v40 }
 0xf8d   :  { %4966 = vmatpush3.bf16.msra.mxu0 %v2787_v13 }
 0xf8e   :  { %v2649_v55 = vpop.trf.xlu0  ;;  %4993 = vmatprep.subr.bf16.mxu0 %v5850_v9 }
 0xf90   :  { %4948 = vmatmul.mubr.msk.bf16.gmra.mxu0 %vm798_vm2, %v2775_v23  ;;  %4958 = vmatmul.mubr.msk.bf16.gmra.mxu1 %vm798_vm2, %v2777_v50  ;;  %v5271_v23 = vunpack.i.h.bf16 %v5269_v3 }
 0xf91   :  { %4961 = vmatprep.mubr.msk.bf16.mxu1 %vm5851_vm1, %v5850_v9  ;;  %4967 = vmatprep.mubr.msk.bf16.mxu0 %vm5851_vm1, %v5850_v9 }
 0xf92   :  { %v2650_v22 = vpop.trf.xlu0  ;;  %v2782_v30 = vpack.c.bf16 %v5271_v23, %v5270_v28 }
 0xf93   :  { %v2788_v38 = vpack.c.bf16 %v2650_v22, %v2649_v55 }
 0xf95   :  { %4980 = vmatpush3.bf16.msra.mxu1 %v2788_v38 }
 0xf96   :  { %5011 = vmatprep.subr.bf16.mxu1 %v5850_v9 }
 0xf98   :  { %4962 = vmatmul.mubr.msk.bf16.gmra.mxu1 %vm798_vm2, %v2778_v43  ;;  %4968 = vmatmul.mubr.msk.bf16.vlgmr.msra.gmra.mxu0 %vm798_vm2, %v2779_v36 }
 0xf99   :  { %4994 = vmatpush3.bf16.msra.mxu0 %v3331_v25  ;;  %4971 = vmatprep.mubr.msk.bf16.mxu0 %vm5851_vm1, %v5850_v9  ;;  %v3334_v25 = vpack.c.bf16 %v5296_v31, %v5295_v19 }
 0xf9a   :  { %4995 = vmatprep.subr.bf16.mxu0 %v5850_v9  ;;  %4981 = vmatprep.mubr.msk.bf16.mxu1 %vm5851_vm1, %v5850_v9 }
 0xf9d   :  { %4996 = vmatpush3.bf16.msra.mxu0 %v3330_v15  ;;  %v5304_v15 = vpop.permute.xlu1 %5303 }
 0xf9e   :  { %4997 = vmatprep.subr.bf16.mxu0 %v5850_v9  ;;  %v5306_v3 = vunpack.i.h.bf16 %v5304_v15  ;;  %v5305_v63 = vunpack.i.l.bf16 %v5304_v15 }
 0xfa0   :  { %4972 = vmatmul.mubr.msk.bf16.gmra.mxu0 %vm798_vm2, %v2780_v26  ;;  %4982 = vmatmul.mubr.msk.bf16.vlgmr.msra.gmra.mxu1 %vm798_vm2, %v2782_v30  ;;  %v3332_v1 = vpack.c.bf16 %v5306_v3, %v5305_v63 }
 0xfa1   :  { %4998 = vmatpush3.bf16.msra.mxu0 %v3329_v59  ;;  %5012 = vmatpush3.bf16.msra.mxu1 %v3334_v25  ;;  %v2784_v59 = vpack.c.bf16 %v5291_v21, %v5290_v5  ;;  %v7281_v5 = vld [vmem:[%s7882_s3 + $0x20] sm:$0xff] }
 0xfa2   :  { %4975 = vmatprep.mubr.msk.bf16.mxu0 %vm5851_vm1, %v5850_v9  ;;  %4985 = vmatprep.mubr.msk.bf16.mxu1 %vm5851_vm1, %v5850_v9 }
 0xfa3   :  { %5013 = vmatprep.subr.bf16.mxu1 %v5850_v9  ;;  %5029 = vmatprep.subr.bf16.mxu0 %v5850_v9 }
 0xfa8   :  { %4976 = vmatmul.mubr.msk.bf16.gmra.mxu0 %vm798_vm2, %v2781_v57  ;;  %4986 = vmatmul.mubr.msk.bf16.gmra.mxu1 %vm798_vm2, %v2783_v39 }
 0xfa9   :  { %4989 = vmatprep.mubr.msk.bf16.mxu1 %vm5851_vm1, %v5850_v9  ;;  %4999 = vmatprep.mubr.msk.bf16.mxu0 %vm5851_vm1, %v5850_v9 }
 0xfb0   :  { %4990 = vmatmul.mubr.msk.bf16.gmra.mxu1 %vm798_vm2, %v2784_v59 }
 0xfb1   :  { %v5299_v54 = vpop.permute.xlu0 %5298  ;;  %5017 = vmatprep.mubr.msk.bf16.mxu1 %vm5851_vm1, %v5850_v9 }
 0xfb2   :  { %v5301_v60 = vunpack.i.h.bf16 %v5299_v54  ;;  %v5300_v27 = vunpack.i.l.bf16 %v5299_v54 }
 0xfb4   :  { %v3333_v34 = vpack.c.bf16 %v5301_v60, %v5300_v27  ;;  %v5844_v27 = vld [vmem:[%s7882_s3 + $0x28] sm:$0xff] }
 0xfb6   :  { %5014 = vmatpush3.bf16.msra.mxu1 %v3333_v34 }
 0xfb7   :  { %5015 = vmatprep.subr.bf16.mxu1 %v5850_v9 }
 0xfba   :  { %5016 = vmatpush3.bf16.msra.mxu1 %v3332_v1 }
 0xfbb   :  { %5047 = vmatprep.subr.bf16.mxu1 %v5850_v9 }
0x1040   :  { %v2832_v33 = vpop.f32.mrf.mxu0 }
0x1041   :  { %v7234_v12 = vadd.f32 %v7231_v47, %v2832_v33 }
0x1042   :  { %v4941_v32 = vpop.f32.mrf.mxu0 }
0x1043   :  { %v3053_v24 = vsel %vm1063_vm3, %v7234_v12, -inf }
0x1044   :  { %3054 = vmax.xlane.f32.xlu1 %v3053_v24  ;;  %v2835_v51 = vpop.f32.mrf.mxu0 }
0x1045   :  { %v7244_v40 = vadd.f32 %v7241_v56, %v2835_v51 }
0x1046   :  { %v4942_v2 = vpop.f32.mrf.mxu0 }
0x1047   :  { %v3056_v53 = vsel %vm1063_vm3, %v7244_v40, -inf }
0x1048   :  { %3057 = vmax.xlane.f32.xlu0 %v3056_v53  ;;  %v2840_v49 = vpop.f32.mrf.mxu0  ;;  %v2898_v13 = vpop.f32.mrf.mxu1 }
0x1049   :  { %v7249_v8 = vadd.f32 %v7231_v47, %v2898_v13  ;;  %v7257_v6 = vadd.f32 %v7254_v4, %v2840_v49 }
0x104a   :  { %v4945_v50 = vpop.f32.mrf.mxu0  ;;  %v4955_v55 = vpop.f32.mrf.mxu1 }
0x104b   :  { %v3071_v11 = vsel %vm1063_vm3, %v7249_v8, -inf  ;;  %v3059_v36 = vsel %vm1063_vm3, %v7257_v6, -inf }
0x104c   :  { %v2843_v62 = vpop.f32.mrf.mxu0  ;;  %3072 = vmax.xlane.f32.xlu1 %v3071_v11  ;;  %v2901_v44 = vpop.f32.mrf.mxu1 }
0x104d   :  { %v7262_v43 = vadd.f32 %v7241_v56, %v2901_v44  ;;  %v7269_v31 = vadd.f32 %v5842_v7, %v2843_v62 }
0x104e   :  { %v4946_v22 = vpop.f32.mrf.mxu0  ;;  %v4956_v38 = vpop.f32.mrf.mxu1 }
0x104f   :  { %v3074_v19 = vsel %vm1063_vm3, %v7262_v43, -inf  ;;  %v3062_v58 = vsel %vm1063_vm3, %v7269_v31, -inf }
0x1050   :  { %v2848_v20 = vpop.f32.mrf.mxu0  ;;  %3060 = vmax.xlane.f32.xlu1 %v3059_v36  ;;  %v2906_v23 = vpop.f32.mrf.mxu1 }
0x1051   :  { %v7274_v18 = vadd.f32 %v7254_v4, %v2906_v23  ;;  %v7284_v59 = vadd.f32 %v7281_v5, %v2848_v20 }
0x1052   :  { %v4949_v28 = vpop.f32.mrf.mxu0  ;;  %v4959_v41 = vpop.f32.mrf.mxu1 }
0x1053   :  { %v3077_v15 = vsel %vm1063_vm3, %v7274_v18, -inf  ;;  %v3065_v32 = vsel %vm1063_vm3, %v7284_v59, -inf }
0x1054   :  { %v2851_v30 = vpop.f32.mrf.mxu0  ;;  %3075 = vmax.xlane.f32.xlu1 %v3074_v19  ;;  %v2909_v26 = vpop.f32.mrf.mxu1 }
0x1055   :  { %v7293_v1 = vadd.f32 %v5842_v7, %v2909_v26  ;;  %v7302_v13 = vadd.f32 %v5844_v27, %v2851_v30 }
0x1056   :  { %v4950_v25 = vpop.f32.mrf.mxu0  ;;  %v4960_v48 = vpop.f32.mrf.mxu1 }
0x1057   :  { %v3080_v50 = vsel %vm1063_vm3, %v7293_v1, -inf  ;;  %v3068_v23 = vsel %vm1063_vm3, %v7302_v13, -inf }
0x1058   :  { %3063 = vmax.xlane.f32.xlu1 %v3062_v58  ;;  %v2914_v61 = vpop.f32.mrf.mxu1  ;;  %v2964_v39 = vpop.f32.mrf.mxu0 }
0x1059   :  { %v7312_v36 = vadd.f32 %v7281_v5, %v2914_v61  ;;  %v7321_v26 = vadd.f32 %v7231_v47, %v2964_v39 }
0x105a   :  { %v4963_v57 = vpop.f32.mrf.mxu1  ;;  %v4969_v21 = vpop.f32.mrf.mxu0 }
0x105b   :  { %v3083_v25 = vsel %vm1063_vm3, %v7312_v36, -inf  ;;  %v3089_v39 = vsel %vm1063_vm3, %v7321_v26, -inf }
0x105c   :  { %3078 = vmax.xlane.f32.xlu1 %v3077_v15  ;;  %v2917_v54 = vpop.f32.mrf.mxu1  ;;  %v2967_v60 = vpop.f32.mrf.mxu0 }
0x105d   :  { %v7291_v3 = vadd.f32 %v5844_v27, %v2917_v54  ;;  %v7296_v33 = vadd.f32 %v7241_v56, %v2967_v60 }
0x105e   :  { %v4964_v63 = vpop.f32.mrf.mxu1  ;;  %v4970_v34 = vpop.f32.mrf.mxu0 }
0x105f   :  { %v3086_v24 = vsel %vm1063_vm3, %v7291_v3, -inf  ;;  %v3092_v55 = vsel %vm1063_vm3, %v7296_v33, -inf }
0x1060   :  { %3066 = vmax.xlane.f32.xlu1 %v3065_v32  ;;  %3087 = vmax.xlane.f32.xlu0 %v3086_v24  ;;  %v2972_v51 = vpop.f32.mrf.mxu0  ;;  %v3030_v2 = vpop.f32.mrf.mxu1 }
0x1061   :  { %v7330_v54 = vadd.f32 %v7231_v47, %v3030_v2 }
0x1062   :  { %v4973_v53 = vpop.f32.mrf.mxu0  ;;  %v4983_v49 = vpop.f32.mrf.mxu1 }
0x1063   :  { %v3107_v24 = vsel %vm1063_vm3, %v7330_v54, -inf }
0x1064   :  { %3081 = vmax.xlane.f32.xlu1 %v3080_v50  ;;  %3093 = vmax.xlane.f32.xlu0 %v3092_v55  ;;  %v2975_v11 = vpop.f32.mrf.mxu0  ;;  %v3033_v62 = vpop.f32.mrf.mxu1 }
0x1065   :  { %v7309_v44 = vadd.f32 %v7241_v56, %v3033_v62  ;;  %v7314_v20 = vadd.f32 %v5842_v7, %v2975_v11 }
0x1066   :  { %v4974_v22 = vpop.f32.mrf.mxu0  ;;  %v4984_v38 = vpop.f32.mrf.mxu1 }
0x1067   :  { %v3110_v28 = vsel %vm1063_vm3, %v7309_v44, -inf  ;;  %v3098_v48 = vsel %vm1063_vm3, %v7314_v20, -inf }
0x1068   :  { %3069 = vmax.xlane.f32.xlu1 %v3068_v23  ;;  %v2980_v41 = vpop.f32.mrf.mxu0  ;;  %3111 = vmax.xlane.f32.xlu0 %v3110_v28  ;;  %v3038_v19 = vpop.f32.mrf.mxu1 }
0x1069   :  { %v7348_v50 = vadd.f32 %v7254_v4, %v3038_v19  ;;  %v7355_v11 = vadd.f32 %v7281_v5, %v2980_v41 }
0x106a   :  { %v4977_v30 = vpop.f32.mrf.mxu0  ;;  %v4987_v56 = vpop.f32.mrf.mxu1 }
0x106b   :  { %v3113_v62 = vsel %vm1063_vm3, %v7348_v50, -inf }
0x106c   :  { %3084 = vmax.xlane.f32.xlu1 %v3083_v25  ;;  %v2983_v58 = vpop.f32.mrf.mxu0  ;;  %3099 = vmax.xlane.f32.xlu0 %v3098_v48  ;;  %v3041_v61 = vpop.f32.mrf.mxu1 }
0x106d   :  { %v7327_v57 = vadd.f32 %v5842_v7, %v3041_v61  ;;  %v7332_v60 = vadd.f32 %v5844_v27, %v2983_v58  ;;  %v7339_v7 = vadd.f32 %v7254_v4, %v2972_v51  ;;  %v3101_v4 = vsel %vm1063_vm3, %v7355_v11, -inf }
0x106e   :  { %v4978_v21 = vpop.f32.mrf.mxu0  ;;  %v4988_v15 = vpop.f32.mrf.mxu1 }
0x106f   :  { %v3116_v63 = vsel %vm1063_vm3, %v7327_v57, -inf  ;;  %v3104_v47 = vsel %vm1063_vm3, %v7332_v60, -inf  ;;  %v3095_v55 = vsel %vm1063_vm3, %v7339_v7, -inf }
0x1070   :  { %3090 = vmax.xlane.f32.xlu1 %v3089_v39  ;;  %3117 = vmax.xlane.f32.xlu0 %v3116_v63  ;;  %v3046_v34 = vpop.f32.mrf.mxu1 }
0x1072   :  { %v4991_v32 = vpop.f32.mrf.mxu1 }
0x1074   :  { %3108 = vmax.xlane.f32.xlu1 %v3107_v24  ;;  %3105 = vmax.xlane.f32.xlu0 %v3104_v47  ;;  %v3049_v2 = vpop.f32.mrf.mxu1 }
0x1075   :  { %v7345_v53 = vadd.f32 %v5844_v27, %v3049_v2  ;;  %v7360_v27 = vadd.f32 %v7281_v5, %v3046_v34 }
0x1076   :  { %v4992_v49 = vpop.f32.mrf.mxu1 }
0x1077   :  { %v3122_v51 = vsel %vm1063_vm3, %v7345_v53, -inf  ;;  %v3119_v22 = vsel %vm1063_vm3, %v7360_v27, -inf }
0x1078   :  { %3096 = vmax.xlane.f32.xlu1 %v3095_v55  ;;  %3123 = vmax.xlane.f32.xlu0 %v3122_v51 }
0x107c   :  { %3114 = vmax.xlane.f32.xlu1 %v3113_v62 }
0x1080   :  { %3102 = vmax.xlane.f32.xlu1 %v3101_v4 }
0x1084   :  { %3120 = vmax.xlane.f32.xlu1 %v3119_v22 }
0x108e   :  { %5308 = vrot.lane.b32.xlu0 %v7147_v10, %s5848_s30 }
0x1095   :  { %5313 = vrot.lane.b32.xlu1 %v7147_v10, %s5849_s1 }
0x1099   :  { %5318 = vrot.lane.b32.xlu1 %v7126_v16, %s5848_s30 }
0x10cd   :  { %v3055_v38 = vpop.xlane.xlu1 %3054 }
0x10ce   :  { %v3125_v5 = vsub.f32 %v7234_v12, %v3055_v38 }
0x10d0   :  { %v3149_v23 = vmul.f32 1.442695, %v3125_v5 }
0x10d1   :  { %v3058_v28 = vpop.xlane.xlu0 %3057 }
0x10d2   :  { %5683 = vpow2.f32 %v3149_v23  ;;  %v3126_v41 = vsub.f32 %v7244_v40, %v3058_v28 }
0x10d4   :  { %v3151_v19 = vmul.f32 1.442695, %v3126_v41 }
0x10d5   :  { %v3073_v30 = vpop.xlane.xlu1 %3072 }
0x10d6   :  { %5685 = vpow2.f32 %v3151_v19  ;;  %v3131_v56 = vsub.f32 %v7249_v8, %v3073_v30 }
0x10d8   :  { %v3161_v25 = vmul.f32 1.442695, %v3131_v56 }
0x10d9   :  { %v3061_v48 = vpop.xlane.xlu1 %3060 }
0x10da   :  { %5687 = vpow2.f32 %v3161_v25  ;;  %v3127_v10 = vsub.f32 %v7257_v6, %v3061_v48 }
0x10dc   :  { %v3153_v58 = vmul.f32 1.442695, %v3127_v10 }
0x10dd   :  { %v3076_v61 = vpop.xlane.xlu1 %3075 }
0x10de   :  { %5689 = vpow2.f32 %v3153_v58  ;;  %v3132_v12 = vsub.f32 %v7262_v43, %v3076_v61 }
0x10df   :  { %v7377_v21 = vpop.eup %5683 }
0x10e0   :  { %v3163_v15 = vmul.f32 1.442695, %v3132_v12  ;;  %v3197_v40 = vsel %vm1063_vm3, %v7377_v21, 0.0 }
0x10e1   :  { %v3064_v39 = vpop.xlane.xlu1 %3063  ;;  %3198 = vadd.xlane.f32.xlu1 %v3197_v40 }
0x10e2   :  { %5691 = vpow2.f32 %v3163_v15  ;;  %v3128_v8 = vsub.f32 %v7269_v31, %v3064_v39 }
0x10e3   :  { %v7382_v63 = vpop.eup %5685 }
0x10e4   :  { %v3155_v34 = vmul.f32 1.442695, %v3128_v8  ;;  %v3200_v6 = vsel %vm1063_vm3, %v7382_v63, 0.0 }
0x10e5   :  { %v3079_v32 = vpop.xlane.xlu1 %3078  ;;  %3201 = vadd.xlane.f32.xlu0 %v3200_v6 }
0x10e6   :  { %5693 = vpow2.f32 %v3155_v34  ;;  %v3133_v43 = vsub.f32 %v7274_v18, %v3079_v32 }
0x10e7   :  { %v7387_v24 = vpop.eup %5687 }
0x10e8   :  { %v3165_v47 = vmul.f32 1.442695, %v3133_v43  ;;  %v3215_v2 = vsel %vm1063_vm3, %v7387_v24, 0.0 }
0x10e9   :  { %v3067_v49 = vpop.xlane.xlu1 %3066  ;;  %3216 = vadd.xlane.f32.xlu1 %v3215_v2  ;;  %v3088_v51 = vpop.xlane.xlu0 %3087 }
0x10ea   :  { %5695 = vpow2.f32 %v3165_v47  ;;  %v3129_v31 = vsub.f32 %v7284_v59, %v3067_v49  ;;  %v3136_v5 = vsub.f32 %v7291_v3, %v3088_v51 }
0x10eb   :  { %v7392_v55 = vpop.eup %5689 }
0x10ec   :  { %v3157_v62 = vmul.f32 1.442695, %v3129_v31  ;;  %v3203_v4 = vsel %vm1063_vm3, %v7392_v55, 0.0  ;;  %v3171_v56 = vmul.f32 1.442695, %v3136_v5 }
0x10ed   :  { %v3082_v22 = vpop.xlane.xlu1 %3081  ;;  %3204 = vadd.xlane.f32.xlu1 %v3203_v4  ;;  %v3094_v28 = vpop.xlane.xlu0 %3093 }
0x10ee   :  { %5697 = vpow2.f32 %v3157_v62  ;;  %v3134_v18 = vsub.f32 %v7293_v1, %v3082_v22  ;;  %v3138_v25 = vsub.f32 %v7296_v33, %v3094_v28 }
0x10ef   :  { %v7397_v38 = vpop.eup %5691 }
0x10f0   :  { %v3167_v23 = vmul.f32 1.442695, %v3134_v18  ;;  %v3218_v59 = vsel %vm1063_vm3, %v7397_v38, 0.0  ;;  %v3175_v61 = vmul.f32 1.442695, %v3138_v25 }
0x10f1   :  { %v3070_v41 = vpop.xlane.xlu1 %3069  ;;  %3219 = vadd.xlane.f32.xlu0 %v3218_v59  ;;  %v3112_v33 = vpop.xlane.xlu0 %3111 }
0x10f2   :  { %5699 = vpow2.f32 %v3167_v23  ;;  %v3130_v19 = vsub.f32 %v7302_v13, %v3070_v41  ;;  %v3144_v43 = vsub.f32 %v7309_v44, %v3112_v33 }
0x10f3   :  { %v7403_v30 = vpop.eup %5693 }
0x10f4   :  { %v3159_v1 = vmul.f32 1.442695, %v3130_v19  ;;  %v3206_v48 = vsel %vm1063_vm3, %v7403_v30, 0.0  ;;  %v3187_v4 = vmul.f32 1.442695, %v3144_v43 }
0x10f5   :  { %v3085_v3 = vpop.xlane.xlu1 %3084  ;;  %3207 = vadd.xlane.f32.xlu0 %v3206_v48  ;;  %v3100_v47 = vpop.xlane.xlu0 %3099 }
0x10f6   :  { %5701 = vpow2.f32 %v3159_v1  ;;  %v3135_v10 = vsub.f32 %v7312_v36, %v3085_v3  ;;  %v3140_v62 = vsub.f32 %v7314_v20, %v3100_v47 }
0x10f7   :  { %v7409_v58 = vpop.eup %5695  ;;  %5703 = vpow2.f32 %v3171_v56 }
0x10f8   :  { %v3169_v12 = vmul.f32 1.442695, %v3135_v10  ;;  %v3221_v13 = vsel %vm1063_vm3, %v7409_v58, 0.0  ;;  %v3179_v23 = vmul.f32 1.442695, %v3140_v62 }
0x10f9   :  { %v3091_v15 = vpop.xlane.xlu1 %3090  ;;  %3222 = vadd.xlane.f32.xlu1 %v3221_v13  ;;  %v3118_v59 = vpop.xlane.xlu0 %3117 }
0x10fa   :  { %5705 = vpow2.f32 %v3169_v12  ;;  %v3137_v40 = vsub.f32 %v7321_v26, %v3091_v15  ;;  %v3146_v1 = vsub.f32 %v7327_v57, %v3118_v59 }
0x10fb   :  { %v7414_v39 = vpop.eup %5697  ;;  %5707 = vpow2.f32 %v3175_v61 }
0x10fc   :  { %v3173_v8 = vmul.f32 1.442695, %v3137_v40  ;;  %v3209_v36 = vsel %vm1063_vm3, %v7414_v39, 0.0 }
0x10fd   :  { %v3109_v34 = vpop.xlane.xlu1 %3108  ;;  %3210 = vadd.xlane.f32.xlu1 %v3209_v36  ;;  %v3106_v61 = vpop.xlane.xlu0 %3105 }
0x10fe   :  { %5709 = vpow2.f32 %v3173_v8  ;;  %v3143_v6 = vsub.f32 %v7330_v54, %v3109_v34  ;;  %v3142_v13 = vsub.f32 %v7332_v60, %v3106_v61 }
0x10ff   :  { %v7419_v32 = vpop.eup %5699 }
0x1100   :  { %v3185_v2 = vmul.f32 1.442695, %v3143_v6  ;;  %v3224_v26 = vsel %vm1063_vm3, %v7419_v32, 0.0  ;;  %v3183_v40 = vmul.f32 1.442695, %v3142_v13 }
0x1101   :  { %v3097_v49 = vpop.xlane.xlu1 %3096  ;;  %3225 = vadd.xlane.f32.xlu0 %v3224_v26 }
0x1102   :  { %5711 = vpow2.f32 %v3185_v2  ;;  %v3139_v31 = vsub.f32 %v7339_v7, %v3097_v49 }
0x1103   :  { %v7425_v51 = vpop.eup %5701 }
0x1104   :  { %v3177_v54 = vmul.f32 1.442695, %v3139_v31  ;;  %v3212_v22 = vsel %vm1063_vm3, %v7425_v51, 0.0  ;;  %v7430_v44 = vpop.eup %5703 }
0x1105   :  { %v3115_v18 = vpop.xlane.xlu1 %3114  ;;  %3213 = vadd.xlane.f32.xlu0 %v3212_v22  ;;  %v3230_v28 = vsel %vm1063_vm3, %v7430_v44, 0.0 }
0x1106   :  { %5713 = vpow2.f32 %v3177_v54  ;;  %v3145_v7 = vsub.f32 %v7348_v50, %v3115_v18 }
0x1107   :  { %v7432_v5 = vpop.eup %5705  ;;  %5715 = vpow2.f32 %v3187_v4 }
0x1108   :  { %v3227_v20 = vsel %vm1063_vm3, %v7432_v5, 0.0  ;;  %v7439_v41 = vpop.eup %5707  ;;  %5717 = vpow2.f32 %v3179_v23  ;;  %v3189_v48 = vmul.f32 1.442695, %v3145_v7  ;;  %v3124_v23 = vpop.xlane.xlu0 %3123 }
0x1109   :  { %v3103_v19 = vpop.xlane.xlu1 %3102  ;;  %3228 = vadd.xlane.f32.xlu1 %v3227_v20  ;;  %3231 = vadd.xlane.f32.xlu0 %v3230_v28  ;;  %v3236_v10 = vsel %vm1063_vm3, %v7439_v41, 0.0  ;;  %v3148_v59 = vsub.f32 %v7345_v53, %v3124_v23 }
0x110a   :  { %v3141_v56 = vsub.f32 %v7355_v11, %v3103_v19  ;;  %v3191_v11 = vmul.f32 1.442695, %v3146_v1 }
0x110b   :  { %v7442_v25 = vpop.eup %5709  ;;  %v3195_v7 = vmul.f32 1.442695, %v3148_v59 }
0x110c   :  { %v3181_v50 = vmul.f32 1.442695, %v3141_v56  ;;  %v3233_v3 = vsel %vm1063_vm3, %v7442_v25, 0.0  ;;  %v5309_v1 = vpop.permute.xlu0 %5308 }
0x110d   :  { %3234 = vadd.xlane.f32.xlu1 %v3233_v3  ;;  %3237 = vadd.xlane.f32.xlu0 %v3236_v10  ;;  %v3121_v15 = vpop.xlane.xlu1 %3120  ;;  %v5310_v13 = vunpack.i.l.bf16 %v5309_v1 }
0x110e   :  { %5719 = vpow2.f32 %v3181_v50  ;;  %v3147_v8 = vsub.f32 %v7360_v27, %v3121_v15 }
0x110f   :  { %v7449_v12 = vpop.eup %5711  ;;  %5721 = vpow2.f32 %v3189_v48 }
0x1110   :  { %v3251_v57 = vsel %vm1063_vm3, %v7449_v12, 0.0  ;;  %5723 = vpow2.f32 %v3191_v11  ;;  %v3193_v60 = vmul.f32 1.442695, %v3147_v8  ;;  %v5311_v11 = vunpack.i.h.bf16 %v5309_v1 }
0x1111   :  { %3252 = vadd.xlane.f32.xlu1 %v3251_v57  ;;  %5725 = vpow2.f32 %v3183_v40  ;;  %v5314_v19 = vpop.permute.xlu1 %5313 }
0x1112   :  { %5727 = vpow2.f32 %v3193_v60  ;;  %v3337_v8 = vpack.c.bf16 %v5311_v11, %v5310_v13 }
0x1113   :  { %v7454_v33 = vpop.eup %5713  ;;  %5729 = vpow2.f32 %v3195_v7 }
0x1114   :  { %v3239_v36 = vsel %vm1063_vm3, %v7454_v33, 0.0  ;;  %v7459_v34 = vpop.eup %5715 }
0x1115   :  { %3240 = vadd.xlane.f32.xlu0 %v3239_v36  ;;  %v7461_v6 = vpop.eup %5717  ;;  %v3254_v43 = vsel %vm1063_vm3, %v7459_v34, 0.0  ;;  %v5319_v56 = vpop.permute.xlu1 %5318 }
0x1116   :  { %v3242_v2 = vsel %vm1063_vm3, %v7461_v6, 0.0  ;;  %v5321_v36 = vunpack.i.h.bf16 %v5319_v56  ;;  %v5320_v60 = vunpack.i.l.bf16 %v5319_v56 }
0x1119   :  { %3255 = vadd.xlane.f32.xlu0 %v3254_v43  ;;  %v3336_v43 = vpack.c.bf16 %v5321_v36, %v5320_v60 }
0x111b   :  { %v7465_v47 = vpop.eup %5719 }
0x111c   :  { %v3245_v27 = vsel %vm1063_vm3, %v7465_v47, 0.0  ;;  %v7471_v26 = vpop.eup %5721 }
0x111d   :  { %3246 = vadd.xlane.f32.xlu1 %v3245_v27  ;;  %3243 = vadd.xlane.f32.xlu0 %v3242_v2  ;;  %v3257_v49 = vsel %vm1063_vm3, %v7471_v26, 0.0  ;;  %v7475_v31 = vpop.eup %5723  ;;  %v5316_v2 = vunpack.i.h.bf16 %v5314_v19 }
0x111e   :  { %v3260_v62 = vsel %vm1063_vm3, %v7475_v31, 0.0  ;;  %v7479_v4 = vpop.eup %5725 }
0x111f   :  { %v3248_v54 = vsel %vm1063_vm3, %v7479_v4, 0.0  ;;  %v7483_v22 = vpop.eup %5727 }
0x1120   :  { %v3263_v18 = vsel %vm1063_vm3, %v7483_v22, 0.0  ;;  %v7492_v20 = vpop.eup %5729 }
0x1121   :  { %3258 = vadd.xlane.f32.xlu0 %v3257_v49  ;;  %v3266_v28 = vsel %vm1063_vm3, %v7492_v20, 0.0  ;;  %v5315_v49 = vunpack.i.l.bf16 %v5314_v19 }
0x1123   :  { %v3340_v56 = vpack.c.bf16 %v5316_v2, %v5315_v49 }
0x1125   :  { %3261 = vadd.xlane.f32.xlu0 %v3260_v62 }
0x1129   :  { %3249 = vadd.xlane.f32.xlu0 %v3248_v54 }
0x112d   :  { %3264 = vadd.xlane.f32.xlu0 %v3263_v18 }
0x112e   :  { %5328 = vrot.lane.b32.xlu1 %v7109_v42, %s5848_s30 }
0x1143   :  { %5323 = vrot.lane.b32.xlu0 %v7126_v16, %s5849_s1 }
0x1152   :  { %3267 = vadd.xlane.f32.xlu1 %v3266_v28 }
0x1163   :  { %5333 = vrot.lane.b32.xlu1 %v7109_v42, %s5849_s1 }
0x116a   :  { %v3199_v48 = vpop.xlane.xlu1 %3198 }
0x116b   :  { %5731 = vrcp.f32 %v3199_v48 }
0x116e   :  { %v3202_v53 = vpop.xlane.xlu0 %3201 }
0x116f   :  { %5733 = vrcp.f32 %v3202_v53 }
0x1172   :  { %v3217_v50 = vpop.xlane.xlu1 %3216 }
0x1173   :  { %5735 = vrcp.f32 %v3217_v50 }
0x1176   :  { %v3205_v16 = vpop.xlane.xlu1 %3204 }
0x1178   :  { %v5732_v3 = vpop.eup %5731 }
0x1179   :  { %v3293_v57 = vmul.f32 %v5732_v3, %v7377_v21 }
0x117a   :  { %v3220_v10 = vpop.xlane.xlu0 %3219 }
0x117b   :  { %5737 = vrcp.f32 %v3220_v10 }
0x117c   :  { %v5734_v61 = vpop.eup %5733  ;;  %5739 = vrcp.f32 %v3205_v16 }
0x117d   :  { %v3294_v15 = vmul.f32 %v5734_v61, %v7382_v63 }
0x117e   :  { %v3208_v42 = vpop.xlane.xlu0 %3207 }
0x117f   :  { %v3317_v40 = vpack.c.bf16 %v3294_v15, %v3293_v57  ;;  %5741 = vrcp.f32 %v3208_v42 }
0x1180   :  { %v5736_v21 = vpop.eup %5735 }
0x1181   :  { %5000 = vmatmul.mubr.msk.bf16.vlgmr.msra.gmra.mxu0 %vm1063_vm3, %v3317_v40  ;;  %v3299_v62 = vmul.f32 %v5736_v21, %v7387_v24 }
0x1182   :  { %5030 = vmatpush3.bf16.msra.mxu0 %v3337_v8  ;;  %5003 = vmatprep.mubr.msk.bf16.mxu0 %vm5851_vm1, %v5850_v9  ;;  %v3223_v27 = vpop.xlane.xlu1 %3222 }
0x1183   :  { %5031 = vmatprep.subr.bf16.mxu0 %v5850_v9  ;;  %5743 = vrcp.f32 %v3223_v27 }
0x1186   :  { %5032 = vmatpush3.bf16.msra.mxu0 %v3336_v43  ;;  %v3211_v23 = vpop.xlane.xlu1 %3210 }
0x1187   :  { %5033 = vmatprep.subr.bf16.mxu0 %v5850_v9 }
0x1188   :  { %v5738_v63 = vpop.eup %5737 }
0x1189   :  { %v3300_v54 = vmul.f32 %v5738_v63, %v7397_v38  ;;  %v5740_v18 = vpop.eup %5739 }
0x118a   :  { %v3226_v59 = vpop.xlane.xlu0 %3225  ;;  %v3295_v1 = vmul.f32 %v5740_v18, %v7392_v55 }
0x118b   :  { %v3320_v7 = vpack.c.bf16 %v3300_v54, %v3299_v62  ;;  %5745 = vrcp.f32 %v3226_v59 }
0x118c   :  { %v5742_v28 = vpop.eup %5741  ;;  %5747 = vrcp.f32 %v3211_v23 }
0x118d   :  { %5018 = vmatmul.mubr.msk.bf16.vlgmr.msra.gmra.mxu1 %vm1063_vm3, %v3320_v7  ;;  %v3296_v48 = vmul.f32 %v5742_v28, %v7403_v30 }
0x118e   :  { %5048 = vmatpush3.bf16.msra.mxu1 %v3340_v56  ;;  %v3214_v19 = vpop.xlane.xlu0 %3213  ;;  %5021 = vmatprep.mubr.msk.bf16.mxu1 %vm5851_vm1, %v5850_v9 }
0x118f   :  { %5749 = vrcp.f32 %v3214_v19  ;;  %v3318_v24 = vpack.c.bf16 %v3296_v48, %v3295_v1  ;;  %5049 = vmatprep.subr.bf16.mxu1 %v5850_v9 }
0x1190   :  { %v5744_v55 = vpop.eup %5743 }
0x1191   :  { %5004 = vmatmul.mubr.msk.bf16.gmra.mxu0 %vm1063_vm3, %v3318_v24  ;;  %v3301_v16 = vmul.f32 %v5744_v55, %v7409_v58 }
0x1192   :  { %v3229_v38 = vpop.xlane.xlu1 %3228  ;;  %v3232_v53 = vpop.xlane.xlu0 %3231  ;;  %5007 = vmatprep.mubr.msk.bf16.mxu0 %vm5851_vm1, %v5850_v9 }
0x1193   :  { %5751 = vrcp.f32 %v3229_v38 }
0x1194   :  { %5753 = vrcp.f32 %v3232_v53 }
0x1196   :  { %v3235_v50 = vpop.xlane.xlu1 %3234  ;;  %v3238_v3 = vpop.xlane.xlu0 %3237 }
0x1197   :  { %5755 = vrcp.f32 %v3235_v50 }
0x1198   :  { %v5746_v30 = vpop.eup %5745  ;;  %5757 = vrcp.f32 %v3238_v3 }
0x1199   :  { %v3302_v10 = vmul.f32 %v5746_v30, %v7419_v32  ;;  %v5748_v61 = vpop.eup %5747 }
0x119a   :  { %v3297_v57 = vmul.f32 %v5748_v61, %v7414_v39  ;;  %v3253_v36 = vpop.xlane.xlu1 %3252 }
0x119b   :  { %v3321_v11 = vpack.c.bf16 %v3302_v10, %v3301_v16 }
0x119c   :  { %v5750_v13 = vpop.eup %5749 }
0x119d   :  { %5022 = vmatmul.mubr.msk.bf16.gmra.mxu1 %vm1063_vm3, %v3321_v11  ;;  %v3298_v15 = vmul.f32 %v5750_v13, %v7425_v51 }
0x119e   :  { %v3241_v42 = vpop.xlane.xlu0 %3240  ;;  %5025 = vmatprep.mubr.msk.bf16.mxu1 %vm5851_vm1, %v5850_v9 }
0x119f   :  { %v3319_v40 = vpack.c.bf16 %v3298_v15, %v3297_v57  ;;  %5759 = vrcp.f32 %v3241_v42 }
0x11a0   :  { %v5752_v8 = vpop.eup %5751 }
0x11a1   :  { %v5754_v58 = vpop.eup %5753  ;;  %5008 = vmatmul.mubr.msk.bf16.gmra.mxu0 %vm1063_vm3, %v3319_v40  ;;  %v3303_v32 = vmul.f32 %v5752_v8, %v7432_v5 }
0x11a2   :  { %v3256_v60 = vpop.xlane.xlu0 %3255  ;;  %v3304_v43 = vmul.f32 %v5754_v58, %v7430_v44  ;;  %5035 = vmatprep.mubr.msk.bf16.mxu0 %vm5851_vm1, %v5850_v9 }
0x11a4   :  { %v3322_v39 = vpack.c.bf16 %v3304_v43, %v3303_v32  ;;  %v5756_v21 = vpop.eup %5755 }
0x11a5   :  { %v5758_v63 = vpop.eup %5757  ;;  %v3305_v44 = vmul.f32 %v5756_v21, %v7442_v25 }
0x11a6   :  { %5026 = vmatmul.mubr.msk.bf16.gmra.mxu1 %vm1063_vm3, %v3322_v39  ;;  %v3247_v51 = vpop.xlane.xlu1 %3246  ;;  %v3244_v27 = vpop.xlane.xlu0 %3243  ;;  %v3306_v54 = vmul.f32 %v5758_v63, %v7439_v41 }
0x11a7   :  { %5053 = vmatprep.mubr.msk.bf16.mxu1 %vm5851_vm1, %v5850_v9  ;;  %5761 = vrcp.f32 %v3244_v27 }
0x11a8   :  { %v3323_v59 = vpack.c.bf16 %v3306_v54, %v3305_v44  ;;  %5763 = vrcp.f32 %v3247_v51 }
0x11aa   :  { %v5329_v5 = vpop.permute.xlu1 %5328  ;;  %v3259_v2 = vpop.xlane.xlu0 %3258 }
0x11ab   :  { %v5331_v49 = vunpack.i.h.bf16 %v5329_v5  ;;  %v5330_v62 = vunpack.i.l.bf16 %v5329_v5 }
0x11ac   :  { %v5760_v28 = vpop.eup %5759 }
0x11ad   :  { %v3335_v18 = vpack.c.bf16 %v5331_v49, %v5330_v62  ;;  %v3307_v25 = vmul.f32 %v5760_v28, %v7454_v33 }
0x11ae   :  { %v3262_v23 = vpop.xlane.xlu0 %3261 }
0x11af   :  { %5034 = vmatpush3.bf16.msra.mxu0 %v3335_v18 }
0x11b0   :  { %5065 = vmatprep.subr.bf16.mxu0 %v5850_v9 }
0x11b2   :  { %v3250_v7 = vpop.xlane.xlu0 %3249  ;;  %5036 = vmatmul.mubr.msk.bf16.vlgmr.msra.gmra.mxu0 %vm1063_vm3, %v3323_v59 }
0x11b3   :  { %5765 = vrcp.f32 %v3250_v7  ;;  %5039 = vmatprep.mubr.msk.bf16.mxu0 %vm5851_vm1, %v5850_v9 }
0x11b4   :  { %v5762_v56 = vpop.eup %5761  ;;  %5767 = vrcp.f32 %v3256_v60 }
0x11b5   :  { %v3308_v41 = vmul.f32 %v5762_v56, %v7461_v6  ;;  %v5764_v55 = vpop.eup %5763  ;;  %5769 = vrcp.f32 %v3253_v36 }
0x11b6   :  { %v3265_v1 = vpop.xlane.xlu0 %3264  ;;  %v3309_v50 = vmul.f32 %v5764_v55, %v7465_v47  ;;  %5771 = vrcp.f32 %v3262_v23 }
0x11b7   :  { %v3324_v48 = vpack.c.bf16 %v3308_v41, %v3307_v25  ;;  %5773 = vrcp.f32 %v3259_v2 }
0x11ba   :  { %v5324_v19 = vpop.permute.xlu0 %5323  ;;  %5040 = vmatmul.mubr.msk.bf16.gmra.mxu0 %vm1063_vm3, %v3324_v48 }
0x11bb   :  { %v5326_v24 = vunpack.i.h.bf16 %v5324_v19  ;;  %v5325_v38 = vunpack.i.l.bf16 %v5324_v19  ;;  %5043 = vmatprep.mubr.msk.bf16.mxu0 %vm5851_vm1, %v5850_v9 }
0x11bd   :  { %v3339_v53 = vpack.c.bf16 %v5326_v24, %v5325_v38 }
0x11bf   :  { %5050 = vmatpush3.bf16.msra.mxu1 %v3339_v53 }
0x11c0   :  { %v5766_v30 = vpop.eup %5765  ;;  %5051 = vmatprep.subr.bf16.mxu1 %v5850_v9 }
0x11c1   :  { %v3310_v33 = vmul.f32 %v5766_v30, %v7479_v4  ;;  %v5768_v16 = vpop.eup %5767 }
0x11c2   :  { %v5770_v61 = vpop.eup %5769  ;;  %v3312_v47 = vmul.f32 %v5768_v16, %v7459_v34 }
0x11c3   :  { %v3325_v6 = vpack.c.bf16 %v3310_v33, %v3309_v50  ;;  %v3311_v57 = vmul.f32 %v5770_v61, %v7449_v12  ;;  %v5772_v42 = vpop.eup %5771  ;;  %v5459_v33 = vld [vmem:[%s7883_s10 + $0x38] sm:$0xff]  }
0x11c4   :  { %v5774_v40 = vpop.eup %5773  ;;  %v3314_v8 = vmul.f32 %v5772_v42, %v7475_v31  ;;  %5066 = vmatpush3.bf16.msra.mxu0 %v5459_v33  ;;  %v5462_v42 = vld [vmem:[%s7883_s10 + $0x20] sm:$0xff]  }
0x11c5   :  { %5044 = vmatmul.mubr.msk.bf16.gmra.mxu0 %vm1063_vm3, %v3325_v6  ;;  %v3326_v15 = vpack.c.bf16 %v3312_v47, %v3311_v57  ;;  %v3313_v58 = vmul.f32 %v5774_v40, %v7471_v26  ;;  %5067 = vmatprep.subr.bf16.mxu0 %v5850_v9 }
0x11c6   :  { %5073 = vmatprep.mubr.msk.bf16.mxu0 %vm5851_vm1, %v5850_v9 }
0x11c7   :  { %v3327_v32 = vpack.c.bf16 %v3314_v8, %v3313_v58 }
0x11db   :  { %v3268_v3 = vpop.xlane.xlu1 %3267 }
0x11dc   :  { %5775 = vrcp.f32 %v3268_v3  ;;  %v5460_v3 = vld [vmem:[%s7883_s10 + $0x30] sm:$0xff]  }
0x11dd   :  { %5777 = vrcp.f32 %v3265_v1  ;;  %5068 = vmatpush3.bf16.msra.mxu0 %v5460_v3 }
0x11de   :  { %5069 = vmatprep.subr.bf16.mxu0 %v5850_v9 }
0x11df   :  { %v5334_v10 = vpop.permute.xlu1 %5333 }
0x11e0   :  { %v5336_v11 = vunpack.i.h.bf16 %v5334_v10  ;;  %v5335_v13 = vunpack.i.l.bf16 %v5334_v10 }
0x11e2   :  { %v3338_v4 = vpack.c.bf16 %v5336_v11, %v5335_v13  ;;  %v5461_v11 = vld [vmem:[%s7883_s10 + $0x28] sm:$0xff]  }
0x11e3   :  { %5070 = vmatpush3.bf16.msra.mxu0 %v5461_v11 }
0x11e4   :  { %5052 = vmatpush3.bf16.msra.mxu1 %v3338_v4  ;;  %5071 = vmatprep.subr.bf16.mxu0 %v5850_v9 }
0x11e7   :  { %5054 = vmatmul.mubr.msk.bf16.vlgmr.msra.gmra.mxu1 %vm1063_vm3, %v3326_v15  ;;  %5072 = vmatpush3.bf16.msra.mxu0 %v5462_v42 }
0x11e8   :  { %5057 = vmatprep.mubr.msk.bf16.mxu1 %vm5851_vm1, %v5850_v9 }
0x11e9   :  { %v5776_v34 = vpop.eup %5775 }
0x11ea   :  { %v5778_v36 = vpop.eup %5777  ;;  %v3316_v12 = vmul.f32 %v5776_v34, %v7492_v20 }
0x11eb   :  { %v3315_v60 = vmul.f32 %v5778_v36, %v7483_v22 }
0x11ed   :  { %v3328_v43 = vpack.c.bf16 %v3316_v12, %v3315_v60 }
0x11ef   :  { %5058 = vmatmul.mubr.msk.bf16.gmra.mxu1 %vm1063_vm3, %v3327_v32 }
0x11f0   :  { %5061 = vmatprep.mubr.msk.bf16.mxu1 %vm5851_vm1, %v5850_v9 }
0x11f7   :  { %5062 = vmatmul.mubr.msk.bf16.gmra.mxu1 %vm1063_vm3, %v3328_v43 }
0x11f8   :  { %4023 = vmatprep.mubr.bf16.mxu1 %v5845_v0 }
0x1241   :  { %v7562_v31 = vpop.f32.mrf.mxu0 }
0x1243   :  { %v5001_v26 = vpop.f32.mrf.mxu0 }
0x1245   :  { %v7564_v39 = vpop.f32.mrf.mxu0 }
0x1247   :  { %v5002_v51 = vpop.f32.mrf.mxu0 }
0x124d   :  { %v3450_v27 = vpop.f32.mrf.mxu1 }
0x124f   :  { %v5019_v21 = vpop.f32.mrf.mxu1 }
0x1251   :  { %v7566_v63 = vpop.f32.mrf.mxu0  ;;  %v3453_v5 = vpop.f32.mrf.mxu1 }
0x1252   :  { %v5337_v2 = vpack.i.bf16 %v3453_v5, %v3450_v27 }
0x1253   :  { %v5005_v20 = vpop.f32.mrf.mxu0  ;;  %v5020_v49 = vpop.f32.mrf.mxu1 }
0x1254   :  { %5338 = vrot.lane.b32.xlu1 %v5337_v2, %s5852_s27 }
0x1255   :  { %v7569_v22 = vpop.f32.mrf.mxu0 }
0x1257   :  { %v5006_v62 = vpop.f32.mrf.mxu0 }
0x125d   :  { %v3458_v44 = vpop.f32.mrf.mxu1 }
0x125f   :  { %v5023_v54 = vpop.f32.mrf.mxu1 }
0x1261   :  { %v7571_v18 = vpop.f32.mrf.mxu0  ;;  %v3461_v23 = vpop.f32.mrf.mxu1 }
0x1262   :  { %v5352_v59 = vpack.i.bf16 %v3461_v23, %v3458_v44 }
0x1263   :  { %v5009_v7 = vpop.f32.mrf.mxu0  ;;  %v5024_v28 = vpop.f32.mrf.mxu1 }
0x1265   :  { %v7573_v56 = vpop.f32.mrf.mxu0 }
0x1266   :  { %v3466_v1 = vpop.f32.mrf.mxu1 }
0x1267   :  { %v5010_v25 = vpop.f32.mrf.mxu0 }
0x1268   :  { %v5027_v41 = vpop.f32.mrf.mxu1 }
0x126a   :  { %v3469_v48 = vpop.f32.mrf.mxu1 }
0x126b   :  { %v5367_v13 = vpack.i.bf16 %v3469_v48, %v3466_v1 }
0x126c   :  { %v5028_v19 = vpop.f32.mrf.mxu1 }
0x1272   :  { %v3516_v24 = vpop.f32.mrf.mxu0 }
0x1274   :  { %v5037_v38 = vpop.f32.mrf.mxu0 }
0x1276   :  { %v3519_v53 = vpop.f32.mrf.mxu0 }
0x1277   :  { %v5342_v55 = vpack.i.bf16 %v3519_v53, %v3516_v24 }
0x1278   :  { %v5038_v30 = vpop.f32.mrf.mxu0 }
0x1279   :  { %5343 = vrot.lane.b32.xlu1 %v5342_v55, %s5853_s19 }
0x127a   :  { %v3524_v50 = vpop.f32.mrf.mxu0 }
0x127c   :  { %v5041_v6 = vpop.f32.mrf.mxu0 }
0x127e   :  { %v3527_v16 = vpop.f32.mrf.mxu0 }
0x127f   :  { %v5357_v10 = vpack.i.bf16 %v3527_v16, %v3524_v50 }
0x1280   :  { %v5042_v61 = vpop.f32.mrf.mxu0 }
0x1281   :  { %5358 = vrot.lane.b32.xlu0 %v5357_v10, %s5853_s19 }
0x1285   :  { %v3532_v47 = vpop.f32.mrf.mxu0  ;;  %5368 = vrot.lane.b32.xlu0 %v5367_v13, %s5852_s27 }
0x1287   :  { %v5045_v4 = vpop.f32.mrf.mxu0 }
0x1289   :  { %v3535_v57 = vpop.f32.mrf.mxu0 }
0x128a   :  { %v5372_v27 = vpack.i.bf16 %v3535_v57, %v3532_v47 }
0x128b   :  { %v5046_v15 = vpop.f32.mrf.mxu0 }
0x12a7   :  { %v3582_v40 = vpop.f32.mrf.mxu1 }
0x12a9   :  { %v5055_v8 = vpop.f32.mrf.mxu1 }
0x12ab   :  { %v3585_v58 = vpop.f32.mrf.mxu1 }
0x12ac   :  { %v5347_v32 = vpack.i.bf16 %v3585_v58, %v3582_v40 }
0x12ad   :  { %v5056_v34 = vpop.f32.mrf.mxu1 }
0x12ae   :  { %5348 = vrot.lane.b32.xlu1 %v5347_v32, %s5854_s5 }
0x12af   :  { %v3590_v36 = vpop.f32.mrf.mxu1 }
0x12b1   :  { %v5059_v12 = vpop.f32.mrf.mxu1 }
0x12b2   :  { %5353 = vrot.lane.b32.xlu1 %v5352_v59, %s5852_s27 }
0x12b3   :  { %v3593_v60 = vpop.f32.mrf.mxu1 }
0x12b4   :  { %v5362_v43 = vpack.i.bf16 %v3593_v60, %v3590_v36 }
0x12b5   :  { %v5060_v26 = vpop.f32.mrf.mxu1 }
0x12b6   :  { %5363 = vrot.lane.b32.xlu1 %v5362_v43, %s5854_s5 }
0x12b7   :  { %v3598_v51 = vpop.f32.mrf.mxu1 }
0x12b9   :  { %v5063_v21 = vpop.f32.mrf.mxu1 }
0x12ba   :  { %5373 = vrot.lane.b32.xlu1 %v5372_v27, %s5853_s19 }
0x12bb   :  { %v3601_v5 = vpop.f32.mrf.mxu1 }
0x12bc   :  { %v5377_v2 = vpack.i.bf16 %v3601_v5, %v3598_v51 }
0x12bd   :  { %v5064_v20 = vpop.f32.mrf.mxu1 }
0x12be   :  { %5378 = vrot.lane.b32.xlu0 %v5377_v2, %s5854_s5 }
0x12c6   :  { %v5339_v49 = vpop.permute.xlu1 %5338 }
0x12c7   :  { %v5341_v44 = vunpack.i.h.bf16 %v5339_v49  ;;  %v5340_v54 = vunpack.i.l.bf16 %v5339_v49 }
0x12c9   :  { %v3678_v28 = vsel %vm798_vm2, %v7564_v39, %v5341_v44  ;;  %v3677_v1 = vsel %vm798_vm2, %v7562_v31, %v5340_v54 }
0x12eb   :  { %v5344_v62 = vpop.permute.xlu1 %5343 }
0x12ec   :  { %v5346_v23 = vunpack.i.h.bf16 %v5344_v62  ;;  %v5345_v59 = vunpack.i.l.bf16 %v5344_v62 }
0x12ee   :  { %v3683_v48 = vsel %vm1694_vm4, %v3677_v1, %v5345_v59  ;;  %v3684_v19 = vsel %vm1694_vm4, %v3678_v28, %v5346_v23 }
0x12f3   :  { %v5359_v53 = vpop.permute.xlu0 %5358 }
0x12f4   :  { %v5361_v6 = vunpack.i.h.bf16 %v5359_v53  ;;  %v5360_v3 = vunpack.i.l.bf16 %v5359_v53 }
0x12f7   :  { %v5369_v11 = vpop.permute.xlu0 %5368 }
0x12f8   :  { %v5370_v42 = vunpack.i.l.bf16 %v5369_v11 }
0x12fa   :  { %v3681_v34 = vsel %vm798_vm2, %v7571_v18, %v5370_v42 }
0x1320   :  { %v5349_v7 = vpop.permute.xlu1 %5348 }
0x1321   :  { %v5351_v25 = vunpack.i.h.bf16 %v5349_v7  ;;  %v5350_v41 = vunpack.i.l.bf16 %v5349_v7 }
0x1323   :  { %v3690_v24 = vsel %vm1063_vm3, %v3684_v19, %v5351_v25  ;;  %v3689_v38 = vsel %vm1063_vm3, %v3683_v48, %v5350_v41 }
0x1324   :  { %v3695_v55 = vpack.c.bf16 %v3690_v24, %v3689_v38  ;;  %v5354_v30 = vpop.permute.xlu1 %5353 }
0x1325   :  { %v5356_v50 = vunpack.i.h.bf16 %v5354_v30  ;;  %v5355_v33 = vunpack.i.l.bf16 %v5354_v30 }
0x1326   :  { %5074 = vmatmul.mubr.msk.bf16.vlgmr.msra.gmra.mxu0 %vm195_vm0, %v3695_v55 }
0x1327   :  { %v3680_v31 = vsel %vm798_vm2, %v7569_v22, %v5356_v50  ;;  %v3679_v39 = vsel %vm798_vm2, %v7566_v63, %v5355_v33  ;;  %5077 = vmatprep.mubr.msk.bf16.mxu0 %vm5851_vm1, %v5850_v9  ;;  %v5371_v63 = vunpack.i.h.bf16 %v5369_v11 }
0x1328   :  { %v5364_v16 = vpop.permute.xlu1 %5363  ;;  %v3685_v13 = vsel %vm1694_vm4, %v3679_v39, %v5360_v3  ;;  %v3686_v47 = vsel %vm1694_vm4, %v3680_v31, %v5361_v6 }
0x1329   :  { %v5366_v10 = vunpack.i.h.bf16 %v5364_v16  ;;  %v5365_v61 = vunpack.i.l.bf16 %v5364_v16  ;;  %v3682_v32 = vsel %vm798_vm2, %v7573_v56, %v5371_v63 }
0x132b   :  { %v3692_v4 = vsel %vm1063_vm3, %v3686_v47, %v5366_v10  ;;  %v3691_v22 = vsel %vm1063_vm3, %v3685_v13, %v5365_v61 }
0x132c   :  { %v3696_v57 = vpack.c.bf16 %v3692_v4, %v3691_v22  ;;  %v5374_v15 = vpop.permute.xlu1 %5373 }
0x132d   :  { %v5376_v40 = vunpack.i.h.bf16 %v5374_v15  ;;  %v5375_v8 = vunpack.i.l.bf16 %v5374_v15 }
0x132e   :  { %5078 = vmatmul.mubr.msk.bf16.gmra.mxu0 %vm195_vm0, %v3696_v57 }
0x132f   :  { %5081 = vmatprep.mubr.msk.bf16.mxu0 %vm5851_vm1, %v5850_v9  ;;  %v3688_v60 = vsel %vm1694_vm4, %v3682_v32, %v5376_v40  ;;  %v3687_v43 = vsel %vm1694_vm4, %v3681_v34, %v5375_v8  ;;  %v4533_v9 = vld [vmem:[%s7884_s11 + $0x1] ss:$0 sm:$0xff] }
0x1330   :  { %v5379_v58 = vpop.permute.xlu0 %5378 }
0x1331   :  { %v5381_v36 = vunpack.i.h.bf16 %v5379_v58  ;;  %v5380_v12 = vunpack.i.l.bf16 %v5379_v58 }
0x1333   :  { %v3694_v26 = vsel %vm1063_vm3, %v3688_v60, %v5381_v36  ;;  %v3693_v51 = vsel %vm1063_vm3, %v3687_v43, %v5380_v12 }
0x1334   :  { %v3697_v27 = vpack.c.bf16 %v3694_v26, %v3693_v51 }
0x1336   :  { %5082 = vmatmul.mubr.msk.bf16.gmra.mxu0 %vm195_vm0, %v3697_v27 }
0x13e6   :  { %v3782_v56 = vpop.f32.mrf.mxu0 }
0x13e7   :  { %v3783_v21 = vadd.f32 %v4533_v9, %v3782_v56  ;;  %v5463_v56 = vld [vmem:[%s7885_s14 + $0x70] ss:$8 sps:$4 sm:$0xff]  }
0x13e8   :  { %v5075_v18 = vpop.f32.mrf.mxu0 }
0x13e9   :  { %v7633_v5 = vadd.f32 %v3783_v21, %v6978_v14  ;;  %v5468_v21 = vld [vmem:[%s7885_s14 + $0x64] ss:$8 sps:$4 sm:$0xff]   ;;  %v5466_v18 = vld [vmem:[%s7885_s14 + $0x60] ss:$8 sps:$4 sm:$0xff]  }
0x13ea   :  { %v3785_v2 = vpop.f32.mrf.mxu0 }
0x13eb   :  { %v3786_v20 = vadd.f32 %v4533_v9, %v3785_v2  ;;  %v3815_v49 = vsel %vm195_vm0, %v7633_v5, 0.0  ;;  %v5471_v2 = vld [vmem:[%s7885_s14 + $0x54] ss:$8 sps:$4 sm:$0xff]  }
0x13ec   :  { %v5076_v62 = vpop.f32.mrf.mxu0  ;;  %3816 = vadd.xlane.f32.xlu1 %v3815_v49  ;;  %v5474_v49 = vld [vmem:[%s7885_s14 + $0x44] ss:$8 sps:$4 sm:$0xff]  }
0x13ed   :  { %v7638_v44 = vadd.f32 %v3786_v20, %v6983_v37  ;;  %v5469_v20 = vld [vmem:[%s7885_s14 + $0x50] ss:$8 sps:$4 sm:$0xff]   ;;  %v5472_v62 = vld [vmem:[%s7885_s14 + $0x40] ss:$8 sps:$4 sm:$0xff]  }
0x13ee   :  { %v3790_v54 = vpop.f32.mrf.mxu0 }
0x13ef   :  { %v3791_v23 = vadd.f32 %v4533_v9, %v3790_v54  ;;  %v3818_v59 = vsel %vm195_vm0, %v7638_v44, 0.0 }
0x13f0   :  { %v5079_v7 = vpop.f32.mrf.mxu0  ;;  %3819 = vadd.xlane.f32.xlu0 %v3818_v59 }
0x13f1   :  { %v7643_v14 = vadd.f32 %v3791_v23, %v6988_v46 }
0x13f2   :  { %v3793_v28 = vpop.f32.mrf.mxu0 }
0x13f3   :  { %v3794_v1 = vadd.f32 %v4533_v9, %v3793_v28  ;;  %v3821_v25 = vsel %vm195_vm0, %v7643_v14, 0.0 }
0x13f4   :  { %v5080_v41 = vpop.f32.mrf.mxu0  ;;  %3822 = vadd.xlane.f32.xlu0 %v3821_v25 }
0x13f5   :  { %v7648_v37 = vadd.f32 %v3794_v1, %v6993_v17 }
0x13f6   :  { %v3798_v48 = vpop.f32.mrf.mxu0 }
0x13f7   :  { %v3799_v19 = vadd.f32 %v4533_v9, %v3798_v48  ;;  %v3824_v24 = vsel %vm195_vm0, %v7648_v37, 0.0 }
0x13f8   :  { %3825 = vadd.xlane.f32.xlu0 %v3824_v24  ;;  %v5083_v38 = vpop.f32.mrf.mxu0 }
0x13f9   :  { %v7653_v46 = vadd.f32 %v3799_v19, %v6998_v52 }
0x13fa   :  { %v3801_v53 = vpop.f32.mrf.mxu0 }
0x13fb   :  { %v3802_v55 = vadd.f32 %v4533_v9, %v3801_v53  ;;  %v3827_v30 = vsel %vm195_vm0, %v7653_v46, 0.0  ;;  %v5465_v9 = vld [vmem:[%s7885_s14 + $0x74] ss:$8 sps:$4 sm:$0xff]  }
0x13fc   :  { %3828 = vadd.xlane.f32.xlu1 %v3827_v30  ;;  %v5084_v50 = vpop.f32.mrf.mxu0  ;;  %3999 = vmatprep.subr.bf16.mxu1 %v5465_v9 }
0x13fd   :  { %v7658_v17 = vadd.f32 %v3802_v55, %v7003_v45  ;;  %4000 = vmatpush1.bf16.msra.mxu1 %v5463_v56 }
0x13fe   :  { %4001 = vmatprep.subr.bf16.mxu1 %v5468_v21  ;;  %v5476_v21 = vld [vmem:[%s7888_s16 + $0xb8] sm:$0xff]  }
0x13ff   :  { %v3830_v33 = vsel %vm195_vm0, %v7658_v17, 0.0 }
0x1400   :  { %3831 = vadd.xlane.f32.xlu0 %v3830_v33 }
0x1401   :  { %4002 = vmatpush1.bf16.msra.mxu1 %v5466_v18  ;;  %v5479_v18 = vld [vmem:[%s7888_s16 + $0xe8] sm:$0xff]  }
0x1402   :  { %4003 = vmatprep.subr.bf16.mxu1 %v5471_v2  ;;  %v5480_v2 = vld [vmem:[%s7888_s16 + $0xa8] sm:$0xff]  }
0x1405   :  { %4004 = vmatpush1.bf16.msra.mxu1 %v5469_v20  ;;  %v5481_v20 = vld [vmem:[%s7888_s16 + $0xe0] sm:$0xff]  }
0x1406   :  { %4005 = vmatprep.subr.bf16.mxu1 %v5474_v49  ;;  %v5482_v49 = vld [vmem:[%s7888_s16 + $0xa0] sm:$0xff]  }
0x1409   :  { %4006 = vmatpush1.bf16.msra.mxu1 %v5472_v62  ;;  %v5483_v62 = vld [vmem:[%s7888_s16 + $0xd8] sm:$0xff]  }
0x1475   :  { %v3817_v31 = vpop.xlane.xlu1 %3816 }
0x1476   :  { %v3833_v39 = vmul.f32 0.015625, %v3817_v31  ;;  %v4543_v31 = vld [vmem:[%s7886_s12 + $0x1] ss:$0 sm:$0xff] }
0x1478   :  { %v7663_v6 = vsub.f32 %v7633_v5, %v3833_v39 }
0x1479   :  { %v3820_v52 = vpop.xlane.xlu0 %3819 }
0x147a   :  { %v3834_v3 = vmul.f32 0.015625, %v3820_v52  ;;  %v3845_v16 = vmul.f32 %v7663_v6, %v7663_v6 }
0x147c   :  { %v7668_v10 = vsub.f32 %v7638_v44, %v3834_v3  ;;  %v3851_v45 = vsel %vm195_vm0, %v3845_v16, 0.0 }
0x147d   :  { %v3823_v61 = vpop.xlane.xlu0 %3822  ;;  %3852 = vadd.xlane.f32.xlu1 %v3851_v45 }
0x147e   :  { %v3835_v11 = vmul.f32 0.015625, %v3823_v61  ;;  %v3846_v13 = vmul.f32 %v7668_v10, %v7668_v10 }
0x1480   :  { %v7674_v47 = vsub.f32 %v7643_v14, %v3835_v11  ;;  %v3854_v4 = vsel %vm195_vm0, %v3846_v13, 0.0  ;;  %v4544_v11 = vld [vmem:[%s7887_s13 + $0x1] ss:$0 sm:$0xff] }
0x1481   :  { %v3826_v22 = vpop.xlane.xlu0 %3825  ;;  %3855 = vadd.xlane.f32.xlu0 %v3854_v4 }
0x1482   :  { %v3836_v57 = vmul.f32 0.015625, %v3826_v22  ;;  %v3847_v15 = vmul.f32 %v7674_v47, %v7674_v47 }
0x1484   :  { %v7680_v63 = vsub.f32 %v7648_v37, %v3836_v57  ;;  %v3857_v42 = vsel %vm195_vm0, %v3847_v15, 0.0 }
0x1485   :  { %3858 = vadd.xlane.f32.xlu1 %v3857_v42  ;;  %v3829_v40 = vpop.xlane.xlu1 %3828 }
0x1486   :  { %v3837_v8 = vmul.f32 0.015625, %v3829_v40  ;;  %v3848_v58 = vmul.f32 %v7680_v63, %v7680_v63 }
0x1488   :  { %v7686_v32 = vsub.f32 %v7653_v46, %v3837_v8  ;;  %v3860_v34 = vsel %vm195_vm0, %v3848_v58, 0.0 }
0x1489   :  { %3861 = vadd.xlane.f32.xlu0 %v3860_v34  ;;  %v3832_v36 = vpop.xlane.xlu0 %3831 }
0x148a   :  { %v3838_v12 = vmul.f32 0.015625, %v3832_v36  ;;  %v3849_v60 = vmul.f32 %v7686_v32, %v7686_v32 }
0x148c   :  { %v7692_v43 = vsub.f32 %v7658_v17, %v3838_v12  ;;  %v3863_v26 = vsel %vm195_vm0, %v3849_v60, 0.0 }
0x148d   :  { %3864 = vadd.xlane.f32.xlu1 %v3863_v26 }
0x148e   :  { %v3850_v51 = vmul.f32 %v7692_v43, %v7692_v43 }
0x1490   :  { %v3866_v27 = vsel %vm195_vm0, %v3850_v51, 0.0 }
0x1491   :  { %3867 = vadd.xlane.f32.xlu0 %v3866_v27 }
0x1506   :  { %v3853_v54 = vpop.xlane.xlu1 %3852 }
0x1507   :  { %v3869_v23 = vmul.f32 0.015625, %v3853_v54  ;;  %v5484_v54 = vld [vmem:[%s7888_s16 + $0x98] sm:$0xff]  }
0x1509   :  { %v3875_v59 = vadd.f32 1e-05, %v3869_v23  ;;  %v5485_v23 = vld [vmem:[%s7888_s16 + $0xd0] sm:$0xff]  }
0x150a   :  { %v3856_v7 = vpop.xlane.xlu0 %3855 }
0x150b   :  { %5779 = vrsqrt.f32 %v3875_v59  ;;  %v3870_v28 = vmul.f32 0.015625, %v3856_v7  ;;  %v5486_v59 = vld [vmem:[%s7888_s16 + $0x90] sm:$0xff]   ;;  %v5487_v7 = vld [vmem:[%s7888_s16 + $0xc8] sm:$0xff]  }
0x150d   :  { %v3876_v1 = vadd.f32 1e-05, %v3870_v28  ;;  %v5488_v28 = vld [vmem:[%s7888_s16 + $0x88] sm:$0xff]  }
0x150e   :  { %v3859_v25 = vpop.xlane.xlu1 %3858 }
0x150f   :  { %5781 = vrsqrt.f32 %v3876_v1  ;;  %v3871_v41 = vmul.f32 0.015625, %v3859_v25  ;;  %v5489_v1 = vld [vmem:[%s7888_s16 + $0xc0] sm:$0xff]  }
0x1510   :  { %v5490_v25 = vld [vmem:[%s7888_s16 + $0x80] sm:$0xff]  }
0x1511   :  { %v3877_v48 = vadd.f32 1e-05, %v3871_v41  ;;  %v4553_v41 = vld [vmem:[%s7889_s15 + $0x2] sm:$0x3] }
0x1512   :  { %v3862_v19 = vpop.xlane.xlu0 %3861 }
0x1513   :  { %5783 = vrsqrt.f32 %v3877_v48  ;;  %v3872_v24 = vmul.f32 0.015625, %v3862_v19  ;;  %v3935_v48 = vrot.slane %v4553_v41, %v6177_v35  ;;  %v3939_v19 = vrot.slane %v4553_v41, %v6183_v29 }
0x1515   :  { %v3878_v38 = vadd.f32 1e-05, %v3872_v24 }
0x1516   :  { %v3865_v53 = vpop.xlane.xlu1 %3864 }
0x1517   :  { %5785 = vrsqrt.f32 %v3878_v38  ;;  %v3873_v55 = vmul.f32 0.015625, %v3865_v53 }
0x1518   :  { %v5780_v30 = vpop.eup %5779 }
0x1519   :  { %v3887_v50 = vmul.f32 %v5780_v30, %v7663_v6  ;;  %v3879_v33 = vadd.f32 1e-05, %v3873_v55 }
0x151a   :  { %v3868_v39 = vpop.xlane.xlu0 %3867 }
0x151b   :  { %5787 = vrsqrt.f32 %v3879_v33  ;;  %v3874_v52 = vmul.f32 0.015625, %v3868_v39  ;;  %v3899_v16 = vmul.f32 %v4543_v31, %v3887_v50 }
0x151c   :  { %v5782_v3 = vpop.eup %5781 }
0x151d   :  { %v3888_v45 = vmul.f32 %v5782_v3, %v7668_v10  ;;  %v3880_v61 = vadd.f32 1e-05, %v3874_v52  ;;  %v3911_v4 = vadd.f32 %v4544_v11, %v3899_v16 }
0x151f   :  { %v3900_v13 = vmul.f32 %v4543_v31, %v3888_v45  ;;  %5789 = vrsqrt.f32 %v3880_v61 }
0x1520   :  { %v5784_v6 = vpop.eup %5783 }
0x1521   :  { %v3912_v22 = vadd.f32 %v4544_v11, %v3900_v13  ;;  %v3889_v57 = vmul.f32 %v5784_v6, %v7674_v47 }
0x1523   :  { %v3917_v15 = vpack.c.bf16 %v3912_v22, %v3911_v4  ;;  %v3901_v8 = vmul.f32 %v4543_v31, %v3889_v57 }
0x1524   :  { %v5786_v42 = vpop.eup %5785 }
0x1525   :  { %v3890_v40 = vmul.f32 %v5786_v42, %v7680_v63  ;;  %4562 = vmatmul.mubr.msk.bf16.vlgmr.msra.gmra.mxu1 %vm195_vm0, %v3917_v15  ;;  %v3913_v36 = vadd.f32 %v4544_v11, %v3901_v8 }
0x1526   :  { %4033 = vmatprep.mubr.bf16.mxu1 %v5845_v0 }
0x1527   :  { %v3902_v10 = vmul.f32 %v4543_v31, %v3890_v40 }
0x1528   :  { %v5788_v58 = vpop.eup %5787 }
0x1529   :  { %v3891_v34 = vmul.f32 %v5788_v58, %v7686_v32  ;;  %v3914_v12 = vadd.f32 %v4544_v11, %v3902_v10  ;;  %v5475_v32 = vld [vmem:[%s7888_s16 + $0xf8] sm:$0xff]  }
0x152a   :  { %4755 = vmatprep.subr.bf16.mxu0 %v5475_v32 }
0x152b   :  { %v3918_v60 = vpack.c.bf16 %v3914_v12, %v3913_v36  ;;  %v3903_v47 = vmul.f32 %v4543_v31, %v3891_v34  ;;  %4756 = vmatpush3.bf16.msra.mxu0 %v5476_v21 }
0x152c   :  { %v5790_v26 = vpop.eup %5789 }
0x152d   :  { %v3892_v51 = vmul.f32 %v5790_v26, %v7692_v43  ;;  %4563 = vmatmul.mubr.msk.bf16.gmra.mxu1 %vm195_vm0, %v3918_v60  ;;  %v3915_v27 = vadd.f32 %v4544_v11, %v3903_v47  ;;  %v5478_v43 = vld [vmem:[%s7888_s16 + $0xb0] sm:$0xff]  }
0x152e   :  { %4043 = vmatprep.mubr.bf16.mxu1 %v5845_v0  ;;  %v5477_v0 = vld [vmem:[%s7888_s16 + $0xf0] sm:$0xff]  }
0x152f   :  { %v3904_v63 = vmul.f32 %v4543_v31, %v3892_v51  ;;  %4757 = vmatprep.subr.bf16.mxu0 %v5477_v0 }
0x1530   :  { %4758 = vmatpush3.bf16.msra.mxu0 %v5478_v43 }
0x1531   :  { %v3916_v9 = vadd.f32 %v4544_v11, %v3904_v63  ;;  %4759 = vmatprep.subr.bf16.mxu0 %v5479_v18 }
0x1533   :  { %v3919_v56 = vpack.c.bf16 %v3916_v9, %v3915_v27 }
0x1534   :  { %4760 = vmatpush3.bf16.msra.mxu0 %v5480_v2 }
0x1535   :  { %4564 = vmatmul.mubr.msk.bf16.gmra.mxu1 %vm195_vm0, %v3919_v56  ;;  %4761 = vmatprep.subr.bf16.mxu0 %v5481_v20 }
0x1538   :  { %4762 = vmatpush3.bf16.msra.mxu0 %v5482_v49 }
0x1539   :  { %4763 = vmatprep.subr.bf16.mxu0 %v5483_v62 }
0x153c   :  { %4764 = vmatpush3.bf16.msra.mxu0 %v5484_v54 }
0x153d   :  { %4765 = vmatprep.subr.bf16.mxu0 %v5485_v23 }
0x1540   :  { %4766 = vmatpush3.bf16.msra.mxu0 %v5486_v59 }
0x1541   :  { %4767 = vmatprep.subr.bf16.mxu0 %v5487_v7 }
0x1544   :  { %4768 = vmatpush3.bf16.msra.mxu0 %v5488_v28 }
0x1545   :  { %4769 = vmatprep.subr.bf16.mxu0 %v5489_v1 }
0x1548   :  { %4770 = vmatpush3.bf16.msra.mxu0 %v5490_v25 }
0x15e5   :  { %v4025_v24 = vpop.f32.mrf.mxu1 }
0x15e6   :  { %v7792_v38 = vadd.f32 %v4025_v24, %v3935_v48 }
0x15e7   :  { %v4027_v53 = vpop.f32.mrf.mxu1 }
0x15e8   :  { %v4565_v55 = vmul.f32 -1.702, %v7792_v38  ;;  %v7795_v30 = vadd.f32 %v4027_v53, %v3939_v19 }
0x15e9   :  { %v4029_v50 = vpop.f32.mrf.mxu1 }
0x15ea   :  { %v4078_v33 = vmul.f32 1.442695, %v4565_v55  ;;  %v4566_v31 = vmul.f32 -1.702, %v7795_v30  ;;  %v7798_v39 = vadd.f32 %v4029_v50, %v3935_v48 }
0x15eb   :  { %v4031_v52 = vpop.f32.mrf.mxu1 }
0x15ec   :  { %5791 = vpow2.f32 %v4078_v33  ;;  %v4080_v3 = vmul.f32 1.442695, %v4566_v31  ;;  %v4567_v35 = vmul.f32 -1.702, %v7798_v39  ;;  %v7801_v29 = vadd.f32 %v4031_v52, %v3939_v19 }
0x15ed   :  { %v4035_v16 = vpop.f32.mrf.mxu1 }
0x15ee   :  { %5793 = vpow2.f32 %v4080_v3  ;;  %v4082_v45 = vmul.f32 1.442695, %v4567_v35  ;;  %v4568_v61 = vmul.f32 -1.702, %v7801_v29  ;;  %v7804_v11 = vadd.f32 %v4035_v16, %v3935_v48 }
0x15ef   :  { %v4037_v13 = vpop.f32.mrf.mxu1 }
0x15f0   :  { %5795 = vpow2.f32 %v4082_v45  ;;  %v4084_v6 = vmul.f32 1.442695, %v4568_v61  ;;  %v4569_v4 = vmul.f32 -1.702, %v7804_v11  ;;  %v7807_v22 = vadd.f32 %v4037_v13, %v3939_v19 }
0x15f1   :  { %v4039_v57 = vpop.f32.mrf.mxu1 }
0x15f2   :  { %5797 = vpow2.f32 %v4084_v6  ;;  %v4086_v15 = vmul.f32 1.442695, %v4569_v4  ;;  %v4570_v42 = vmul.f32 -1.702, %v7807_v22  ;;  %v7810_v40 = vadd.f32 %v4039_v57, %v3935_v48 }
0x15f3   :  { %v4041_v8 = vpop.f32.mrf.mxu1 }
0x15f4   :  { %v4088_v10 = vmul.f32 1.442695, %v4570_v42  ;;  %v4571_v58 = vmul.f32 -1.702, %v7810_v40  ;;  %v7813_v34 = vadd.f32 %v4041_v8, %v3939_v19  ;;  %5799 = vpow2.f32 %v4086_v15 }
0x15f5   :  { %v4045_v36 = vpop.f32.mrf.mxu1 }
0x15f6   :  { %5801 = vpow2.f32 %v4088_v10  ;;  %v4090_v12 = vmul.f32 1.442695, %v4571_v58  ;;  %v4572_v60 = vmul.f32 -1.702, %v7813_v34  ;;  %v7816_v26 = vadd.f32 %v4045_v36, %v3935_v48 }
0x15f7   :  { %v4047_v51 = vpop.f32.mrf.mxu1 }
0x15f8   :  { %5803 = vpow2.f32 %v4090_v12  ;;  %v4092_v47 = vmul.f32 1.442695, %v4572_v60  ;;  %v4573_v63 = vmul.f32 -1.702, %v7816_v26  ;;  %v7819_v27 = vadd.f32 %v4047_v51, %v3939_v19 }
0x15f9   :  { %v5792_v9 = vpop.eup %5791  ;;  %v4049_v56 = vpop.f32.mrf.mxu1 }
0x15fa   :  { %v4102_v32 = vadd.f32 1.0, %v5792_v9  ;;  %5805 = vpow2.f32 %v4092_v47  ;;  %v4094_v21 = vmul.f32 1.442695, %v4573_v63  ;;  %v4574_v0 = vmul.f32 -1.702, %v7819_v27 }
0x15fb   :  { %v5794_v43 = vpop.eup %5793  ;;  %v7822_v18 = vadd.f32 %v4049_v56, %v3935_v48  ;;  %v4051_v2 = vpop.f32.mrf.mxu1 }
0x15fc   :  { %5807 = vrcp.f32 %v4102_v32  ;;  %v4103_v20 = vadd.f32 1.0, %v5794_v43  ;;  %v4096_v49 = vmul.f32 1.442695, %v4574_v0  ;;  %v7824_v62 = vadd.f32 %v4051_v2, %v3939_v19 }
0x15fd   :  { %v5796_v54 = vpop.eup %5795  ;;  %5809 = vpow2.f32 %v4094_v21  ;;  %v4575_v23 = vmul.f32 -1.702, %v7822_v18 }
0x15fe   :  { %5811 = vrcp.f32 %v4103_v20  ;;  %v4104_v59 = vadd.f32 1.0, %v5796_v54  ;;  %v4576_v7 = vmul.f32 -1.702, %v7824_v62 }
0x15ff   :  { %v5798_v28 = vpop.eup %5797  ;;  %5813 = vpow2.f32 %v4096_v49  ;;  %v4098_v1 = vmul.f32 1.442695, %v4575_v23  ;;  %v4610_v23 = vld [vmem:[%s7890_s17 + $0x1] ss:$0 sm:$0xff] }
0x1600   :  { %5815 = vrcp.f32 %v4104_v59  ;;  %v4105_v25 = vadd.f32 1.0, %v5798_v28  ;;  %v4100_v41 = vmul.f32 1.442695, %v4576_v7 }
0x1601   :  { %5817 = vpow2.f32 %v4098_v1  ;;  %v5800_v48 = vpop.eup %5799 }
0x1602   :  { %5819 = vrcp.f32 %v4105_v25  ;;  %v4106_v55 = vadd.f32 1.0, %v5800_v48 }
0x1603   :  { %v5802_v24 = vpop.eup %5801  ;;  %5821 = vpow2.f32 %v4100_v41 }
0x1604   :  { %v4107_v19 = vadd.f32 1.0, %v5802_v24 }
0x1605   :  { %v5804_v53 = vpop.eup %5803 }
0x1606   :  { %v4108_v50 = vadd.f32 1.0, %v5804_v53  ;;  %5823 = vrcp.f32 %v4107_v19 }
0x1607   :  { %v5806_v33 = vpop.eup %5805 }
0x1608   :  { %5825 = vrcp.f32 %v4108_v50  ;;  %v4109_v31 = vadd.f32 1.0, %v5806_v33 }
0x1609   :  { %v5808_v52 = vpop.eup %5807  ;;  %5827 = vrcp.f32 %v4106_v55 }
0x160a   :  { %v5810_v3 = vpop.eup %5809  ;;  %5829 = vrcp.f32 %v4109_v31  ;;  %v4138_v58 = vmul.f32 %v5808_v52, %v7792_v38 }
0x160b   :  { %v5812_v35 = vpop.eup %5811  ;;  %v4110_v6 = vadd.f32 1.0, %v5810_v3 }
0x160c   :  { %v5814_v16 = vpop.eup %5813  ;;  %v4139_v8 = vmul.f32 %v5812_v35, %v7795_v30 }
0x160d   :  { %v5816_v45 = vpop.eup %5815  ;;  %v4111_v61 = vadd.f32 1.0, %v5814_v16 }
0x160e   :  { %v5818_v13 = vpop.eup %5817  ;;  %v4140_v57 = vmul.f32 %v5816_v45, %v7798_v39 }
0x160f   :  { %v5820_v4 = vpop.eup %5819  ;;  %v4112_v15 = vadd.f32 1.0, %v5818_v13  ;;  %5831 = vrcp.f32 %v4111_v61 }
0x1610   :  { %v5822_v42 = vpop.eup %5821  ;;  %v4141_v10 = vmul.f32 %v5820_v4, %v7801_v29  ;;  %v4150_v60 = vpack.c.bf16 %v4140_v57, %v4138_v58 }
0x1611   :  { %5833 = vrcp.f32 %v4112_v15  ;;  %v4113_v36 = vadd.f32 1.0, %v5822_v42 }
0x1612   :  { %5835 = vrcp.f32 %v4110_v6  ;;  %v4151_v12 = vpack.c.bf16 %v4141_v10, %v4139_v8 }
0x1613   :  { %5837 = vrcp.f32 %v4113_v36  ;;  %v5824_v51 = vpop.eup %5823 }
0x1614   :  { %4325 = vmatprep.mubr.bf16.mxu0 %v4151_v12  ;;  %v4143_v30 = vmul.f32 %v5824_v51, %v7807_v22 }
0x1615   :  { %v5826_v47 = vpop.eup %5825  ;;  %4326 = vmatmul.mubr.bf16.vlgmr.msra.gmra.mxu0 %v4150_v60 }
0x1616   :  { %v5828_v39 = vpop.eup %5827  ;;  %v4144_v9 = vmul.f32 %v5826_v47, %v7810_v40 }
0x1617   :  { %v5830_v63 = vpop.eup %5829  ;;  %v4142_v38 = vmul.f32 %v5828_v39, %v7804_v11 }
0x1618   :  { %v4145_v29 = vmul.f32 %v5830_v63, %v7813_v34 }
0x1619   :  { %v4152_v32 = vpack.c.bf16 %v4144_v9, %v4142_v38 }
0x161a   :  { %v4153_v56 = vpack.c.bf16 %v4145_v29, %v4143_v30 }
0x161c   :  { %4333 = vmatprep.mubr.bf16.mxu0 %v4153_v56  ;;  %v5832_v21 = vpop.eup %5831 }
0x161d   :  { %4334 = vmatmul.mubr.bf16.gmra.mxu0 %v4152_v32  ;;  %v4147_v49 = vmul.f32 %v5832_v21, %v7819_v27 }
0x161e   :  { %v5834_v0 = vpop.eup %5833 }
0x161f   :  { %v5836_v43 = vpop.eup %5835  ;;  %v4148_v20 = vmul.f32 %v5834_v0, %v7822_v18 }
0x1620   :  { %v5838_v2 = vpop.eup %5837  ;;  %v4146_v22 = vmul.f32 %v5836_v43, %v7816_v26 }
0x1621   :  { %v4149_v40 = vmul.f32 %v5838_v2, %v7824_v62 }
0x1622   :  { %v4154_v34 = vpack.c.bf16 %v4148_v20, %v4146_v22 }
0x1623   :  { %v4155_v54 = vpack.c.bf16 %v4149_v40, %v4147_v49 }
0x1625   :  { %4341 = vmatprep.mubr.bf16.mxu0 %v4155_v54 }
0x1626   :  { %4342 = vmatmul.mubr.bf16.gmra.mxu0 %v4154_v34 }
0x16d5   :  { %v4771_v11 = vpop.f32.mrf.mxu0 }
0x16d7   :  { %v4772_v59 = vpop.f32.mrf.mxu0 }
0x16d8   :  { %v4773_v7 = vadd.f32 %v4772_v59, %v4771_v11 }
0x16d9   :  { %v4774_v28 = vpop.f32.mrf.mxu0 }
0x16da   :  { %v4328_v1 = vadd.f32 %v4773_v7, %v4610_v23 }
0x16db   :  { %v4775_v18 = vpop.f32.mrf.mxu0 }
0x16dc   :  { %v4350_v27 = vadd.f32 %v4328_v1, %v7633_v5  ;;  %v4776_v25 = vadd.f32 %v4775_v18, %v4774_v28 }
0x16dd   :  { %v4777_v62 = vpop.f32.mrf.mxu0 }
0x16de   :  { %4356 = vst.msk [vmem:[%s7891_s18] sm:$0xff] %vm195_vm0, %v4350_v27  ;;  %v4331_v26 = vadd.f32 %v4776_v25, %v4610_v23 }
0x16df   :  { %v4778_v41 = vpop.f32.mrf.mxu0 }
0x16e0   :  { %v4351_v48 = vadd.f32 %v4331_v26, %v7638_v44  ;;  %v4779_v24 = vadd.f32 %v4778_v41, %v4777_v62 }
0x16e1   :  { %v4780_v19 = vpop.f32.mrf.mxu0 }
0x16e2   :  { %4357 = vst.msk [vmem:[%s7891_s18 + $0x8] sm:$0xff] %vm195_vm0, %v4351_v48  ;;  %v4336_v53 = vadd.f32 %v4779_v24, %v4610_v23 }
0x16e3   :  { %v4781_v5 = vpop.f32.mrf.mxu0 }
0x16e4   :  { %v4352_v55 = vadd.f32 %v4336_v53, %v7643_v14  ;;  %v4782_v50 = vadd.f32 %v4781_v5, %v4780_v19 }
0x16e6   :  { %4358 = vst.msk [vmem:[%s7891_s18 + $0x10] sm:$0xff] %vm195_vm0, %v4352_v55  ;;  %v4339_v33 = vadd.f32 %v4782_v50, %v4610_v23  ;;  %v4783_v31 = vpop.f32.mrf.mxu0 }
0x16e8   :  { %v4353_v44 = vadd.f32 %v4339_v33, %v7648_v37  ;;  %v4784_v52 = vpop.f32.mrf.mxu0 }
0x16e9   :  { %v4785_v3 = vadd.f32 %v4784_v52, %v4783_v31 }
0x16ea   :  { %4359 = vst.msk [vmem:[%s7891_s18 + $0x18] sm:$0xff] %vm195_vm0, %v4353_v44  ;;  %v4786_v35 = vpop.f32.mrf.mxu0 }
0x16eb   :  { %v4344_v16 = vadd.f32 %v4785_v3, %v4610_v23 }
0x16ec   :  { %v4787_v14 = vpop.f32.mrf.mxu0 }
0x16ed   :  { %v4354_v45 = vadd.f32 %v4344_v16, %v7653_v46  ;;  %v4788_v61 = vadd.f32 %v4787_v14, %v4786_v35 }
0x16ef   :  { %4360 = vst.msk [vmem:[%s7891_s18 + $0x20] sm:$0xff] %vm195_vm0, %v4354_v45  ;;  %v4347_v13 = vadd.f32 %v4788_v61, %v4610_v23 }
0x16f1   :  { %v4355_v37 = vadd.f32 %v4347_v13, %v7658_v17 }
0x16f3   :  { %4361 = vst.msk [vmem:[%s7891_s18 + $0x28] sm:$0xff] %vm195_vm0, %v4355_v37 }

</bundles_post_ra>
